<compile_context>
chip_gen: v6e
topology: v6e:2x2x1
jax: 0.10.0
libtpu: 0.0.40
codegen_flags: <defaults>
</compile_context>

<pallas_src>
import numpy as np

import jax
import jax.numpy as jnp
from jax.experimental import pallas as pl
from jax.experimental.pallas import tpu as pltpu

_LANE = 128


def _round_up(x, m):
    return ((x + m - 1) // m) * m


def _pad2(x, rows, cols, dtype=None):
    r, c = x.shape
    out = jnp.pad(x, ((0, rows - r), (0, cols - c)))
    return out.astype(dtype) if dtype is not None else out


# ----------------------------------------------------------------------------
# Fused kernel (whole CaCo forward in one pallas_call)
# ----------------------------------------------------------------------------
def _make_caco_kernel(n_layers, n_real, c_pad):
    """Builds the fused CaCo forward kernel (n_layers hidden GraphConvs/branch)."""

    def kernel(*refs):
        (adj_ref, g_ref, feat_ref, addf_ref, eps_a_ref, eps_b_ref) = refs[:6]
        idx = 6
        wk_hidden = refs[idx:idx + n_layers]; idx += n_layers
        wk_head_ref = refs[idx]; idx += 1
        wh_hidden = refs[idx:idx + n_layers]; idx += n_layers
        wh_head_ref = refs[idx]; idx += 1
        wzaT_ref, wzbT_ref, pack_ref, out_ref = refs[idx:idx + 4]

        def mm_bf16(a, b):
            # bf16 MXU matmul, f32 accumulation (bf16-native on v5e/v6e/v7x).
            return jnp.dot(a.astype(jnp.bfloat16), b.astype(jnp.bfloat16),
                           preferred_element_type=jnp.float32)

        def gconv(adj, h, w, activation):
            support = mm_bf16(h, w)          # h @ W
            out = mm_bf16(adj, support)      # adj @ (h @ W)
            return jnp.maximum(out, 0.0) if activation else out

        def branch(adj, x, w_hidden, w_head_ref):
            h = x
            for i in range(n_layers):        # dropout(p=0)/eval -> identity
                h = gconv(adj, h, w_hidden[i][...], activation=True)
            # Fused mean+std head: one 2*c_pad-wide MXU pass, then split.
            ms = gconv(adj, h, w_head_ref[...], activation=False)
            return ms[:, :c_pad], ms[:, c_pad:]

        adj = adj_ref[...]
        g = g_ref[...]
        a_mean, a_std = branch(adj, feat_ref[...], wk_hidden, wk_head_ref)
        s_mean, s_std = branch(g, addf_ref[...], wh_hidden, wh_head_ref)

        shape = a_mean.shape                 # (n_pad, c_pad)
        rows = jax.lax.broadcasted_iota(jnp.int32, shape, 0)
        row_mask = (rows < n_real).astype(jnp.float32)   # real nodes only
        inv_n = 1.0 / float(n_real)
        inv_nm1 = 1.0 / float(max(n_real - 1, 1))

        def head(mean, std, eps, wT_ref):
            z = mean + eps * jnp.exp(std)
            zm = z * row_mask                # mask applied once
            mu = jnp.sum(zm, axis=0, keepdims=True) * inv_n
            d = (z - mu) * row_mask          # two-pass (stable) unbiased var
            var = jnp.maximum(
                jnp.sum(d * d, axis=0, keepdims=True) * inv_nm1, 1e-12)
            zn = (z - mu) * jax.lax.rsqrt(var)   # EUP rsqrt
            # Final Linear is tiny; keep it f32 for full output fidelity.
            return jnp.dot(zn, wT_ref[...], preferred_element_type=jnp.float32)

        z1 = head(a_mean, a_std, eps_a_ref[...], wzaT_ref)
        z2 = head(s_mean, s_std, eps_b_ref[...], wzbT_ref)

        # Pack all six logical (n, n_classes) outputs into one lane-dense slab
        # via an exact 0/1 selection matmul: single unmasked store, ~6x less
        # output writeback than six separate c_pad-wide buffers.
        stacked = jnp.concatenate([z1, z2, a_mean, s_mean, a_std, s_std],
                                  axis=1)
        out_ref[...] = jnp.dot(stacked, pack_ref[...],
                               preferred_element_type=jnp.float32)

    return kernel


# ----------------------------------------------------------------------------
# One-time preparation: pad / cast / fuse weights (hoisted out of the forward)
# ----------------------------------------------------------------------------
def prepare_caco(g_adj, adj, features, add_features, params, n_layers):
    n = features.shape[0]
    n_hidden, n_classes = params["std_w"].shape

    n_pad = _round_up(n, _LANE)          # lane-dense MXU contraction dim
    h_pad = _round_up(n_hidden, _LANE)
    c_pad = _round_up(n_classes, _LANE)
    fk_pad = _round_up(features.shape[1], _LANE)
    fh_pad = _round_up(add_features.shape[1], _LANE)
    out_w = _round_up(6 * n_classes, _LANE)

    wk = params["meank"]
    wh = params["meanh"]
    assert len(wk) == n_layers + 1 and len(wh) == n_layers + 1

    bf16 = jnp.bfloat16
    adj_p = _pad2(adj.astype(jnp.float32), n_pad, n_pad, bf16)
    g_p = _pad2(g_adj.astype(jnp.float32), n_pad, n_pad, bf16)
    feat_p = _pad2(features.astype(jnp.float32), n_pad, fk_pad, bf16)
    addf_p = _pad2(add_features.astype(jnp.float32), n_pad, fh_pad, bf16)

    wk_hidden = tuple(
        [_pad2(wk[0], fk_pad, h_pad, bf16)]
        + [_pad2(w, h_pad, h_pad, bf16) for w in wk[1:n_layers]])
    wh_hidden = tuple(
        [_pad2(wh[0], fh_pad, h_pad, bf16)]
        + [_pad2(w, h_pad, h_pad, bf16) for w in wh[1:n_layers]])

    # Fused mean+std head weights: (h_pad, 2*c_pad) -> one MXU pass per branch.
    wk_head = jnp.concatenate(
        [_pad2(wk[n_layers], h_pad, c_pad, bf16),
         _pad2(params["std_w"], h_pad, c_pad, bf16)], axis=1)
    wh_head = jnp.concatenate(
        [_pad2(wh[n_layers], h_pad, c_pad, bf16),
         _pad2(params["std_w"], h_pad, c_pad, bf16)], axis=1)

    # torch Linear: y = x @ W^T (kept f32 -- tiny matmul, output fidelity).
    wzaT = _pad2(params["w_za"].T.astype(jnp.float32), c_pad, c_pad)
    wzbT = _pad2(params["w_zb"].T.astype(jnp.float32), c_pad, c_pad)

    # Exact 0/1 selector packing six n_classes-wide bands into one slab.
    pack_np = np.zeros((6 * c_pad, out_w), np.float32)
    for i in range(6):
        for j in range(n_classes):
            pack_np[i * c_pad + j, i * n_classes + j] = 1.0
    pack = jnp.asarray(pack_np)

    arrays = dict(adj=adj_p, g=g_p, feat=feat_p, addf=addf_p,
                  wk_hidden=wk_hidden, wk_head=wk_head,
                  wh_hidden=wh_hidden, wh_head=wh_head,
                  wzaT=wzaT, wzbT=wzbT, pack=pack)
    cfg = dict(n=n, n_classes=n_classes, n_layers=n_layers, n_pad=n_pad,
               h_pad=h_pad, c_pad=c_pad, fk_pad=fk_pad, fh_pad=fh_pad,
               out_w=out_w)
    return arrays, cfg


# ----------------------------------------------------------------------------
# Forward builder: single pallas_call, noise drawn over real extent, crop back
# ----------------------------------------------------------------------------
def build_caco_forward(cfg):
    n, n_classes, n_layers = cfg["n"], cfg["n_classes"], cfg["n_layers"]
    n_pad, h_pad, c_pad = cfg["n_pad"], cfg["h_pad"], cfg["c_pad"]
    fk_pad, fh_pad, out_w = cfg["fk_pad"], cfg["fh_pad"], cfg["out_w"]

    kernel = _make_caco_kernel(n_layers, n, c_pad)
    n_inputs = 6 + 2 * (n_layers + 1) + 3

    # Roofline numbers for the scheduler / scoped-VMEM budget.
    mm2 = lambda m, k, nn: 2 * m * k * nn
    flops_branch = sum(
        mm2(n_pad, d_in, h_pad) + mm2(n_pad, n_pad, h_pad)
        for d_in in [fk_pad] + [h_pad] * (n_layers - 1))
    flops_branch += mm2(n_pad, h_pad, 2 * c_pad) + mm2(n_pad, n_pad, 2 * c_pad)
    flops = 2 * flops_branch + 2 * mm2(n_pad, c_pad, c_pad) \
        + mm2(n_pad, 6 * c_pad, out_w)
    in_bytes = 2 * (2 * n_pad * n_pad + n_pad * fk_pad + n_pad * fh_pad
                    + fk_pad * h_pad + fh_pad * h_pad
                    + 2 * (n_layers - 1) * h_pad * h_pad
                    + 2 * h_pad * 2 * c_pad) \
        + 4 * (2 * n_pad * c_pad + 2 * c_pad * c_pad + 6 * c_pad * out_w)
    out_bytes = 4 * n_pad * out_w
    vmem_bytes = 2 * (in_bytes + out_bytes
                      + 4 * n_pad * (2 * h_pad + 4 * c_pad + 6 * c_pad))
    vmem_limit = int(min(max(vmem_bytes, 32 << 20), 100 << 20))

    extra = {}
    if jax.default_backend() == "tpu":
        extra = dict(
            compiler_params=pltpu.CompilerParams(vmem_limit_bytes=vmem_limit),
            cost_estimate=pl.CostEstimate(
                flops=int(flops),
                transcendentals=int(2 * n_pad * c_pad + 2 * c_pad),
                bytes_accessed=int(in_bytes + out_bytes)),
        )

    vmem = pl.BlockSpec(memory_space=pltpu.MemorySpace.VMEM)
    call = pl.pallas_call(
        kernel,
        out_shape=jax.ShapeDtypeStruct((n_pad, out_w), jnp.float32),
        in_specs=[vmem] * n_inputs,
        out_specs=vmem,
        **extra,
    )

    @jax.jit
    def forward(arrays, key):
        ka, kb = jax.random.split(key)
        # True N(0,1) noise over the REAL extent only (padding-independent),
        # generated host/XLA-side -- no TPU-only PRNG primitives in the kernel.
        eps_a = _pad2(jax.random.normal(ka, (n, n_classes), jnp.float32),
                      n_pad, c_pad)
        eps_b = _pad2(jax.random.normal(kb, (n, n_classes), jnp.float32),
                      n_pad, c_pad)
        packed = call(arrays["adj"], arrays["g"], arrays["feat"],
                      arrays["addf"], eps_a, eps_b,
                      *arrays["wk_hidden"], arrays["wk_head"],
                      *arrays["wh_hidden"], arrays["wh_head"],
                      arrays["wzaT"], arrays["wzbT"], arrays["pack"])
        # Unpack the six logical outputs from the lane-dense slab.
        return tuple(packed[:n, i * n_classes:(i + 1) * n_classes]
                     for i in range(6))   # z1, z2, A_mean, S_mean, A_std, S_std

    return forward


# ----------------------------------------------------------------------------
# Deterministic parameter construction (shapes from CaCo.__init__)
# ----------------------------------------------------------------------------
def make_params(key, input_dim, add_in_feats, n_hidden, n_classes, n_layers):
    keys = iter(jax.random.split(key, 64))

    def w(shape, scale=0.2):
        return scale * jax.random.normal(next(keys), shape, dtype=jnp.float32)

    meank = [w((input_dim, n_hidden))]
    meank += [w((n_hidden, n_hidden)) for _ in range(n_layers - 1)]
    meank += [w((n_hidden, n_classes))]

    meanh = [w((add_in_feats, n_hidden))]
    meanh += [w((n_hidden, n_hidden)) for _ in range(n_layers - 1)]
    meanh += [w((n_hidden, n_classes))]

    return {
        "meank": meank,
        "meanh": meanh,
        "std_w": w((n_hidden, n_classes)),
        "w_za": w((n_classes, n_classes)),   # torch Linear weight [out, in]
        "w_zb": w((n_classes, n_classes)),
    }


if __name__ == "__main__":
    N = 8            # number of nodes == n_samples
    INPUT_DIM = 16   # features dim (meank branch)
    ADD_IN = 12      # add_features dim (meanh branch)
    N_HIDDEN = 32
    N_CLASSES = 4
    N_LAYERS = 2     # meank/meanh each have N_LAYERS + 1 GraphConvs

    root = jax.random.PRNGKey(0)
    k_par, k_feat, k_add, k_adj, k_g, k_eps = jax.random.split(root, 6)

    params = make_params(k_par, INPUT_DIM, ADD_IN, N_HIDDEN, N_CLASSES,
                         N_LAYERS)

    features = jax.random.normal(k_feat, (N, INPUT_DIM), dtype=jnp.float32)
    add_features = jax.random.normal(k_add, (N, ADD_IN), dtype=jnp.float32)

    # Dense, row-normalized adjacencies with self loops (deterministic).
    def make_adj(k):
        a = (jax.random.uniform(k, (N, N)) > 0.5).astype(jnp.float32)
        a = a + jnp.eye(N, dtype=jnp.float32)
        return a / jnp.sum(a, axis=1, keepdims=True)

    adj = make_adj(k_adj)
    g_adj = make_adj(k_g)

    arrays, cfg = prepare_caco(g_adj, adj, features, add_features, params,
                               N_LAYERS)
    forward = build_caco_forward(cfg)

    outs = forward(arrays, k_eps)
    outs = jax.block_until_ready(outs)

    z1, z2, a_mean, s_mean, a_std, s_std = outs
    assert z1.shape == (N, N_CLASSES) and z2.shape == (N, N_CLASSES)
    assert a_mean.shape == (N, N_CLASSES) and s_std.shape == (N, N_CLASSES)
    assert all(bool(jnp.all(jnp.isfinite(o))) for o in outs)

    print("KERNEL_OK")
</pallas_src>

<mosaic_0001>
module attributes {stable_mosaic.version = 11 : i64} {
  func.func @kernel(%arg0: memref<128x128xbf16, #tpu.memory_space<vmem>>, %arg1: memref<128x128xbf16, #tpu.memory_space<vmem>>, %arg2: memref<128x128xbf16, #tpu.memory_space<vmem>>, %arg3: memref<128x128xbf16, #tpu.memory_space<vmem>>, %arg4: memref<128x128xf32, #tpu.memory_space<vmem>>, %arg5: memref<128x128xf32, #tpu.memory_space<vmem>>, %arg6: memref<128x128xbf16, #tpu.memory_space<vmem>>, %arg7: memref<128x128xbf16, #tpu.memory_space<vmem>>, %arg8: memref<128x256xbf16, #tpu.memory_space<vmem>>, %arg9: memref<128x128xbf16, #tpu.memory_space<vmem>>, %arg10: memref<128x128xbf16, #tpu.memory_space<vmem>>, %arg11: memref<128x256xbf16, #tpu.memory_space<vmem>>, %arg12: memref<128x128xf32, #tpu.memory_space<vmem>>, %arg13: memref<128x128xf32, #tpu.memory_space<vmem>>, %arg14: memref<768x128xf32, #tpu.memory_space<vmem>>, %arg15: memref<128x128xf32, #tpu.memory_space<vmem>>) attributes {dimension_semantics = [], scalar_prefetch = 0 : i64, scratch_operands = 0 : i64, tpu.core_type = #tpu.core_type<tc>} {
    %c0 = arith.constant 0 : index
    %c0_0 = arith.constant 0 : index
    %0 = vector.load %arg0[%c0, %c0_0] : memref<128x128xbf16, #tpu.memory_space<vmem>>, vector<128x128xbf16>
    %c0_1 = arith.constant 0 : index
    %c0_2 = arith.constant 0 : index
    %1 = vector.load %arg1[%c0_1, %c0_2] : memref<128x128xbf16, #tpu.memory_space<vmem>>, vector<128x128xbf16>
    %c0_3 = arith.constant 0 : index
    %c0_4 = arith.constant 0 : index
    %2 = vector.load %arg2[%c0_3, %c0_4] : memref<128x128xbf16, #tpu.memory_space<vmem>>, vector<128x128xbf16>
    %c0_5 = arith.constant 0 : index
    %c0_6 = arith.constant 0 : index
    %3 = vector.load %arg6[%c0_5, %c0_6] : memref<128x128xbf16, #tpu.memory_space<vmem>>, vector<128x128xbf16>
    %cst = arith.constant dense<0.000000e+00> : vector<128x128xf32>
    %4 = tpu.matmul %2, %3, %cst {dimension_numbers = #tpu.dot_dimension_numbers<[1], [0], [0], [1], [0, 0, 1, 1], [], []>} : vector<128x128xbf16>, vector<128x128xbf16>, vector<128x128xf32> -> vector<128x128xf32>
    %5 = arith.truncf %4 : vector<128x128xf32> to vector<128x128xbf16>
    %cst_7 = arith.constant dense<0.000000e+00> : vector<128x128xf32>
    %6 = tpu.matmul %0, %5, %cst_7 {dimension_numbers = #tpu.dot_dimension_numbers<[1], [0], [0], [1], [0, 0, 1, 1], [], []>} : vector<128x128xbf16>, vector<128x128xbf16>, vector<128x128xf32> -> vector<128x128xf32>
    %cst_8 = arith.constant 0.000000e+00 : f32
    %7 = vector.broadcast %cst_8 : f32 to vector<128x128xf32>
    %8 = arith.maximumf %6, %7 : vector<128x128xf32>
    %c0_9 = arith.constant 0 : index
    %c0_10 = arith.constant 0 : index
    %9 = vector.load %arg7[%c0_9, %c0_10] : memref<128x128xbf16, #tpu.memory_space<vmem>>, vector<128x128xbf16>
    %10 = arith.truncf %8 : vector<128x128xf32> to vector<128x128xbf16>
    %cst_11 = arith.constant dense<0.000000e+00> : vector<128x128xf32>
    %11 = tpu.matmul %10, %9, %cst_11 {dimension_numbers = #tpu.dot_dimension_numbers<[1], [0], [0], [1], [0, 0, 1, 1], [], []>} : vector<128x128xbf16>, vector<128x128xbf16>, vector<128x128xf32> -> vector<128x128xf32>
    %12 = arith.truncf %11 : vector<128x128xf32> to vector<128x128xbf16>
    %cst_12 = arith.constant dense<0.000000e+00> : vector<128x128xf32>
    %13 = tpu.matmul %0, %12, %cst_12 {dimension_numbers = #tpu.dot_dimension_numbers<[1], [0], [0], [1], [0, 0, 1, 1], [], []>} : vector<128x128xbf16>, vector<128x128xbf16>, vector<128x128xf32> -> vector<128x128xf32>
    %cst_13 = arith.constant 0.000000e+00 : f32
    %14 = vector.broadcast %cst_13 : f32 to vector<128x128xf32>
    %15 = arith.maximumf %13, %14 : vector<128x128xf32>
    %c0_14 = arith.constant 0 : index
    %c0_15 = arith.constant 0 : index
    %16 = vector.load %arg8[%c0_14, %c0_15] : memref<128x256xbf16, #tpu.memory_space<vmem>>, vector<128x256xbf16>
    %17 = arith.truncf %15 : vector<128x128xf32> to vector<128x128xbf16>
    %cst_16 = arith.constant dense<0.000000e+00> : vector<128x256xf32>
    %18 = tpu.matmul %17, %16, %cst_16 {dimension_numbers = #tpu.dot_dimension_numbers<[1], [0], [0], [1], [0, 0, 1, 1], [], []>} : vector<128x128xbf16>, vector<128x256xbf16>, vector<128x256xf32> -> vector<128x256xf32>
    %19 = arith.truncf %18 : vector<128x256xf32> to vector<128x256xbf16>
    %cst_17 = arith.constant dense<0.000000e+00> : vector<128x256xf32>
    %20 = tpu.matmul %0, %19, %cst_17 {dimension_numbers = #tpu.dot_dimension_numbers<[1], [0], [0], [1], [0, 0, 1, 1], [], []>} : vector<128x128xbf16>, vector<128x256xbf16>, vector<128x256xf32> -> vector<128x256xf32>
    %21 = vector.extract_strided_slice %20 {offsets = [0, 0], sizes = [128, 128], strides = [1, 1]} : vector<128x256xf32> to vector<128x128xf32>
    %22 = vector.extract_strided_slice %20 {offsets = [0, 128], sizes = [128, 128], strides = [1, 1]} : vector<128x256xf32> to vector<128x128xf32>
    %c0_18 = arith.constant 0 : index
    %c0_19 = arith.constant 0 : index
    %23 = vector.load %arg3[%c0_18, %c0_19] : memref<128x128xbf16, #tpu.memory_space<vmem>>, vector<128x128xbf16>
    %c0_20 = arith.constant 0 : index
    %c0_21 = arith.constant 0 : index
    %24 = vector.load %arg9[%c0_20, %c0_21] : memref<128x128xbf16, #tpu.memory_space<vmem>>, vector<128x128xbf16>
    %cst_22 = arith.constant dense<0.000000e+00> : vector<128x128xf32>
    %25 = tpu.matmul %23, %24, %cst_22 {dimension_numbers = #tpu.dot_dimension_numbers<[1], [0], [0], [1], [0, 0, 1, 1], [], []>} : vector<128x128xbf16>, vector<128x128xbf16>, vector<128x128xf32> -> vector<128x128xf32>
    %26 = arith.truncf %25 : vector<128x128xf32> to vector<128x128xbf16>
    %cst_23 = arith.constant dense<0.000000e+00> : vector<128x128xf32>
    %27 = tpu.matmul %1, %26, %cst_23 {dimension_numbers = #tpu.dot_dimension_numbers<[1], [0], [0], [1], [0, 0, 1, 1], [], []>} : vector<128x128xbf16>, vector<128x128xbf16>, vector<128x128xf32> -> vector<128x128xf32>
    %cst_24 = arith.constant 0.000000e+00 : f32
    %28 = vector.broadcast %cst_24 : f32 to vector<128x128xf32>
    %29 = arith.maximumf %27, %28 : vector<128x128xf32>
    %c0_25 = arith.constant 0 : index
    %c0_26 = arith.constant 0 : index
    %30 = vector.load %arg10[%c0_25, %c0_26] : memref<128x128xbf16, #tpu.memory_space<vmem>>, vector<128x128xbf16>
    %31 = arith.truncf %29 : vector<128x128xf32> to vector<128x128xbf16>
    %cst_27 = arith.constant dense<0.000000e+00> : vector<128x128xf32>
    %32 = tpu.matmul %31, %30, %cst_27 {dimension_numbers = #tpu.dot_dimension_numbers<[1], [0], [0], [1], [0, 0, 1, 1], [], []>} : vector<128x128xbf16>, vector<128x128xbf16>, vector<128x128xf32> -> vector<128x128xf32>
    %33 = arith.truncf %32 : vector<128x128xf32> to vector<128x128xbf16>
    %cst_28 = arith.constant dense<0.000000e+00> : vector<128x128xf32>
    %34 = tpu.matmul %1, %33, %cst_28 {dimension_numbers = #tpu.dot_dimension_numbers<[1], [0], [0], [1], [0, 0, 1, 1], [], []>} : vector<128x128xbf16>, vector<128x128xbf16>, vector<128x128xf32> -> vector<128x128xf32>
    %cst_29 = arith.constant 0.000000e+00 : f32
    %35 = vector.broadcast %cst_29 : f32 to vector<128x128xf32>
    %36 = arith.maximumf %34, %35 : vector<128x128xf32>
    %c0_30 = arith.constant 0 : index
    %c0_31 = arith.constant 0 : index
    %37 = vector.load %arg11[%c0_30, %c0_31] : memref<128x256xbf16, #tpu.memory_space<vmem>>, vector<128x256xbf16>
    %38 = arith.truncf %36 : vector<128x128xf32> to vector<128x128xbf16>
    %cst_32 = arith.constant dense<0.000000e+00> : vector<128x256xf32>
    %39 = tpu.matmul %38, %37, %cst_32 {dimension_numbers = #tpu.dot_dimension_numbers<[1], [0], [0], [1], [0, 0, 1, 1], [], []>} : vector<128x128xbf16>, vector<128x256xbf16>, vector<128x256xf32> -> vector<128x256xf32>
    %40 = arith.truncf %39 : vector<128x256xf32> to vector<128x256xbf16>
    %cst_33 = arith.constant dense<0.000000e+00> : vector<128x256xf32>
    %41 = tpu.matmul %1, %40, %cst_33 {dimension_numbers = #tpu.dot_dimension_numbers<[1], [0], [0], [1], [0, 0, 1, 1], [], []>} : vector<128x128xbf16>, vector<128x256xbf16>, vector<128x256xf32> -> vector<128x256xf32>
    %42 = vector.extract_strided_slice %41 {offsets = [0, 0], sizes = [128, 128], strides = [1, 1]} : vector<128x256xf32> to vector<128x128xf32>
    %43 = vector.extract_strided_slice %41 {offsets = [0, 128], sizes = [128, 128], strides = [1, 1]} : vector<128x256xf32> to vector<128x128xf32>
    %44 = tpu.iota {dimensions = array<i32: 0>} : vector<128x128xi32>
    %c8_i32 = arith.constant 8 : i32
    %45 = vector.broadcast %c8_i32 : i32 to vector<128x128xi32>
    %46 = arith.cmpi slt, %44, %45 : vector<128x128xi32>
    %47 = arith.extui %46 : vector<128x128xi1> to vector<128x128xi32>
    %48 = arith.sitofp %47 : vector<128x128xi32> to vector<128x128xf32>
    %c0_34 = arith.constant 0 : index
    %c0_35 = arith.constant 0 : index
    %49 = vector.load %arg4[%c0_34, %c0_35] : memref<128x128xf32, #tpu.memory_space<vmem>>, vector<128x128xf32>
    %50 = math.exp %22 : vector<128x128xf32>
    %51 = arith.mulf %49, %50 : vector<128x128xf32>
    %52 = arith.addf %21, %51 : vector<128x128xf32>
    %53 = arith.mulf %52, %48 : vector<128x128xf32>
    %cst_36 = arith.constant dense<0.000000e+00> : vector<128xf32>
    %54 = vector.multi_reduction <add>, %53, %cst_36 [0] : vector<128x128xf32> to vector<128xf32>
    %55 = vector.shape_cast %54 : vector<128xf32> to vector<1x128xf32>
    %cst_37 = arith.constant 1.250000e-01 : f32
    %56 = vector.broadcast %cst_37 : f32 to vector<1x128xf32>
    %57 = arith.mulf %55, %56 : vector<1x128xf32>
    %58 = vector.broadcast %57 : vector<1x128xf32> to vector<128x128xf32>
    %59 = arith.subf %52, %58 : vector<128x128xf32>
    %60 = arith.mulf %59, %48 : vector<128x128xf32>
    %61 = arith.mulf %60, %60 : vector<128x128xf32>
    %cst_38 = arith.constant dense<0.000000e+00> : vector<128xf32>
    %62 = vector.multi_reduction <add>, %61, %cst_38 [0] : vector<128x128xf32> to vector<128xf32>
    %63 = vector.shape_cast %62 : vector<128xf32> to vector<1x128xf32>
    %cst_39 = arith.constant 0.142857149 : f32
    %64 = vector.broadcast %cst_39 : f32 to vector<1x128xf32>
    %65 = arith.mulf %63, %64 : vector<1x128xf32>
    %cst_40 = arith.constant 9.99999996E-13 : f32
    %66 = vector.broadcast %cst_40 : f32 to vector<1x128xf32>
    %67 = arith.maximumf %65, %66 : vector<1x128xf32>
    %68 = vector.broadcast %57 : vector<1x128xf32> to vector<128x128xf32>
    %69 = arith.subf %52, %68 : vector<128x128xf32>
    %70 = math.rsqrt %67 : vector<1x128xf32>
    %71 = vector.broadcast %70 : vector<1x128xf32> to vector<128x128xf32>
    %72 = arith.mulf %69, %71 : vector<128x128xf32>
    %c0_41 = arith.constant 0 : index
    %c0_42 = arith.constant 0 : index
    %73 = vector.load %arg12[%c0_41, %c0_42] : memref<128x128xf32, #tpu.memory_space<vmem>>, vector<128x128xf32>
    %cst_43 = arith.constant dense<0.000000e+00> : vector<128x128xf32>
    %74 = tpu.matmul %72, %73, %cst_43 {dimension_numbers = #tpu.dot_dimension_numbers<[1], [0], [0], [1], [0, 0, 1, 1], [], []>} : vector<128x128xf32>, vector<128x128xf32>, vector<128x128xf32> -> vector<128x128xf32>
    %c0_44 = arith.constant 0 : index
    %c0_45 = arith.constant 0 : index
    %75 = vector.load %arg5[%c0_44, %c0_45] : memref<128x128xf32, #tpu.memory_space<vmem>>, vector<128x128xf32>
    %76 = math.exp %43 : vector<128x128xf32>
    %77 = arith.mulf %75, %76 : vector<128x128xf32>
    %78 = arith.addf %42, %77 : vector<128x128xf32>
    %79 = arith.mulf %78, %48 : vector<128x128xf32>
    %cst_46 = arith.constant dense<0.000000e+00> : vector<128xf32>
    %80 = vector.multi_reduction <add>, %79, %cst_46 [0] : vector<128x128xf32> to vector<128xf32>
    %81 = vector.shape_cast %80 : vector<128xf32> to vector<1x128xf32>
    %cst_47 = arith.constant 1.250000e-01 : f32
    %82 = vector.broadcast %cst_47 : f32 to vector<1x128xf32>
    %83 = arith.mulf %81, %82 : vector<1x128xf32>
    %84 = vector.broadcast %83 : vector<1x128xf32> to vector<128x128xf32>
    %85 = arith.subf %78, %84 : vector<128x128xf32>
    %86 = arith.mulf %85, %48 : vector<128x128xf32>
    %87 = arith.mulf %86, %86 : vector<128x128xf32>
    %cst_48 = arith.constant dense<0.000000e+00> : vector<128xf32>
    %88 = vector.multi_reduction <add>, %87, %cst_48 [0] : vector<128x128xf32> to vector<128xf32>
    %89 = vector.shape_cast %88 : vector<128xf32> to vector<1x128xf32>
    %cst_49 = arith.constant 0.142857149 : f32
    %90 = vector.broadcast %cst_49 : f32 to vector<1x128xf32>
    %91 = arith.mulf %89, %90 : vector<1x128xf32>
    %cst_50 = arith.constant 9.99999996E-13 : f32
    %92 = vector.broadcast %cst_50 : f32 to vector<1x128xf32>
    %93 = arith.maximumf %91, %92 : vector<1x128xf32>
    %94 = vector.broadcast %83 : vector<1x128xf32> to vector<128x128xf32>
    %95 = arith.subf %78, %94 : vector<128x128xf32>
    %96 = math.rsqrt %93 : vector<1x128xf32>
    %97 = vector.broadcast %96 : vector<1x128xf32> to vector<128x128xf32>
    %98 = arith.mulf %95, %97 : vector<128x128xf32>
    %c0_51 = arith.constant 0 : index
    %c0_52 = arith.constant 0 : index
    %99 = vector.load %arg13[%c0_51, %c0_52] : memref<128x128xf32, #tpu.memory_space<vmem>>, vector<128x128xf32>
    %cst_53 = arith.constant dense<0.000000e+00> : vector<128x128xf32>
    %100 = tpu.matmul %98, %99, %cst_53 {dimension_numbers = #tpu.dot_dimension_numbers<[1], [0], [0], [1], [0, 0, 1, 1], [], []>} : vector<128x128xf32>, vector<128x128xf32>, vector<128x128xf32> -> vector<128x128xf32>
    %101 = tpu.concatenate %74, %100, %21, %42, %22, %43 in 1 : vector<128x128xf32>, vector<128x128xf32>, vector<128x128xf32>, vector<128x128xf32>, vector<128x128xf32>, vector<128x128xf32> -> vector<128x768xf32>
    %c0_54 = arith.constant 0 : index
    %c0_55 = arith.constant 0 : index
    %102 = vector.load %arg14[%c0_54, %c0_55] : memref<768x128xf32, #tpu.memory_space<vmem>>, vector<768x128xf32>
    %cst_56 = arith.constant dense<0.000000e+00> : vector<128x128xf32>
    %103 = tpu.matmul %101, %102, %cst_56 {dimension_numbers = #tpu.dot_dimension_numbers<[1], [0], [0], [1], [0, 0, 1, 1], [], []>} : vector<128x768xf32>, vector<768x128xf32>, vector<128x128xf32> -> vector<128x128xf32>
    %c0_57 = arith.constant 0 : index
    %c0_58 = arith.constant 0 : index
    %104 = vector.load %arg15[%c0_57, %c0_58] : memref<128x128xf32, #tpu.memory_space<vmem>>, vector<128x128xf32>
    tpu.vector_store %arg15[%c0_57, %c0_58], %103 {strides = array<i32>} : memref<128x128xf32, #tpu.memory_space<vmem>>, vector<128x128xf32>,
    return
  }
}

</mosaic_0001>

<bundles_post_ra>
// kernel: forward.1
= control target key start
LH: loop header
LB: loop body
LE: loop exit
PB: predicated region body
PF: predicated region fallthrough
CT: control target
= control target key end

     0   :  { %20 = vsyncpa [#allocation3], 0  ;;  %s6146_s0 = inlined_call_operand.hbm [shape: bf16[128,128], index: 0, kind: input, shape index: {}]   ;;  %s6147_s1 = inlined_call_operand.hbm [shape: bf16[128,128], index: 1, kind: input, shape index: {}]   ;;  %s6148_s2 = inlined_call_operand.hbm [shape: bf16[128,128], index: 2, kind: input, shape index: {}]   ;;  %s6149_s3 = inlined_call_operand.hbm [shape: bf16[128,128], index: 3, kind: input, shape index: {}]   ;;  %s6150_s4 = inlined_call_operand.vmem [shape: f32[128,128], index: 4, kind: input, shape index: {}]   ;;  %s6151_s5 = inlined_call_operand.vmem [shape: f32[128,128], index: 5, kind: input, shape index: {}]   ;;  %s6152_s6 = inlined_call_operand.hbm [shape: bf16[128,128], index: 6, kind: input, shape index: {}]   ;;  %s6153_s7 = inlined_call_operand.hbm [shape: bf16[128,128], index: 7, kind: input, shape index: {}]   ;;  %s6154_s8 = inlined_call_operand.vmem [shape: bf16[128,256], index: 8, kind: input, shape index: {}]   ;;  %s6155_s9 = inlined_call_operand.hbm [shape: bf16[128,128], index: 9, kind: input, shape index: {}]   ;;  %s6156_s10 = inlined_call_operand.hbm [shape: bf16[128,128], index: 10, kind: input, shape index: {}]   ;;  %s6157_s11 = inlined_call_operand.vmem [shape: bf16[128,256], index: 11, kind: input, shape index: {}]   ;;  %s6158_s12 = inlined_call_operand.vmem [shape: f32[128,128], index: 12, kind: input, shape index: {}]   ;;  %s6159_s13 = inlined_call_operand.hbm [shape: f32[128,128], index: 13, kind: input, shape index: {}]   ;;  %s6160_s14 = inlined_call_operand.hbm [shape: f32[768,128], index: 14, kind: input, shape index: {}]   ;;  %s6161_s15 = inlined_call_operand.vmem [shape: f32[128,128], index: 15, kind: output, shape index: {}]  }
   0x1   :  { %21 = vsyncpa [#allocation5], 0 }
   0x2   :  { %22 = vsyncpa [#allocation8], 0 }
   0x3   :  { %23 = vsyncpa [#allocation11], 0 }
   0x4   :  { %24 = vsyncpa [#allocation14], 0 }
   0x5   :  { %25 = vsyncpa [#allocation17], 0  ;;  %s4946_s18 = smov [#allocation4]   ;;  %s4947_s20 = smov [#allocation7]  }
   0x6   :  { %s43_s19 = sshll.u32 %s4946_s18, 4  ;;  %s67_s21 = sshll.u32 %s4947_s20, 4  ;;  %s44_s19 = int_to_ptr.vmem [resolvable:$true] %s43_s19  ;;  %s68_s21 = int_to_ptr.vmem [resolvable:$true] %s67_s21 }
   0x7   :  { %s4742_s22 = scalar_lea.vmem %s44_s19, 1024  ;;  %p4747_p1 = scmp.lt.s32.totalorder %s44_s19, %s44_s19 }
   0x8   :  { %p4743_p0 = scmp.ne.s32.totalorder %s44_s19, %s4742_s22  ;;  %p4748_p2 = scmp.lt.s32.totalorder %s4742_s22, %s4742_s22 }
   0xa   :  { %p4749_p3 = por %p4748_p2, %p4747_p1 }
   0xc   :  { %p4750_p4 = pnand %p4749_p3, %p4743_p0 }
   0xe   :  { %4753 = shalt.err (!%p4750_p4)
}
   0xf   :  { %s4948_s23 = smov 64   ;;  %s4949_s24 = smov 4  }
  0x10   :  { %49 = dma.hbm_to_vmem [thread:$0]  %s6147_s1, 1024, %s44_s19, [#allocation5], %s4948_s23, %s4948_s23, %s4949_s24  }
  0x11   :  { %s4762_s27 = scalar_lea.vmem %s68_s21, 1024  ;;  %p4767_p6 = scmp.lt.s32.totalorder %s68_s21, %s68_s21 }
  0x12   :  { %p4763_p5 = scmp.ne.s32.totalorder %s68_s21, %s4762_s27  ;;  %p4768_p7 = scmp.lt.s32.totalorder %s4762_s27, %s4762_s27 }
  0x14   :  { %p4769_p8 = por %p4768_p7, %p4767_p6 }
  0x16   :  { %p4770_p9 = pnand %p4769_p8, %p4763_p5 }
  0x18   :  { %4773 = shalt.err (!%p4770_p9)
}
  0x19   :  { %73 = dma.hbm_to_vmem [thread:$0]  %s6149_s3, 1024, %s68_s21, [#allocation8], %s4948_s23, %s4948_s23, %s4949_s24  }
  0x1a   :  { %s4950_s30 = smov [#allocation10]   ;;  %s4951_s17 = smov [#allocation13]  }
  0x1b   :  { %s95_s16 = sshll.u32 %s4950_s30, 4  ;;  %s121_s18 = sshll.u32 %s4951_s17, 4  ;;  %s96_s16 = int_to_ptr.vmem [resolvable:$true] %s95_s16  ;;  %s122_s18 = int_to_ptr.vmem [resolvable:$true] %s121_s18 }
  0x1c   :  { %s4782_s1 = scalar_lea.vmem %s96_s16, 1024  ;;  %p4787_p11 = scmp.lt.s32.totalorder %s96_s16, %s96_s16 }
  0x1d   :  { %p4783_p10 = scmp.ne.s32.totalorder %s96_s16, %s4782_s1  ;;  %p4788_p12 = scmp.lt.s32.totalorder %s4782_s1, %s4782_s1 }
  0x1f   :  { %p4789_p13 = por %p4788_p12, %p4787_p11 }
  0x21   :  { %p4790_p0 = pnand %p4789_p13, %p4783_p10 }
  0x23   :  { %4793 = shalt.err (!%p4790_p0)
}
  0x24   :  { %101 = dma.hbm_to_vmem [thread:$0]  %s6153_s7, 1024, %s96_s16, [#allocation11], %s4948_s23, %s4948_s23, %s4949_s24  }
  0x25   :  { %s4802_s3 = scalar_lea.vmem %s122_s18, 1024  ;;  %p4807_p2 = scmp.lt.s32.totalorder %s122_s18, %s122_s18 }
  0x26   :  { %p4803_p1 = scmp.ne.s32.totalorder %s122_s18, %s4802_s3  ;;  %p4808_p3 = scmp.lt.s32.totalorder %s4802_s3, %s4802_s3 }
  0x28   :  { %p4809_p4 = por %p4808_p3, %p4807_p2 }
  0x2a   :  { %p4810_p5 = pnand %p4809_p4, %p4803_p1 }
  0x2c   :  { %4813 = shalt.err (!%p4810_p5)
}
  0x2d   :  { %127 = dma.hbm_to_vmem [thread:$0]  %s6156_s10, 1024, %s122_s18, [#allocation14], %s4948_s23, %s4948_s23, %s4949_s24  }
  0x2e   :  { %s4952_s25 = smov [#allocation2]   ;;  %s4953_s27 = smov [#allocation6]  }
  0x2f   :  { %s31_s26 = sshll.u32 %s4952_s25, 4  ;;  %s55_s28 = sshll.u32 %s4953_s27, 4  ;;  %s32_s26 = int_to_ptr.vmem [resolvable:$true] %s31_s26  ;;  %s56_s28 = int_to_ptr.vmem [resolvable:$true] %s55_s28 }
  0x30   :  { %s4822_s7 = scalar_lea.vmem %s32_s26, 1024  ;;  %p4827_p7 = scmp.lt.s32.totalorder %s32_s26, %s32_s26 }
  0x31   :  { %p4823_p6 = scmp.ne.s32.totalorder %s32_s26, %s4822_s7  ;;  %p4828_p8 = scmp.lt.s32.totalorder %s4822_s7, %s4822_s7 }
  0x33   :  { %p4829_p9 = por %p4828_p8, %p4827_p7 }
  0x35   :  { %p4830_p10 = pnand %p4829_p9, %p4823_p6 }
  0x37   :  { %4833 = shalt.err (!%p4830_p10)
}
  0x38   :  { %37 = dma.hbm_to_vmem [thread:$0]  %s6146_s0, 1024, %s32_s26, [#allocation3], %s4948_s23, %s4948_s23, %s4949_s24  }
  0x39   :  { %s4842_s10 = scalar_lea.vmem %s56_s28, 1024  ;;  %p4847_p12 = scmp.lt.s32.totalorder %s56_s28, %s56_s28 }
  0x3a   :  { %p4843_p11 = scmp.ne.s32.totalorder %s56_s28, %s4842_s10  ;;  %p4848_p13 = scmp.lt.s32.totalorder %s4842_s10, %s4842_s10 }
  0x3c   :  { %p4849_p0 = por %p4848_p13, %p4847_p12 }
  0x3e   :  { %p4850_p1 = pnand %p4849_p0, %p4843_p11 }
  0x40   :  { %4853 = shalt.err (!%p4850_p1)
}
  0x41   :  { %61 = dma.hbm_to_vmem [thread:$0]  %s6148_s2, 1024, %s56_s28, [#allocation5], %s4948_s23, %s4948_s23, %s4949_s24  }
  0x42   :  { %s4954_s18 = smov [#allocation9]   ;;  %s4955_s19 = smov [#allocation12]  }
  0x43   :  { %s83_s1 = sshll.u32 %s4954_s18, 4  ;;  %s109_s20 = sshll.u32 %s4955_s19, 4  ;;  %s84_s1 = int_to_ptr.vmem [resolvable:$true] %s83_s1  ;;  %s110_s20 = int_to_ptr.vmem [resolvable:$true] %s109_s20 }
  0x44   :  { %s4862_s0 = scalar_lea.vmem %s84_s1, 1024  ;;  %p4867_p3 = scmp.lt.s32.totalorder %s84_s1, %s84_s1 }
  0x45   :  { %p4863_p2 = scmp.ne.s32.totalorder %s84_s1, %s4862_s0  ;;  %p4868_p4 = scmp.lt.s32.totalorder %s4862_s0, %s4862_s0 }
  0x47   :  { %p4869_p5 = por %p4868_p4, %p4867_p3 }
  0x49   :  { %p4870_p6 = pnand %p4869_p5, %p4863_p2 }
  0x4b   :  { %4873 = shalt.err (!%p4870_p6)
}
  0x4c   :  { %89 = dma.hbm_to_vmem [thread:$0]  %s6152_s6, 1024, %s84_s1, [#allocation8], %s4948_s23, %s4948_s23, %s4949_s24  }
  0x4d   :  { %s4882_s2 = scalar_lea.vmem %s110_s20, 1024  ;;  %p4887_p8 = scmp.lt.s32.totalorder %s110_s20, %s110_s20 }
  0x4e   :  { %p4883_p7 = scmp.ne.s32.totalorder %s110_s20, %s4882_s2  ;;  %p4888_p9 = scmp.lt.s32.totalorder %s4882_s2, %s4882_s2 }
  0x50   :  { %p4889_p10 = por %p4888_p9, %p4887_p8 }
  0x52   :  { %p4890_p11 = pnand %p4889_p10, %p4883_p7 }
  0x54   :  { %4893 = shalt.err (!%p4890_p11)
}
  0x55   :  { %115 = dma.hbm_to_vmem [thread:$0]  %s6155_s9, 1024, %s110_s20, [#allocation11], %s4948_s23, %s4948_s23, %s4949_s24  }
  0x56   :  { %s4956_s26 = smov [#allocation15]  }
  0x57   :  { %s137_s27 = sshll.u32 %s4956_s26, 4  ;;  %s138_s27 = int_to_ptr.vmem [resolvable:$true] %s137_s27 }
  0x58   :  { %s4902_s28 = scalar_lea.vmem %s138_s27, 2048  ;;  %p4907_p13 = scmp.lt.s32.totalorder %s138_s27, %s138_s27 }
  0x59   :  { %p4903_p12 = scmp.ne.s32.totalorder %s138_s27, %s4902_s28  ;;  %p4908_p0 = scmp.lt.s32.totalorder %s4902_s28, %s4902_s28 }
  0x5b   :  { %p4909_p1 = por %p4908_p0, %p4907_p13 }
  0x5d   :  { %p4910_p2 = pnand %p4909_p1, %p4903_p12 }
  0x5f   :  { %4913 = shalt.err (!%p4910_p2)
}
  0x60   :  { %s4957_s6 = smov 128   ;;  %s4958_s7 = smov 8  }
  0x61   :  { %143 = dma.hbm_to_vmem [thread:$0]  %s6159_s13, 2048, %s138_s27, [#allocation14], %s4957_s6, %s4957_s6, %s4958_s7  }
  0x62   :  { %s4959_s10 = smov [#allocation16]  }
  0x63   :  { %s149_s16 = sshll.u32 %s4959_s10, 4  ;;  %s150_s16 = int_to_ptr.vmem [resolvable:$true] %s149_s16 }
  0x64   :  { %s4922_s9 = scalar_lea.vmem %s150_s16, 12288  ;;  %p4927_p4 = scmp.lt.s32.totalorder %s150_s16, %s150_s16 }
  0x65   :  { %p4923_p3 = scmp.ne.s32.totalorder %s150_s16, %s4922_s9  ;;  %p4928_p5 = scmp.lt.s32.totalorder %s4922_s9, %s4922_s9 }
  0x67   :  { %p4929_p6 = por %p4928_p5, %p4927_p4 }
  0x69   :  { %p4930_p7 = pnand %p4929_p6, %p4923_p3 }
  0x6b   :  { %4933 = shalt.err (!%p4930_p7)
}
  0x6c   :  { %155 = dma.hbm_to_vmem [thread:$0]  %s6160_s14, 12288, %s150_s16, [#allocation17], %s4957_s6, %s4957_s6, %s4958_s7  }
  0x6d   :  { %4934 = dma.done.wait [#allocation3], 1024  }
  0x6e   :  { %4935 = vsyncadd [#allocation3], 4294966272 }
  0x6f   :  { %4936 = dma.done.wait [#allocation5], 2048  }
  0x70   :  { %4937 = vsyncadd [#allocation5], 4294965248 }
  0x71   :  { %4938 = dma.done.wait [#allocation8], 2048  }
  0x72   :  { %4939 = vsyncadd [#allocation8], 4294965248 }
  0x73   :  { %4940 = dma.done.wait [#allocation11], 2048  }
  0x74   :  { %4941 = vsyncadd [#allocation11], 4294965248 }
  0x75   :  { %4942 = dma.done.wait [#allocation14], 3072  }
  0x76   :  { %4943 = vsyncadd [#allocation14], 4294964224 }
  0x77   :  { %4944 = dma.done.wait [#allocation17], 12288  }
  0x78   :  { %4945 = vsyncadd [#allocation17], 4294955008  ;;  %v4546_v0 = vld [vmem:[#allocation9 + $0x38] sm:$0xff]   ;;  %v4547_v1 = vld [vmem:[#allocation9 + $0x30] sm:$0xff]  }
  0x79   :  { %4163 = vmatprep.subr.bf16.mxu1 %v4546_v0  ;;  %v4548_v2 = vld [vmem:[#allocation9 + $0x28] sm:$0xff]   ;;  %v4549_v3 = vld [vmem:[#allocation9 + $0x20] sm:$0xff]   ;;  %v4550_v5 = vld [vmem:[#allocation9 + $0x18] sm:$0xff]  }
  0x7a   :  { %4164 = vmatpush3.bf16.msra.mxu1 %v4546_v0  ;;  %v4554_v4 = vld [vmem:[#allocation6] sm:$0xff]   ;;  %v4551_v6 = vld [vmem:[#allocation9 + $0x10] sm:$0xff]   ;;  %v4552_v7 = vld [vmem:[#allocation9 + $0x8] sm:$0xff]  }
  0x7b   :  { %4165 = vmatprep.subr.bf16.mxu1 %v4547_v1  ;;  %4179 = vmatprep.mubr.bf16.mxu1 %v4554_v4  ;;  %v4553_v8 = vld [vmem:[#allocation9] sm:$0xff]   ;;  %v4555_v9 = vld [vmem:[#allocation6 + $0x8] sm:$0xff]   ;;  %v4556_v10 = vld [vmem:[#allocation6 + $0x10] sm:$0xff]  }
  0x7c   :  { %v4557_v11 = vld [vmem:[#allocation6 + $0x18] sm:$0xff]   ;;  %v4558_v12 = vld [vmem:[#allocation6 + $0x20] sm:$0xff]   ;;  %v4559_v13 = vld [vmem:[#allocation6 + $0x28] sm:$0xff]  }
  0x7d   :  { %v4560_v14 = vld [vmem:[#allocation6 + $0x30] sm:$0xff]   ;;  %v4561_v15 = vld [vmem:[#allocation6 + $0x38] sm:$0xff]   ;;  %v5095_v16 = vld [vmem:[#allocation2] sm:$0xff]  }
  0x7e   :  { %4166 = vmatpush3.bf16.msra.mxu1 %v4547_v1  ;;  %v4570_v17 = vld [vmem:[#allocation10 + $0x38] sm:$0xff]   ;;  %v4571_v18 = vld [vmem:[#allocation10 + $0x30] sm:$0xff]   ;;  %v4572_v19 = vld [vmem:[#allocation10 + $0x28] sm:$0xff]  }
  0x7f   :  { %4167 = vmatprep.subr.bf16.mxu1 %v4548_v2  ;;  %4227 = vmatprep.subr.bf16.mxu0 %v4570_v17  ;;  %v4573_v20 = vld [vmem:[#allocation10 + $0x20] sm:$0xff]   ;;  %v4574_v21 = vld [vmem:[#allocation10 + $0x18] sm:$0xff]   ;;  %v5098_v46 = vld [vmem:[#allocation2 + $0x8] sm:$0xff]  }
  0x80   :  { %4228 = vmatpush3.bf16.msra.mxu0 %v4570_v17  ;;  %v5100_v47 = vld [vmem:[#allocation2 + $0x10] sm:$0xff]   ;;  %v5104_v48 = vld [vmem:[#allocation2 + $0x18] sm:$0xff]   ;;  %v5106_v49 = vld [vmem:[#allocation2 + $0x20] sm:$0xff]  }
  0x81   :  { %4229 = vmatprep.subr.bf16.mxu0 %v4571_v18  ;;  %v5110_v50 = vld [vmem:[#allocation2 + $0x28] sm:$0xff]   ;;  %v5112_v51 = vld [vmem:[#allocation2 + $0x30] sm:$0xff]   ;;  %v5116_v52 = vld [vmem:[#allocation2 + $0x38] sm:$0xff]  }
  0x82   :  { %4168 = vmatpush3.bf16.msra.mxu1 %v4548_v2  ;;  %v4575_v53 = vld [vmem:[#allocation10 + $0x10] sm:$0xff]   ;;  %v4576_v54 = vld [vmem:[#allocation10 + $0x8] sm:$0xff]   ;;  %v4577_v55 = vld [vmem:[#allocation10] sm:$0xff]  }
  0x83   :  { %4169 = vmatprep.subr.bf16.mxu1 %v4549_v3 }
  0x84   :  { %4230 = vmatpush3.bf16.msra.mxu0 %v4571_v18 }
  0x85   :  { %4231 = vmatprep.subr.bf16.mxu0 %v4572_v19 }
  0x86   :  { %4170 = vmatpush3.bf16.msra.mxu1 %v4549_v3 }
  0x87   :  { %4171 = vmatprep.subr.bf16.mxu1 %v4550_v5 }
  0x88   :  { %4232 = vmatpush3.bf16.msra.mxu0 %v4572_v19 }
  0x89   :  { %4233 = vmatprep.subr.bf16.mxu0 %v4573_v20 }
  0x8a   :  { %4172 = vmatpush3.bf16.msra.mxu1 %v4550_v5 }
  0x8b   :  { %4173 = vmatprep.subr.bf16.mxu1 %v4551_v6 }
  0x8c   :  { %4234 = vmatpush3.bf16.msra.mxu0 %v4573_v20 }
  0x8d   :  { %4235 = vmatprep.subr.bf16.mxu0 %v4574_v21 }
  0x8e   :  { %4174 = vmatpush3.bf16.msra.mxu1 %v4551_v6 }
  0x8f   :  { %4175 = vmatprep.subr.bf16.mxu1 %v4552_v7 }
  0x90   :  { %4236 = vmatpush3.bf16.msra.mxu0 %v4574_v21 }
  0x91   :  { %4237 = vmatprep.subr.bf16.mxu0 %v4575_v53 }
  0x92   :  { %4176 = vmatpush3.bf16.msra.mxu1 %v4552_v7 }
  0x93   :  { %4177 = vmatprep.subr.bf16.mxu1 %v4553_v8 }
  0x94   :  { %4238 = vmatpush3.bf16.msra.mxu0 %v4575_v53 }
  0x95   :  { %4239 = vmatprep.subr.bf16.mxu0 %v4576_v54 }
  0x96   :  { %4178 = vmatpush3.bf16.msra.mxu1 %v4553_v8 }
  0x98   :  { %4240 = vmatpush3.bf16.msra.mxu0 %v4576_v54 }
  0x99   :  { %4180 = vmatmul.mubr.bf16.vlgmr.msra.gmra.mxu1 %v4555_v9  ;;  %4241 = vmatprep.subr.bf16.mxu0 %v4577_v55 }
  0x9a   :  { %4183 = vmatprep.mubr.bf16.mxu1 %v4556_v10 }
  0x9c   :  { %4242 = vmatpush3.bf16.msra.mxu0 %v4577_v55 }
  0xa1   :  { %4184 = vmatmul.mubr.bf16.gmra.mxu1 %v4557_v11 }
  0xa2   :  { %4187 = vmatprep.mubr.bf16.mxu1 %v4558_v12 }
  0xa9   :  { %4188 = vmatmul.mubr.bf16.gmra.mxu1 %v4559_v13 }
  0xaa   :  { %4191 = vmatprep.mubr.bf16.mxu1 %v4560_v14 }
  0xb1   :  { %4192 = vmatmul.mubr.bf16.gmra.mxu1 %v4561_v15 }
  0xb2   :  { %4211 = vmatprep.mubr.bf16.mxu1 %v5095_v16 }
 0x159   :  { %v4181_v22 = vpop.f32.mrf.mxu1 }
 0x15b   :  { %v381_v23 = vpop.f32.mrf.mxu1 }
 0x15d   :  { %v4182_v24 = vpop.f32.mrf.mxu1 }
 0x15e   :  { %v445_v44 = vpack.c.bf16 %v4182_v24, %v4181_v22 }
 0x15f   :  { %v384_v25 = vpop.f32.mrf.mxu1 }
 0x160   :  { %v444_v45 = vpack.c.bf16 %v384_v25, %v381_v23 }
 0x161   :  { %v4185_v26 = vpop.f32.mrf.mxu1 }
 0x163   :  { %v397_v27 = vpop.f32.mrf.mxu1 }
 0x165   :  { %v4186_v28 = vpop.f32.mrf.mxu1 }
 0x166   :  { %v447_v42 = vpack.c.bf16 %v4186_v28, %v4185_v26 }
 0x167   :  { %v400_v29 = vpop.f32.mrf.mxu1 }
 0x168   :  { %v446_v43 = vpack.c.bf16 %v400_v29, %v397_v27 }
 0x169   :  { %v4189_v30 = vpop.f32.mrf.mxu1 }
 0x16b   :  { %v413_v31 = vpop.f32.mrf.mxu1 }
 0x16d   :  { %v4190_v32 = vpop.f32.mrf.mxu1 }
 0x16e   :  { %v449_v40 = vpack.c.bf16 %v4190_v32, %v4189_v30 }
 0x16f   :  { %v416_v33 = vpop.f32.mrf.mxu1 }
 0x170   :  { %v448_v41 = vpack.c.bf16 %v416_v33, %v413_v31  ;;  %v4578_v33 = vld [vmem:[%s6154_s8 + $0x70] ss:$8 sps:$4 sm:$0xff]  }
 0x171   :  { %v4193_v34 = vpop.f32.mrf.mxu1 }
 0x173   :  { %v429_v35 = vpop.f32.mrf.mxu1 }
 0x175   :  { %v4194_v36 = vpop.f32.mrf.mxu1 }
 0x176   :  { %v451_v37 = vpack.c.bf16 %v4194_v36, %v4193_v34  ;;  %v4580_v34 = vld [vmem:[%s6154_s8 + $0x74] ss:$8 sps:$4 sm:$0xff]   ;;  %v4581_v36 = vld [vmem:[%s6154_s8 + $0x60] ss:$8 sps:$4 sm:$0xff]  }
 0x177   :  { %v432_v38 = vpop.f32.mrf.mxu1  ;;  %1007 = vmatprep.subr.bf16.mxu0 %v4580_v34  ;;  %v4605_v34 = vld [vmem:[#allocation12 + $0x20] sm:$0xff]  }
 0x178   :  { %v450_v39 = vpack.c.bf16 %v432_v38, %v429_v35  ;;  %4195 = vmatprep.subr.bf16.mxu1 %v451_v37  ;;  %v4583_v35 = vld [vmem:[%s6154_s8 + $0x64] ss:$8 sps:$4 sm:$0xff]   ;;  %v4584_v38 = vld [vmem:[%s6154_s8 + $0x50] ss:$8 sps:$4 sm:$0xff]  }
 0x179   :  { %4196 = vmatpush3.bf16.msra.mxu1 %v451_v37  ;;  %v4586_v37 = vld [vmem:[%s6154_s8 + $0x54] ss:$8 sps:$4 sm:$0xff]  }
 0x17a   :  { %4197 = vmatprep.subr.bf16.mxu1 %v450_v39 }
 0x17d   :  { %4198 = vmatpush3.bf16.msra.mxu1 %v450_v39  ;;  %v4589_v39 = vld [vmem:[%s6154_s8 + $0x44] ss:$8 sps:$4 sm:$0xff]  }
 0x17e   :  { %4199 = vmatprep.subr.bf16.mxu1 %v449_v40 }
 0x181   :  { %4200 = vmatpush3.bf16.msra.mxu1 %v449_v40  ;;  %v4587_v40 = vld [vmem:[%s6154_s8 + $0x40] ss:$8 sps:$4 sm:$0xff]  }
 0x182   :  { %4201 = vmatprep.subr.bf16.mxu1 %v448_v41 }
 0x185   :  { %4202 = vmatpush3.bf16.msra.mxu1 %v448_v41  ;;  %v4592_v41 = vld [vmem:[%s6154_s8 + $0x34] ss:$8 sps:$4 sm:$0xff]  }
 0x186   :  { %4203 = vmatprep.subr.bf16.mxu1 %v447_v42 }
 0x189   :  { %4204 = vmatpush3.bf16.msra.mxu1 %v447_v42  ;;  %v4590_v42 = vld [vmem:[%s6154_s8 + $0x30] ss:$8 sps:$4 sm:$0xff]  }
 0x18a   :  { %4205 = vmatprep.subr.bf16.mxu1 %v446_v43 }
 0x18d   :  { %4206 = vmatpush3.bf16.msra.mxu1 %v446_v43  ;;  %v4595_v43 = vld [vmem:[%s6154_s8 + $0x24] ss:$8 sps:$4 sm:$0xff]  }
 0x18e   :  { %4207 = vmatprep.subr.bf16.mxu1 %v445_v44 }
 0x191   :  { %4208 = vmatpush3.bf16.msra.mxu1 %v445_v44  ;;  %v4593_v44 = vld [vmem:[%s6154_s8 + $0x20] ss:$8 sps:$4 sm:$0xff]  }
 0x192   :  { %4209 = vmatprep.subr.bf16.mxu1 %v444_v45 }
 0x195   :  { %4210 = vmatpush3.bf16.msra.mxu1 %v444_v45 }
 0x198   :  { %4212 = vmatmul.mubr.bf16.vlgmr.msra.gmra.mxu1 %v5098_v46 }
 0x199   :  { %4215 = vmatprep.mubr.bf16.mxu1 %v5100_v47 }
 0x1a0   :  { %4216 = vmatmul.mubr.bf16.gmra.mxu1 %v5104_v48 }
 0x1a1   :  { %4219 = vmatprep.mubr.bf16.mxu1 %v5106_v49 }
 0x1a8   :  { %4220 = vmatmul.mubr.bf16.gmra.mxu1 %v5110_v50 }
 0x1a9   :  { %4223 = vmatprep.mubr.bf16.mxu1 %v5112_v51 }
 0x1b0   :  { %4224 = vmatmul.mubr.bf16.gmra.mxu1 %v5116_v52 }
 0x1b1   :  { %4275 = vmatprep.mubr.bf16.mxu1 %v5095_v16 }
 0x258   :  { %v4213_v56 = vpop.f32.mrf.mxu1 }
 0x259   :  { %v599_v63 = vmax.f32 %v4213_v56, 0.0 }
 0x25a   :  { %v534_v57 = vpop.f32.mrf.mxu1 }
 0x25b   :  { %v597_v61 = vmax.f32 %v534_v57, 0.0 }
 0x25c   :  { %v4214_v58 = vpop.f32.mrf.mxu1 }
 0x25d   :  { %v600_v59 = vmax.f32 %v4214_v58, 0.0 }
 0x25e   :  { %v537_v60 = vpop.f32.mrf.mxu1 }
 0x25f   :  { %v598_v62 = vmax.f32 %v537_v60, 0.0  ;;  %v630_v2 = vpack.c.bf16 %v600_v59, %v599_v63 }
 0x260   :  { %v4217_v0 = vpop.f32.mrf.mxu1 }
 0x261   :  { %v629_v1 = vpack.c.bf16 %v598_v62, %v597_v61  ;;  %v603_v9 = vmax.f32 %v4217_v0, 0.0 }
 0x262   :  { %v550_v3 = vpop.f32.mrf.mxu1 }
 0x263   :  { %4243 = vmatprep.mubr.bf16.mxu0 %v629_v1  ;;  %v601_v7 = vmax.f32 %v550_v3, 0.0 }
 0x264   :  { %v4218_v4 = vpop.f32.mrf.mxu1  ;;  %4244 = vmatmul.mubr.bf16.vlgmr.msra.gmra.mxu0 %v630_v2 }
 0x265   :  { %v604_v5 = vmax.f32 %v4218_v4, 0.0  ;;  %1008 = vmatpush1.bf16.msra.mxu0 %v4578_v33 }
 0x266   :  { %v553_v6 = vpop.f32.mrf.mxu1  ;;  %1009 = vmatprep.subr.bf16.mxu0 %v4583_v35 }
 0x267   :  { %v602_v8 = vmax.f32 %v553_v6, 0.0  ;;  %v632_v12 = vpack.c.bf16 %v604_v5, %v603_v9 }
 0x268   :  { %v4221_v10 = vpop.f32.mrf.mxu1 }
 0x269   :  { %v631_v11 = vpack.c.bf16 %v602_v8, %v601_v7  ;;  %v607_v20 = vmax.f32 %v4221_v10, 0.0  ;;  %1010 = vmatpush1.bf16.msra.mxu0 %v4581_v36 }
 0x26a   :  { %v566_v13 = vpop.f32.mrf.mxu1  ;;  %1011 = vmatprep.subr.bf16.mxu0 %v4586_v37 }
 0x26b   :  { %4247 = vmatprep.mubr.bf16.mxu0 %v631_v11  ;;  %v605_v18 = vmax.f32 %v566_v13, 0.0  ;;  %v4596_v13 = vld [vmem:[%s6154_s8 + $0x10] ss:$8 sps:$4 sm:$0xff]  }
 0x26c   :  { %v4222_v14 = vpop.f32.mrf.mxu1  ;;  %4248 = vmatmul.mubr.bf16.gmra.mxu0 %v632_v12  ;;  %v4598_v12 = vld [vmem:[%s6154_s8 + $0x14] ss:$8 sps:$4 sm:$0xff]  }
 0x26d   :  { %v608_v15 = vmax.f32 %v4222_v14, 0.0  ;;  %1012 = vmatpush1.bf16.msra.mxu0 %v4584_v38  ;;  %v4601_v14 = vld [vmem:[%s6154_s8 + $0x4] ss:$8 sps:$4 sm:$0xff]   ;;  %v4606_v38 = vld [vmem:[#allocation12 + $0x18] sm:$0xff]  }
 0x26e   :  { %v569_v17 = vpop.f32.mrf.mxu1  ;;  %1013 = vmatprep.subr.bf16.mxu0 %v4589_v39 }
 0x26f   :  { %v606_v19 = vmax.f32 %v569_v17, 0.0  ;;  %v634_v23 = vpack.c.bf16 %v608_v15, %v607_v20  ;;  %v4599_v15 = vld [vmem:[%s6154_s8] ss:$8 sps:$4 sm:$0xff]   ;;  %v6162_v17 = vmov 0  }
 0x270   :  { %v4225_v21 = vpop.f32.mrf.mxu1 }
 0x271   :  { %v633_v22 = vpack.c.bf16 %v606_v19, %v605_v18  ;;  %v611_v30 = vmax.f32 %v4225_v21, 0.0  ;;  %1014 = vmatpush1.bf16.msra.mxu0 %v4587_v40  ;;  %v4602_v18 = vld [vmem:[#allocation12 + $0x38] sm:$0xff]  }
 0x272   :  { %v582_v24 = vpop.f32.mrf.mxu1  ;;  %1015 = vmatprep.subr.bf16.mxu0 %v4592_v41  ;;  %v4607_v41 = vld [vmem:[#allocation12 + $0x10] sm:$0xff]  }
 0x273   :  { %4251 = vmatprep.mubr.bf16.mxu0 %v633_v22  ;;  %v609_v28 = vmax.f32 %v582_v24, 0.0 }
 0x274   :  { %v4226_v25 = vpop.f32.mrf.mxu1  ;;  %4252 = vmatmul.mubr.bf16.gmra.mxu0 %v634_v23 }
 0x275   :  { %v612_v26 = vmax.f32 %v4226_v25, 0.0  ;;  %1016 = vmatpush1.bf16.msra.mxu0 %v4590_v42 }
 0x276   :  { %v585_v27 = vpop.f32.mrf.mxu1  ;;  %1017 = vmatprep.subr.bf16.mxu0 %v4595_v43 }
 0x277   :  { %v610_v29 = vmax.f32 %v585_v27, 0.0  ;;  %v636_v32 = vpack.c.bf16 %v612_v26, %v611_v30  ;;  %v4603_v27 = vld [vmem:[#allocation12 + $0x30] sm:$0xff]   ;;  %v4604_v30 = vld [vmem:[#allocation12 + $0x28] sm:$0xff]  }
 0x279   :  { %v635_v31 = vpack.c.bf16 %v610_v29, %v609_v28  ;;  %1018 = vmatpush1.bf16.msra.mxu0 %v4593_v44 }
 0x27a   :  { %1019 = vmatprep.subr.bf16.mxu0 %v4598_v12  ;;  %v4613_v12 = vld [vmem:[#allocation7 + $0x18] sm:$0xff]  }
 0x27b   :  { %4255 = vmatprep.mubr.bf16.mxu0 %v635_v31 }
 0x27c   :  { %4256 = vmatmul.mubr.bf16.gmra.mxu0 %v636_v32 }
 0x27d   :  { %1020 = vmatpush1.bf16.msra.mxu0 %v4596_v13  ;;  %1039 = vmatprep.mubr.bf16.mxu0 %v6162_v17  ;;  %v4614_v13 = vld [vmem:[#allocation7 + $0x20] sm:$0xff]  }
 0x27e   :  { %1021 = vmatprep.subr.bf16.mxu0 %v4601_v14  ;;  %v4615_v14 = vld [vmem:[#allocation7 + $0x28] sm:$0xff]  }
 0x281   :  { %1022 = vmatpush1.bf16.msra.mxu0 %v4599_v15  ;;  %v4616_v15 = vld [vmem:[#allocation7 + $0x30] sm:$0xff]  }
 0x282   :  { %4291 = vmatprep.subr.bf16.mxu0 %v4602_v18 }
 0x324   :  { %v4245_v45 = vpop.f32.mrf.mxu0 }
 0x326   :  { %v719_v53 = vpop.f32.mrf.mxu0 }
 0x328   :  { %v4246_v54 = vpop.f32.mrf.mxu0 }
 0x329   :  { %v783_v10 = vpack.c.bf16 %v4246_v54, %v4245_v45  ;;  %v4608_v45 = vld [vmem:[#allocation12 + $0x8] sm:$0xff]  }
 0x32a   :  { %v722_v55 = vpop.f32.mrf.mxu0 }
 0x32b   :  { %v782_v11 = vpack.c.bf16 %v722_v55, %v719_v53  ;;  %v4609_v55 = vld [vmem:[#allocation12] sm:$0xff]  }
 0x32c   :  { %v4249_v56 = vpop.f32.mrf.mxu0 }
 0x32e   :  { %v735_v57 = vpop.f32.mrf.mxu0 }
 0x330   :  { %v4250_v58 = vpop.f32.mrf.mxu0 }
 0x331   :  { %v785_v8 = vpack.c.bf16 %v4250_v58, %v4249_v56 }
 0x332   :  { %v738_v59 = vpop.f32.mrf.mxu0 }
 0x333   :  { %v784_v9 = vpack.c.bf16 %v738_v59, %v735_v57 }
 0x334   :  { %v4253_v60 = vpop.f32.mrf.mxu0 }
 0x336   :  { %v751_v61 = vpop.f32.mrf.mxu0 }
 0x338   :  { %v4254_v62 = vpop.f32.mrf.mxu0 }
 0x339   :  { %v787_v6 = vpack.c.bf16 %v4254_v62, %v4253_v60 }
 0x33a   :  { %v754_v63 = vpop.f32.mrf.mxu0 }
 0x33b   :  { %v786_v7 = vpack.c.bf16 %v754_v63, %v751_v61 }
 0x33c   :  { %v4257_v0 = vpop.f32.mrf.mxu0 }
 0x33e   :  { %v767_v1 = vpop.f32.mrf.mxu0 }
 0x340   :  { %v4258_v2 = vpop.f32.mrf.mxu0 }
 0x341   :  { %v789_v3 = vpack.c.bf16 %v4258_v2, %v4257_v0 }
 0x342   :  { %v770_v4 = vpop.f32.mrf.mxu0 }
 0x343   :  { %v788_v5 = vpack.c.bf16 %v770_v4, %v767_v1  ;;  %4259 = vmatprep.subr.bf16.mxu1 %v789_v3 }
 0x344   :  { %4260 = vmatpush3.bf16.msra.mxu1 %v789_v3 }
 0x345   :  { %4261 = vmatprep.subr.bf16.mxu1 %v788_v5 }
 0x348   :  { %4262 = vmatpush3.bf16.msra.mxu1 %v788_v5 }
 0x349   :  { %4263 = vmatprep.subr.bf16.mxu1 %v787_v6 }
 0x34c   :  { %4264 = vmatpush3.bf16.msra.mxu1 %v787_v6 }
 0x34d   :  { %4265 = vmatprep.subr.bf16.mxu1 %v786_v7 }
 0x350   :  { %4266 = vmatpush3.bf16.msra.mxu1 %v786_v7 }
 0x351   :  { %4267 = vmatprep.subr.bf16.mxu1 %v785_v8 }
 0x354   :  { %4268 = vmatpush3.bf16.msra.mxu1 %v785_v8  ;;  %v4610_v8 = vld [vmem:[#allocation7] sm:$0xff]  }
 0x355   :  { %4269 = vmatprep.subr.bf16.mxu1 %v784_v9 }
 0x358   :  { %4270 = vmatpush3.bf16.msra.mxu1 %v784_v9 }
 0x359   :  { %4271 = vmatprep.subr.bf16.mxu1 %v783_v10 }
 0x35c   :  { %4272 = vmatpush3.bf16.msra.mxu1 %v783_v10  ;;  %v4611_v10 = vld [vmem:[#allocation7 + $0x8] sm:$0xff]  }
 0x35d   :  { %4273 = vmatprep.subr.bf16.mxu1 %v782_v11 }
 0x360   :  { %4274 = vmatpush3.bf16.msra.mxu1 %v782_v11  ;;  %v4612_v11 = vld [vmem:[#allocation7 + $0x10] sm:$0xff]  }
 0x363   :  { %4276 = vmatmul.mubr.bf16.vlgmr.msra.gmra.mxu1 %v5098_v46 }
 0x364   :  { %4279 = vmatprep.mubr.bf16.mxu1 %v5100_v47 }
 0x36b   :  { %4280 = vmatmul.mubr.bf16.gmra.mxu1 %v5104_v48 }
 0x36c   :  { %4283 = vmatprep.mubr.bf16.mxu1 %v5106_v49 }
 0x373   :  { %4284 = vmatmul.mubr.bf16.gmra.mxu1 %v5110_v50 }
 0x374   :  { %4287 = vmatprep.mubr.bf16.mxu1 %v5112_v51 }
 0x37b   :  { %4288 = vmatmul.mubr.bf16.gmra.mxu1 %v5116_v52 }
 0x37c   :  { %1168 = vmatprep.mubr.bf16.mxu1 %v6162_v17 }
 0x423   :  { %v4277_v19 = vpop.f32.mrf.mxu1 }
 0x424   :  { %v889_v32 = vmax.f32 %v4277_v19, 0.0 }
 0x425   :  { %v824_v20 = vpop.f32.mrf.mxu1 }
 0x426   :  { %v887_v23 = vmax.f32 %v824_v20, 0.0 }
 0x427   :  { %v4278_v21 = vpop.f32.mrf.mxu1 }
 0x428   :  { %v890_v29 = vmax.f32 %v4278_v21, 0.0 }
 0x429   :  { %v827_v22 = vpop.f32.mrf.mxu1 }
 0x42a   :  { %v888_v24 = vmax.f32 %v827_v22, 0.0  ;;  %v920_v33 = vpack.c.bf16 %v890_v29, %v889_v32 }
 0x42b   :  { %v4281_v25 = vpop.f32.mrf.mxu1 }
 0x42c   :  { %v919_v26 = vpack.c.bf16 %v888_v24, %v887_v23  ;;  %v893_v43 = vmax.f32 %v4281_v25, 0.0 }
 0x42d   :  { %v840_v28 = vpop.f32.mrf.mxu1 }
 0x42e   :  { %1040 = vmatmul.mubr.bf16.vlgmr.msra.gmra.mxu0 %v919_v26  ;;  %v891_v36 = vmax.f32 %v840_v28, 0.0 }
 0x42f   :  { %1049 = vmatprep.mubr.bf16.mxu0 %v6162_v17  ;;  %4292 = vmatpush3.bf16.msra.mxu0 %v4602_v18  ;;  %v4282_v31 = vpop.f32.mrf.mxu1  ;;  %v4617_v18 = vld [vmem:[#allocation7 + $0x38] sm:$0xff]  }
 0x430   :  { %4293 = vmatprep.subr.bf16.mxu0 %v4603_v27  ;;  %v894_v44 = vmax.f32 %v4282_v31, 0.0 }
 0x431   :  { %v843_v35 = vpop.f32.mrf.mxu1 }
 0x432   :  { %v892_v37 = vmax.f32 %v843_v35, 0.0  ;;  %v922_v54 = vpack.c.bf16 %v894_v44, %v893_v43 }
 0x433   :  { %4294 = vmatpush3.bf16.msra.mxu0 %v4603_v27  ;;  %v4285_v39 = vpop.f32.mrf.mxu1 }
 0x434   :  { %4295 = vmatprep.subr.bf16.mxu0 %v4604_v30  ;;  %v921_v40 = vpack.c.bf16 %v892_v37, %v891_v36  ;;  %v897_v62 = vmax.f32 %v4285_v39, 0.0 }
 0x435   :  { %v856_v42 = vpop.f32.mrf.mxu1 }
 0x436   :  { %1050 = vmatmul.mubr.bf16.gmra.mxu0 %v920_v33  ;;  %v895_v57 = vmax.f32 %v856_v42, 0.0 }
 0x437   :  { %1059 = vmatprep.mubr.bf16.mxu0 %v6162_v17  ;;  %4296 = vmatpush3.bf16.msra.mxu0 %v4604_v30  ;;  %v4286_v53 = vpop.f32.mrf.mxu1 }
 0x438   :  { %4297 = vmatprep.subr.bf16.mxu0 %v4605_v34  ;;  %v898_v63 = vmax.f32 %v4286_v53, 0.0 }
 0x439   :  { %v859_v56 = vpop.f32.mrf.mxu1 }
 0x43a   :  { %v896_v58 = vmax.f32 %v859_v56, 0.0  ;;  %v924_v1 = vpack.c.bf16 %v898_v63, %v897_v62 }
 0x43b   :  { %4298 = vmatpush3.bf16.msra.mxu0 %v4605_v34  ;;  %v4289_v59 = vpop.f32.mrf.mxu1 }
 0x43c   :  { %4299 = vmatprep.subr.bf16.mxu0 %v4606_v38  ;;  %v923_v60 = vpack.c.bf16 %v896_v58, %v895_v57  ;;  %v901_v6 = vmax.f32 %v4289_v59, 0.0 }
 0x43d   :  { %v872_v61 = vpop.f32.mrf.mxu1 }
 0x43e   :  { %1060 = vmatmul.mubr.bf16.gmra.mxu0 %v921_v40  ;;  %v899_v3 = vmax.f32 %v872_v61, 0.0 }
 0x43f   :  { %1069 = vmatprep.mubr.bf16.mxu0 %v6162_v17  ;;  %4300 = vmatpush3.bf16.msra.mxu0 %v4606_v38  ;;  %v4290_v0 = vpop.f32.mrf.mxu1 }
 0x440   :  { %4301 = vmatprep.subr.bf16.mxu0 %v4607_v41  ;;  %v902_v7 = vmax.f32 %v4290_v0, 0.0 }
 0x441   :  { %v875_v2 = vpop.f32.mrf.mxu1 }
 0x442   :  { %v900_v4 = vmax.f32 %v875_v2, 0.0  ;;  %v926_v9 = vpack.c.bf16 %v902_v7, %v901_v6 }
 0x443   :  { %4302 = vmatpush3.bf16.msra.mxu0 %v4607_v41 }
 0x444   :  { %4303 = vmatprep.subr.bf16.mxu0 %v4608_v45  ;;  %v925_v5 = vpack.c.bf16 %v900_v4, %v899_v3 }
 0x446   :  { %1070 = vmatmul.mubr.bf16.gmra.mxu0 %v922_v54 }
 0x447   :  { %1079 = vmatprep.mubr.bf16.mxu0 %v6162_v17  ;;  %4304 = vmatpush3.bf16.msra.mxu0 %v4608_v45 }
 0x448   :  { %4305 = vmatprep.subr.bf16.mxu0 %v4609_v55 }
 0x44b   :  { %4306 = vmatpush3.bf16.msra.mxu0 %v4609_v55 }
 0x44e   :  { %1080 = vmatmul.mubr.bf16.gmra.mxu0 %v923_v60 }
 0x44f   :  { %1089 = vmatprep.mubr.bf16.mxu0 %v6162_v17 }
 0x456   :  { %1090 = vmatmul.mubr.bf16.gmra.mxu0 %v924_v1 }
 0x457   :  { %1099 = vmatprep.mubr.bf16.mxu0 %v6162_v17 }
 0x45e   :  { %1100 = vmatmul.mubr.bf16.gmra.mxu0 %v925_v5 }
 0x45f   :  { %1109 = vmatprep.mubr.bf16.mxu0 %v6162_v17 }
 0x466   :  { %1110 = vmatmul.mubr.bf16.gmra.mxu0 %v926_v9 }
 0x467   :  { %4307 = vmatprep.mubr.bf16.mxu0 %v4610_v8 }
 0x46e   :  { %4308 = vmatmul.mubr.bf16.vlgmr.msra.gmra.mxu0 %v4611_v10 }
 0x46f   :  { %4311 = vmatprep.mubr.bf16.mxu0 %v4612_v11 }
 0x476   :  { %4312 = vmatmul.mubr.bf16.gmra.mxu0 %v4613_v12 }
 0x477   :  { %4315 = vmatprep.mubr.bf16.mxu0 %v4614_v13 }
 0x47e   :  { %4316 = vmatmul.mubr.bf16.gmra.mxu0 %v4615_v14 }
 0x47f   :  { %4319 = vmatprep.mubr.bf16.mxu0 %v4616_v15 }
 0x486   :  { %4320 = vmatmul.mubr.bf16.gmra.mxu0 %v4617_v18 }
 0x4ee   :  { %v5184_v19 = vpop.f32.mrf.mxu0 }
 0x4f0   :  { %v5186_v20 = vpop.f32.mrf.mxu0 }
 0x4f2   :  { %v5188_v21 = vpop.f32.mrf.mxu0 }
 0x4f3   :  { %v1120_v22 = vpack.c.bf16 %v5188_v21, %v5184_v19 }
 0x4f4   :  { %v5192_v23 = vpop.f32.mrf.mxu0 }
 0x4f6   :  { %v5194_v24 = vpop.f32.mrf.mxu0 }
 0x4f8   :  { %v5196_v25 = vpop.f32.mrf.mxu0 }
 0x4fa   :  { %v5198_v26 = vpop.f32.mrf.mxu0 }
 0x4fb   :  { %v1122_v27 = vpack.c.bf16 %v5198_v26, %v5194_v24  ;;  %v5250_v24 = vld [vmem:[#allocation4 + $0x38] sm:$0xff]  }
 0x4fc   :  { %v1057_v28 = vpop.f32.mrf.mxu0  ;;  %v4626_v26 = vld [vmem:[#allocation13 + $0x38] sm:$0xff]  }
 0x4fd   :  { %4355 = vmatprep.subr.bf16.mxu0 %v4626_v26 }
 0x4fe   :  { %v1061_v29 = vpop.f32.mrf.mxu0  ;;  %4356 = vmatpush3.bf16.msra.mxu0 %v4626_v26 }
 0x500   :  { %v1063_v30 = vpop.f32.mrf.mxu0 }
 0x502   :  { %v1065_v31 = vpop.f32.mrf.mxu0 }
 0x504   :  { %v1067_v32 = vpop.f32.mrf.mxu0 }
 0x505   :  { %v1125_v15 = vpack.c.bf16 %v1067_v32, %v1063_v30 }
 0x506   :  { %v1071_v33 = vpop.f32.mrf.mxu0 }
 0x508   :  { %v1073_v34 = vpop.f32.mrf.mxu0 }
 0x50a   :  { %v1075_v35 = vpop.f32.mrf.mxu0 }
 0x50b   :  { %v1126_v13 = vpack.c.bf16 %v1075_v35, %v1071_v33  ;;  %v4630_v35 = vld [vmem:[#allocation13 + $0x18] sm:$0xff]  }
 0x50c   :  { %v1077_v36 = vpop.f32.mrf.mxu0 }
 0x50d   :  { %v1127_v11 = vpack.c.bf16 %v1077_v36, %v1073_v34  ;;  %v1121_v34 = vpack.c.bf16 %v5192_v23, %v5186_v20  ;;  %v4631_v36 = vld [vmem:[#allocation13 + $0x10] sm:$0xff]  }
 0x50e   :  { %v1081_v37 = vpop.f32.mrf.mxu0 }
 0x510   :  { %v1083_v38 = vpop.f32.mrf.mxu0 }
 0x512   :  { %v1085_v39 = vpop.f32.mrf.mxu0 }
 0x513   :  { %v1128_v9 = vpack.c.bf16 %v1085_v39, %v1081_v37  ;;  %v4632_v37 = vld [vmem:[#allocation13 + $0x8] sm:$0xff]   ;;  %v4633_v39 = vld [vmem:[#allocation13] sm:$0xff]  }
 0x514   :  { %v1087_v40 = vpop.f32.mrf.mxu0 }
 0x515   :  { %v1129_v7 = vpack.c.bf16 %v1087_v40, %v1083_v38 }
 0x516   :  { %v1091_v41 = vpop.f32.mrf.mxu0 }
 0x518   :  { %v1093_v42 = vpop.f32.mrf.mxu0 }
 0x51a   :  { %v1095_v43 = vpop.f32.mrf.mxu0 }
 0x51b   :  { %v1130_v5 = vpack.c.bf16 %v1095_v43, %v1091_v41  ;;  %v1123_v41 = vpack.c.bf16 %v1057_v28, %v5196_v25 }
 0x51c   :  { %v1097_v44 = vpop.f32.mrf.mxu0 }
 0x51d   :  { %v1131_v3 = vpack.c.bf16 %v1097_v44, %v1093_v42  ;;  %v1124_v42 = vpack.c.bf16 %v1065_v31, %v1061_v29  ;;  %v4628_v29 = vld [vmem:[#allocation13 + $0x28] sm:$0xff]   ;;  %v4629_v31 = vld [vmem:[#allocation13 + $0x20] sm:$0xff]  }
 0x51e   :  { %v1101_v45 = vpop.f32.mrf.mxu0 }
 0x520   :  { %v1103_v53 = vpop.f32.mrf.mxu0 }
 0x522   :  { %v1105_v54 = vpop.f32.mrf.mxu0 }
 0x523   :  { %v1132_v1 = vpack.c.bf16 %v1105_v54, %v1101_v45 }
 0x524   :  { %v1107_v55 = vpop.f32.mrf.mxu0 }
 0x525   :  { %v1133_v63 = vpack.c.bf16 %v1107_v55, %v1103_v53 }
 0x526   :  { %v1111_v56 = vpop.f32.mrf.mxu0 }
 0x528   :  { %v1113_v57 = vpop.f32.mrf.mxu0 }
 0x52a   :  { %v1115_v58 = vpop.f32.mrf.mxu0 }
 0x52b   :  { %v1134_v61 = vpack.c.bf16 %v1115_v58, %v1111_v56 }
 0x52c   :  { %v1117_v59 = vpop.f32.mrf.mxu0 }
 0x52d   :  { %v1135_v60 = vpack.c.bf16 %v1117_v59, %v1113_v57 }
 0x52e   :  { %v5202_v62 = vpop.f32.mrf.mxu0 }
 0x52f   :  { %1136 = vmatprep.subr.bf16.mxu1 %v1135_v60 }
 0x530   :  { %1137 = vmatpush1.bf16.msra.mxu1 %v1134_v61  ;;  %v5204_v0 = vpop.f32.mrf.mxu0 }
 0x531   :  { %1138 = vmatprep.subr.bf16.mxu1 %v1133_v63 }
 0x532   :  { %v4310_v2 = vpop.f32.mrf.mxu0 }
 0x534   :  { %1139 = vmatpush1.bf16.msra.mxu1 %v1132_v1  ;;  %v1414_v4 = vpop.f32.mrf.mxu0 }
 0x535   :  { %1140 = vmatprep.subr.bf16.mxu1 %v1131_v3 }
 0x536   :  { %v4313_v6 = vpop.f32.mrf.mxu0 }
 0x538   :  { %1141 = vmatpush1.bf16.msra.mxu1 %v1130_v5  ;;  %v1427_v8 = vpop.f32.mrf.mxu0 }
 0x539   :  { %1142 = vmatprep.subr.bf16.mxu1 %v1129_v7 }
 0x53a   :  { %v4314_v10 = vpop.f32.mrf.mxu0 }
 0x53b   :  { %v1477_v19 = vpack.c.bf16 %v4314_v10, %v4313_v6 }
 0x53c   :  { %1143 = vmatpush1.bf16.msra.mxu1 %v1128_v9  ;;  %v1430_v12 = vpop.f32.mrf.mxu0 }
 0x53d   :  { %1144 = vmatprep.subr.bf16.mxu1 %v1127_v11  ;;  %v1476_v21 = vpack.c.bf16 %v1430_v12, %v1427_v8 }
 0x53e   :  { %v4317_v14 = vpop.f32.mrf.mxu0 }
 0x540   :  { %1145 = vmatpush1.bf16.msra.mxu1 %v1126_v13  ;;  %v1443_v18 = vpop.f32.mrf.mxu0 }
 0x541   :  { %1146 = vmatprep.subr.bf16.mxu1 %v1125_v15 }
 0x542   :  { %v4318_v44 = vpop.f32.mrf.mxu0 }
 0x543   :  { %v1479_v20 = vpack.c.bf16 %v4318_v44, %v4317_v14 }
 0x544   :  { %1147 = vmatpush1.bf16.msra.mxu1 %v1124_v42  ;;  %v1446_v38 = vpop.f32.mrf.mxu0 }
 0x545   :  { %1148 = vmatprep.subr.bf16.mxu1 %v1123_v41  ;;  %v1478_v23 = vpack.c.bf16 %v1446_v38, %v1443_v18 }
 0x546   :  { %v4321_v40 = vpop.f32.mrf.mxu0 }
 0x548   :  { %1149 = vmatpush1.bf16.msra.mxu1 %v1122_v27  ;;  %v1459_v33 = vpop.f32.mrf.mxu0  ;;  %v4627_v27 = vld [vmem:[#allocation13 + $0x30] sm:$0xff]  }
 0x549   :  { %1150 = vmatprep.subr.bf16.mxu1 %v1121_v34  ;;  %4357 = vmatprep.subr.bf16.mxu0 %v4627_v27 }
 0x54a   :  { %v4322_v30 = vpop.f32.mrf.mxu0  ;;  %4358 = vmatpush3.bf16.msra.mxu0 %v4627_v27 }
 0x54b   :  { %v1481_v32 = vpack.c.bf16 %v4322_v30, %v4321_v40  ;;  %4359 = vmatprep.subr.bf16.mxu0 %v4628_v29 }
 0x54c   :  { %1151 = vmatpush1.bf16.msra.mxu1 %v1120_v22  ;;  %v1462_v25 = vpop.f32.mrf.mxu0  ;;  %v5234_v22 = vld [vmem:[#allocation4 + $0x10] sm:$0xff]  }
 0x54d   :  { %v1480_v28 = vpack.c.bf16 %v1462_v25, %v1459_v33  ;;  %4323 = vmatprep.subr.bf16.mxu1 %v1481_v32 }
 0x54e   :  { %4360 = vmatpush3.bf16.msra.mxu0 %v4628_v29 }
 0x54f   :  { %1169 = vmatmul.mubr.bf16.vlgmr.msra.gmra.mxu1 %v5095_v16  ;;  %v1475_v16 = vpack.c.bf16 %v4310_v2, %v5202_v62  ;;  %4361 = vmatprep.subr.bf16.mxu0 %v4629_v31 }
 0x550   :  { %4324 = vmatpush3.bf16.msra.mxu1 %v1481_v32  ;;  %1178 = vmatprep.mubr.bf16.mxu1 %v6162_v17 }
 0x551   :  { %4325 = vmatprep.subr.bf16.mxu1 %v1480_v28 }
 0x552   :  { %4362 = vmatpush3.bf16.msra.mxu0 %v4629_v31 }
 0x553   :  { %4363 = vmatprep.subr.bf16.mxu0 %v4630_v35 }
 0x554   :  { %4326 = vmatpush3.bf16.msra.mxu1 %v1480_v28 }
 0x555   :  { %4327 = vmatprep.subr.bf16.mxu1 %v1479_v20 }
 0x556   :  { %4364 = vmatpush3.bf16.msra.mxu0 %v4630_v35 }
 0x557   :  { %1179 = vmatmul.mubr.bf16.gmra.mxu1 %v5098_v46  ;;  %v1474_v46 = vpack.c.bf16 %v1414_v4, %v5204_v0  ;;  %4365 = vmatprep.subr.bf16.mxu0 %v4631_v36 }
 0x558   :  { %4328 = vmatpush3.bf16.msra.mxu1 %v1479_v20  ;;  %1188 = vmatprep.mubr.bf16.mxu1 %v6162_v17 }
 0x559   :  { %4329 = vmatprep.subr.bf16.mxu1 %v1478_v23 }
 0x55a   :  { %4366 = vmatpush3.bf16.msra.mxu0 %v4631_v36 }
 0x55b   :  { %4367 = vmatprep.subr.bf16.mxu0 %v4632_v37 }
 0x55c   :  { %4330 = vmatpush3.bf16.msra.mxu1 %v1478_v23 }
 0x55d   :  { %4331 = vmatprep.subr.bf16.mxu1 %v1477_v19 }
 0x55e   :  { %4368 = vmatpush3.bf16.msra.mxu0 %v4632_v37 }
 0x55f   :  { %1189 = vmatmul.mubr.bf16.gmra.mxu1 %v5100_v47  ;;  %v4618_v47 = vld [vmem:[#allocation4] sm:$0xff]   ;;  %4369 = vmatprep.subr.bf16.mxu0 %v4633_v39 }
 0x560   :  { %4332 = vmatpush3.bf16.msra.mxu1 %v1477_v19  ;;  %1198 = vmatprep.mubr.bf16.mxu1 %v6162_v17 }
 0x561   :  { %4333 = vmatprep.subr.bf16.mxu1 %v1476_v21 }
 0x562   :  { %4370 = vmatpush3.bf16.msra.mxu0 %v4633_v39 }
 0x564   :  { %4334 = vmatpush3.bf16.msra.mxu1 %v1476_v21 }
 0x565   :  { %4335 = vmatprep.subr.bf16.mxu1 %v1475_v16 }
 0x567   :  { %1199 = vmatmul.mubr.bf16.gmra.mxu1 %v5104_v48  ;;  %v5232_v48 = vld [vmem:[#allocation4 + $0x8] sm:$0xff]  }
 0x568   :  { %4336 = vmatpush3.bf16.msra.mxu1 %v1475_v16  ;;  %1208 = vmatprep.mubr.bf16.mxu1 %v6162_v17 }
 0x569   :  { %4337 = vmatprep.subr.bf16.mxu1 %v1474_v46 }
 0x56c   :  { %4338 = vmatpush3.bf16.msra.mxu1 %v1474_v46 }
 0x56f   :  { %1209 = vmatmul.mubr.bf16.gmra.mxu1 %v5106_v49  ;;  %v5238_v49 = vld [vmem:[#allocation4 + $0x18] sm:$0xff]  }
 0x570   :  { %1218 = vmatprep.mubr.bf16.mxu1 %v6162_v17 }
 0x577   :  { %1219 = vmatmul.mubr.bf16.gmra.mxu1 %v5110_v50  ;;  %v5240_v50 = vld [vmem:[#allocation4 + $0x20] sm:$0xff]  }
 0x578   :  { %1228 = vmatprep.mubr.bf16.mxu1 %v6162_v17 }
 0x57f   :  { %1229 = vmatmul.mubr.bf16.gmra.mxu1 %v5112_v51  ;;  %v5244_v51 = vld [vmem:[#allocation4 + $0x28] sm:$0xff]  }
 0x580   :  { %1238 = vmatprep.mubr.bf16.mxu1 %v6162_v17 }
 0x587   :  { %1239 = vmatmul.mubr.bf16.gmra.mxu1 %v5116_v52  ;;  %v5246_v52 = vld [vmem:[#allocation4 + $0x30] sm:$0xff]  }
 0x588   :  { %4339 = vmatprep.mubr.bf16.mxu1 %v4618_v47 }
 0x58f   :  { %4340 = vmatmul.mubr.bf16.vlgmr.msra.gmra.mxu1 %v5232_v48 }
 0x590   :  { %4343 = vmatprep.mubr.bf16.mxu1 %v5234_v22 }
 0x597   :  { %4344 = vmatmul.mubr.bf16.gmra.mxu1 %v5238_v49 }
 0x598   :  { %4347 = vmatprep.mubr.bf16.mxu1 %v5240_v50 }
 0x59f   :  { %4348 = vmatmul.mubr.bf16.gmra.mxu1 %v5244_v51 }
 0x5a0   :  { %4351 = vmatprep.mubr.bf16.mxu1 %v5246_v52 }
 0x5a7   :  { %4352 = vmatmul.mubr.bf16.gmra.mxu1 %v5250_v24 }
 0x5a8   :  { %4403 = vmatprep.mubr.bf16.mxu1 %v4618_v47 }
 0x60f   :  { %v5253_v43 = vpop.f32.mrf.mxu1 }
 0x611   :  { %v5255_v45 = vpop.f32.mrf.mxu1 }
 0x612   :  { %6202 = vst [vmem:[#allocation24_spill] sm:$0xff] %v5255_v45 }
 0x613   :  { %v5257_v53 = vpop.f32.mrf.mxu1 }
 0x615   :  { %v5259_v54 = vpop.f32.mrf.mxu1 }
 0x616   :  { %6203 = vst [vmem:[#allocation25_spill] sm:$0xff] %v5259_v54 }
 0x617   :  { %v5261_v55 = vpop.f32.mrf.mxu1 }
 0x619   :  { %v5263_v56 = vpop.f32.mrf.mxu1 }
 0x61a   :  { %6204 = vst [vmem:[#allocation26_spill] sm:$0xff] %v5263_v56 }
 0x61b   :  { %v5265_v57 = vpop.f32.mrf.mxu1 }
 0x61d   :  { %v5267_v58 = vpop.f32.mrf.mxu1 }
 0x61e   :  { %6205 = vst [vmem:[#allocation27_spill] sm:$0xff] %v5267_v58 }
 0x61f   :  { %v5269_v59 = vpop.f32.mrf.mxu1 }
 0x621   :  { %v5271_v60 = vpop.f32.mrf.mxu1 }
 0x622   :  { %6206 = vst [vmem:[#allocation28_spill] sm:$0xff] %v5271_v60 }
 0x623   :  { %v5273_v61 = vpop.f32.mrf.mxu1 }
 0x625   :  { %v5275_v62 = vpop.f32.mrf.mxu1 }
 0x626   :  { %6207 = vst [vmem:[#allocation29_spill] sm:$0xff] %v5275_v62 }
 0x627   :  { %v5277_v63 = vpop.f32.mrf.mxu1 }
 0x629   :  { %v5279_v0 = vpop.f32.mrf.mxu1 }
 0x62a   :  { %6208 = vst [vmem:[#allocation30_spill] sm:$0xff] %v5279_v0 }
 0x62b   :  { %v5281_v1 = vpop.f32.mrf.mxu1 }
 0x62d   :  { %v5283_v2 = vpop.f32.mrf.mxu1 }
 0x62e   :  { %6209 = vst [vmem:[#allocation31_spill] sm:$0xff] %v5283_v2 }
 0x62f   :  { %v5285_v3 = vpop.f32.mrf.mxu1 }
 0x631   :  { %v5287_v4 = vpop.f32.mrf.mxu1 }
 0x632   :  { %6210 = vst [vmem:[#allocation32_spill] sm:$0xff] %v5287_v4 }
 0x633   :  { %v5289_v5 = vpop.f32.mrf.mxu1 }
 0x635   :  { %v5291_v6 = vpop.f32.mrf.mxu1 }
 0x636   :  { %6211 = vst [vmem:[#allocation33_spill] sm:$0xff] %v5291_v6 }
 0x637   :  { %v5293_v7 = vpop.f32.mrf.mxu1 }
 0x639   :  { %v5295_v8 = vpop.f32.mrf.mxu1 }
 0x63a   :  { %6212 = vst [vmem:[#allocation34_spill] sm:$0xff] %v5295_v8 }
 0x63b   :  { %v5297_v9 = vpop.f32.mrf.mxu1 }
 0x63d   :  { %v5299_v10 = vpop.f32.mrf.mxu1 }
 0x63e   :  { %6213 = vst [vmem:[#allocation35_spill] sm:$0xff] %v5299_v10 }
 0x63f   :  { %v5301_v11 = vpop.f32.mrf.mxu1 }
 0x640   :  { %6214 = vst [vmem:[#allocation36_spill] sm:$0xff] %v5301_v11 }
 0x641   :  { %v5303_v12 = vpop.f32.mrf.mxu1 }
 0x642   :  { %6215 = vst [vmem:[#allocation37_spill] sm:$0xff] %v5303_v12 }
 0x643   :  { %v5305_v13 = vpop.f32.mrf.mxu1 }
 0x644   :  { %6216 = vst [vmem:[#allocation38_spill] sm:$0xff] %v5305_v13 }
 0x645   :  { %v5307_v14 = vpop.f32.mrf.mxu1 }
 0x646   :  { %6217 = vst [vmem:[#allocation39_spill] sm:$0xff] %v5307_v14 }
 0x647   :  { %v5309_v15 = vpop.f32.mrf.mxu1 }
 0x648   :  { %6218 = vst [vmem:[#allocation40_spill] sm:$0xff] %v5309_v15 }
 0x649   :  { %v5311_v18 = vpop.f32.mrf.mxu1 }
 0x64a   :  { %6219 = vst [vmem:[#allocation41_spill] sm:$0xff] %v5311_v18 }
 0x64b   :  { %v5313_v42 = vpop.f32.mrf.mxu1 }
 0x64c   :  { %6220 = vst [vmem:[#allocation42_spill] sm:$0xff] %v5313_v42 }
 0x64d   :  { %v5315_v44 = vpop.f32.mrf.mxu1 }
 0x64e   :  { %6221 = vst [vmem:[#allocation43_spill] sm:$0xff] %v5315_v44 }
 0x64f   :  { %v4341_v41 = vpop.f32.mrf.mxu1 }
 0x650   :  { %v1629_v25 = vmax.f32 %v4341_v41, 0.0 }
 0x651   :  { %v1564_v38 = vpop.f32.mrf.mxu1 }
 0x652   :  { %v1627_v30 = vmax.f32 %v1564_v38, 0.0 }
 0x653   :  { %v4342_v40 = vpop.f32.mrf.mxu1 }
 0x654   :  { %v1630_v34 = vmax.f32 %v4342_v40, 0.0 }
 0x655   :  { %v1567_v33 = vpop.f32.mrf.mxu1 }
 0x656   :  { %v1628_v32 = vmax.f32 %v1567_v33, 0.0  ;;  %v1660_v23 = vpack.c.bf16 %v1630_v34, %v1629_v25 }
 0x657   :  { %v4345_v28 = vpop.f32.mrf.mxu1 }
 0x658   :  { %v1659_v20 = vpack.c.bf16 %v1628_v32, %v1627_v30  ;;  %v1633_v27 = vmax.f32 %v4345_v28, 0.0 }
 0x659   :  { %v1580_v19 = vpop.f32.mrf.mxu1 }
 0x65a   :  { %4371 = vmatprep.mubr.bf16.mxu0 %v1659_v20  ;;  %v1631_v47 = vmax.f32 %v1580_v19, 0.0 }
 0x65b   :  { %v4346_v21 = vpop.f32.mrf.mxu1  ;;  %4372 = vmatmul.mubr.bf16.vlgmr.msra.gmra.mxu0 %v1660_v23 }
 0x65c   :  { %v1634_v16 = vmax.f32 %v4346_v21, 0.0 }
 0x65d   :  { %v1583_v46 = vpop.f32.mrf.mxu1 }
 0x65e   :  { %v1632_v26 = vmax.f32 %v1583_v46, 0.0  ;;  %v1662_v35 = vpack.c.bf16 %v1634_v16, %v1633_v27  ;;  %v4636_v27 = vld [vmem:[%s6157_s11 + $0x74] ss:$8 sps:$4 sm:$0xff]  }
 0x65f   :  { %v4349_v29 = vpop.f32.mrf.mxu1  ;;  %2037 = vmatprep.subr.bf16.mxu0 %v4636_v27 }
 0x660   :  { %v1661_v31 = vpack.c.bf16 %v1632_v26, %v1631_v47  ;;  %v1637_v34 = vmax.f32 %v4349_v29, 0.0  ;;  %v4634_v26 = vld [vmem:[%s6157_s11 + $0x70] ss:$8 sps:$4 sm:$0xff]   ;;  %v4639_v29 = vld [vmem:[%s6157_s11 + $0x64] ss:$8 sps:$4 sm:$0xff]  }
 0x661   :  { %v1596_v36 = vpop.f32.mrf.mxu1  ;;  %2038 = vmatpush1.bf16.msra.mxu0 %v4634_v26 }
 0x662   :  { %4375 = vmatprep.mubr.bf16.mxu0 %v1661_v31  ;;  %v1635_v38 = vmax.f32 %v1596_v36, 0.0  ;;  %v4637_v31 = vld [vmem:[%s6157_s11 + $0x60] ss:$8 sps:$4 sm:$0xff]   ;;  %2039 = vmatprep.subr.bf16.mxu0 %v4639_v29  ;;  %v4640_v36 = vld [vmem:[%s6157_s11 + $0x50] ss:$8 sps:$4 sm:$0xff]  }
 0x663   :  { %v4350_v37 = vpop.f32.mrf.mxu1  ;;  %4376 = vmatmul.mubr.bf16.gmra.mxu0 %v1662_v35  ;;  %v4642_v35 = vld [vmem:[%s6157_s11 + $0x54] ss:$8 sps:$4 sm:$0xff]  }
 0x664   :  { %v1638_v39 = vmax.f32 %v4350_v37, 0.0  ;;  %v4645_v37 = vld [vmem:[%s6157_s11 + $0x44] ss:$8 sps:$4 sm:$0xff]  }
 0x665   :  { %v1599_v41 = vpop.f32.mrf.mxu1  ;;  %2040 = vmatpush1.bf16.msra.mxu0 %v4637_v31 }
 0x666   :  { %v1636_v40 = vmax.f32 %v1599_v41, 0.0  ;;  %v1664_v32 = vpack.c.bf16 %v1638_v39, %v1637_v34  ;;  %2041 = vmatprep.subr.bf16.mxu0 %v4642_v35  ;;  %v4643_v39 = vld [vmem:[%s6157_s11 + $0x40] ss:$8 sps:$4 sm:$0xff]   ;;  %v4648_v41 = vld [vmem:[%s6157_s11 + $0x34] ss:$8 sps:$4 sm:$0xff]  }
 0x667   :  { %v4353_v33 = vpop.f32.mrf.mxu1  ;;  %v4649_v34 = vld [vmem:[%s6157_s11 + $0x20] ss:$8 sps:$4 sm:$0xff]  }
 0x668   :  { %v1663_v30 = vpack.c.bf16 %v1636_v40, %v1635_v38  ;;  %v1641_v16 = vmax.f32 %v4353_v33, 0.0  ;;  %v4646_v38 = vld [vmem:[%s6157_s11 + $0x30] ss:$8 sps:$4 sm:$0xff]   ;;  %v4651_v40 = vld [vmem:[%s6157_s11 + $0x24] ss:$8 sps:$4 sm:$0xff]  }
 0x669   :  { %v1612_v25 = vpop.f32.mrf.mxu1  ;;  %2042 = vmatpush1.bf16.msra.mxu0 %v4640_v36 }
 0x66a   :  { %4379 = vmatprep.mubr.bf16.mxu0 %v1663_v30  ;;  %v1639_v19 = vmax.f32 %v1612_v25, 0.0  ;;  %2043 = vmatprep.subr.bf16.mxu0 %v4645_v37 }
 0x66b   :  { %v4354_v20 = vpop.f32.mrf.mxu1  ;;  %4380 = vmatmul.mubr.bf16.gmra.mxu0 %v1664_v32 }
 0x66c   :  { %v1642_v28 = vmax.f32 %v4354_v20, 0.0 }
 0x66d   :  { %v1615_v23 = vpop.f32.mrf.mxu1  ;;  %2044 = vmatpush1.bf16.msra.mxu0 %v4643_v39 }
 0x66e   :  { %v1640_v21 = vmax.f32 %v1615_v23, 0.0  ;;  %v1666_v47 = vpack.c.bf16 %v1642_v28, %v1641_v16  ;;  %2045 = vmatprep.subr.bf16.mxu0 %v4648_v41 }
 0x670   :  { %v1665_v46 = vpack.c.bf16 %v1640_v21, %v1639_v19 }
 0x671   :  { %2046 = vmatpush1.bf16.msra.mxu0 %v4646_v38 }
 0x672   :  { %4383 = vmatprep.mubr.bf16.mxu0 %v1665_v46  ;;  %2047 = vmatprep.subr.bf16.mxu0 %v4651_v40 }
 0x673   :  { %4384 = vmatmul.mubr.bf16.gmra.mxu0 %v1666_v47 }
 0x674   :  { %2069 = vmatprep.mubr.bf16.mxu0 %v6162_v17 }
 0x675   :  { %2048 = vmatpush1.bf16.msra.mxu0 %v4649_v34 }
 0x71b   :  { %v4373_v33 = vpop.f32.mrf.mxu0 }
 0x71d   :  { %v1749_v30 = vpop.f32.mrf.mxu0 }
 0x71f   :  { %v4374_v32 = vpop.f32.mrf.mxu0 }
 0x720   :  { %v1813_v40 = vpack.c.bf16 %v4374_v32, %v4373_v33  ;;  %v2362_v33 = vmul.f32 1.442695, %v5259_v54 }
 0x721   :  { %v1752_v25 = vpop.f32.mrf.mxu0 }
 0x722   :  { %v1812_v34 = vpack.c.bf16 %v1752_v25, %v1749_v30  ;;  %v2364_v30 = vmul.f32 1.442695, %v5263_v56  ;;  %4658 = vpow2.f32 %v2362_v33  ;;  %v2378_v25 = vmul.f32 1.442695, %v5291_v6  ;;  %v4655_v33 = vld [vmem:[%s6157_s11] ss:$8 sps:$4 sm:$0xff]  }
 0x723   :  { %v4377_v20 = vpop.f32.mrf.mxu0 }
 0x724   :  { %4660 = vpow2.f32 %v2364_v30 }
 0x725   :  { %v1765_v28 = vpop.f32.mrf.mxu0 }
 0x727   :  { %v4378_v23 = vpop.f32.mrf.mxu0 }
 0x728   :  { %v1815_v41 = vpack.c.bf16 %v4378_v23, %v4377_v20  ;;  %v2345_v20 = vld [vmem:[%s6150_s4 + $0x8] sm:$0xff] }
 0x729   :  { %v1768_v19 = vpop.f32.mrf.mxu0 }
 0x72a   :  { %v1814_v38 = vpack.c.bf16 %v1768_v19, %v1765_v28  ;;  %v2380_v28 = vmul.f32 1.442695, %v5295_v8  ;;  %v4654_v19 = vld [vmem:[%s6157_s11 + $0x14] ss:$8 sps:$4 sm:$0xff]  }
 0x72b   :  { %v4381_v21 = vpop.f32.mrf.mxu0  ;;  %2049 = vmatprep.subr.bf16.mxu0 %v4654_v19  ;;  %v2351_v19 = vld [vmem:[%s6150_s4 + $0x38] sm:$0xff] }
 0x72d   :  { %v1781_v16 = vpop.f32.mrf.mxu0 }
 0x72f   :  { %v4382_v46 = vpop.f32.mrf.mxu0  ;;  %v4659_v32 = vpop.eup %4658 }
 0x730   :  { %v1817_v37 = vpack.c.bf16 %v4382_v46, %v4381_v21  ;;  %v2346_v21 = vld [vmem:[%s6150_s4 + $0x10] sm:$0xff]  ;;  %v2382_v46 = vmul.f32 1.442695, %v5299_v10 }
 0x731   :  { %v1784_v47 = vpop.f32.mrf.mxu0  ;;  %v4661_v23 = vpop.eup %4660 }
 0x732   :  { %v1816_v39 = vpack.c.bf16 %v1784_v47, %v1781_v16  ;;  %v2393_v16 = vmul.f32 %v4659_v32, %v2345_v20  ;;  %v4652_v47 = vld [vmem:[%s6157_s11 + $0x10] ss:$8 sps:$4 sm:$0xff]   ;;  %v2390_v20 = vmul.f32 1.442695, %v5315_v44 }
 0x733   :  { %v4385_v26 = vpop.f32.mrf.mxu0  ;;  %2050 = vmatpush1.bf16.msra.mxu0 %v4652_v47 }
 0x735   :  { %v1797_v27 = vpop.f32.mrf.mxu0 }
 0x737   :  { %v4386_v29 = vpop.f32.mrf.mxu0 }
 0x738   :  { %v1819_v31 = vpack.c.bf16 %v4386_v29, %v4385_v26 }
 0x739   :  { %v1800_v35 = vpop.f32.mrf.mxu0 }
 0x73a   :  { %v1818_v36 = vpack.c.bf16 %v1800_v35, %v1797_v27  ;;  %4387 = vmatprep.subr.bf16.mxu1 %v1819_v31  ;;  %v2347_v27 = vld [vmem:[%s6150_s4 + $0x18] sm:$0xff]  ;;  %v2344_v35 = vld [vmem:[%s6150_s4] sm:$0xff] }
 0x73b   :  { %4388 = vmatpush3.bf16.msra.mxu1 %v1819_v31  ;;  %v2384_v31 = vmul.f32 1.442695, %v5303_v12 }
 0x73c   :  { %4389 = vmatprep.subr.bf16.mxu1 %v1818_v36 }
 0x73f   :  { %4390 = vmatpush3.bf16.msra.mxu1 %v1818_v36  ;;  %v2394_v36 = vmul.f32 %v4661_v23, %v2346_v21 }
 0x740   :  { %4391 = vmatprep.subr.bf16.mxu1 %v1817_v37 }
 0x743   :  { %4392 = vmatpush3.bf16.msra.mxu1 %v1817_v37 }
 0x744   :  { %4393 = vmatprep.subr.bf16.mxu1 %v1816_v39 }
 0x747   :  { %4394 = vmatpush3.bf16.msra.mxu1 %v1816_v39  ;;  %v2348_v39 = vld [vmem:[%s6150_s4 + $0x20] sm:$0xff] }
 0x748   :  { %4395 = vmatprep.subr.bf16.mxu1 %v1815_v41 }
 0x74b   :  { %4396 = vmatpush3.bf16.msra.mxu1 %v1815_v41  ;;  %v4657_v41 = vld [vmem:[%s6157_s11 + $0x4] ss:$8 sps:$4 sm:$0xff]  }
 0x74c   :  { %4397 = vmatprep.subr.bf16.mxu1 %v1814_v38  ;;  %2051 = vmatprep.subr.bf16.mxu0 %v4657_v41 }
 0x74d   :  { %2052 = vmatpush1.bf16.msra.mxu0 %v4655_v33 }
 0x74f   :  { %4398 = vmatpush3.bf16.msra.mxu1 %v1814_v38  ;;  %v5400_v38 = vadd.f32 %v2393_v16, %v5257_v53 }
 0x750   :  { %4399 = vmatprep.subr.bf16.mxu1 %v1813_v40 }
 0x751   :  { %v2425_v32 = vmul.f32 0.0, %v5400_v38 }
 0x753   :  { %4400 = vmatpush3.bf16.msra.mxu1 %v1813_v40 }
 0x754   :  { %4401 = vmatprep.subr.bf16.mxu1 %v1812_v34 }
 0x757   :  { %4402 = vmatpush3.bf16.msra.mxu1 %v1812_v34  ;;  %v2386_v34 = vmul.f32 1.442695, %v5307_v14 }
 0x75a   :  { %4404 = vmatmul.mubr.bf16.vlgmr.msra.gmra.mxu1 %v5232_v48  ;;  %v2366_v48 = vmul.f32 1.442695, %v5267_v58 }
 0x75b   :  { %4407 = vmatprep.mubr.bf16.mxu1 %v5234_v22  ;;  %v2360_v22 = vmul.f32 1.442695, %v5255_v45 }
 0x75c   :  { %4662 = vpow2.f32 %v2366_v48  ;;  %v2349_v48 = vld [vmem:[%s6150_s4 + $0x28] sm:$0xff] }
 0x75d   :  { %4664 = vpow2.f32 %v2360_v22 }
 0x762   :  { %4408 = vmatmul.mubr.bf16.gmra.mxu1 %v5238_v49  ;;  %v2368_v49 = vmul.f32 1.442695, %v5271_v60 }
 0x763   :  { %4411 = vmatprep.mubr.bf16.mxu1 %v5240_v50  ;;  %v2370_v50 = vmul.f32 1.442695, %v5275_v62 }
 0x764   :  { %4666 = vpow2.f32 %v2368_v49 }
 0x765   :  { %4668 = vpow2.f32 %v2370_v50  ;;  %v2388_v50 = vmul.f32 1.442695, %v5311_v18 }
 0x769   :  { %v4663_v26 = vpop.eup %4662 }
 0x76a   :  { %4412 = vmatmul.mubr.bf16.gmra.mxu1 %v5244_v51  ;;  %v2372_v51 = vmul.f32 1.442695, %v5279_v0  ;;  %v4665_v29 = vpop.eup %4664  ;;  %v2395_v40 = vmul.f32 %v4663_v26, %v2347_v27  ;;  %v2352_v27 = vld [vmem:[%s6150_s4 + $0x40] sm:$0xff] }
 0x76b   :  { %4415 = vmatprep.mubr.bf16.mxu1 %v5246_v52  ;;  %v2374_v52 = vmul.f32 1.442695, %v5283_v2  ;;  %v2392_v22 = vmul.f32 %v4665_v29, %v2344_v35 }
 0x76c   :  { %4670 = vpow2.f32 %v2372_v51  ;;  %v5411_v51 = vadd.f32 %v2394_v36, %v5261_v55 }
 0x76d   :  { %4672 = vpow2.f32 %v2374_v52  ;;  %v5425_v21 = vadd.f32 %v2392_v22, %v5253_v43 }
 0x76e   :  { %v2426_v47 = vmul.f32 0.0, %v5411_v51 }
 0x76f   :  { %v2440_v29 = vadd.f32 %v2425_v32, %v5425_v21  ;;  %v2355_v32 = vld [vmem:[%s6150_s4 + $0x58] sm:$0xff] }
 0x771   :  { %v4667_v37 = vpop.eup %4666  ;;  %v2441_v33 = vadd.f32 %v2440_v29, %v2426_v47  ;;  %v2356_v47 = vld [vmem:[%s6150_s4 + $0x60] sm:$0xff] }
 0x772   :  { %4416 = vmatmul.mubr.bf16.gmra.mxu1 %v5250_v24  ;;  %v2376_v24 = vmul.f32 1.442695, %v5287_v4  ;;  %v4669_v30 = vpop.eup %4668  ;;  %v2396_v49 = vmul.f32 %v4667_v37, %v2348_v39  ;;  %v2353_v39 = vld [vmem:[%s6150_s4 + $0x48] sm:$0xff] }
 0x773   :  { %2198 = vmatprep.mubr.bf16.mxu1 %v6162_v17 }
 0x774   :  { %4674 = vpow2.f32 %v2376_v24  ;;  %v2350_v24 = vld [vmem:[%s6150_s4 + $0x30] sm:$0xff] }
 0x775   :  { %4676 = vpow2.f32 %v2378_v25  ;;  %v2397_v25 = vmul.f32 %v4669_v30, %v2349_v48  ;;  %v2354_v48 = vld [vmem:[%s6150_s4 + $0x50] sm:$0xff] }
 0x776   :  { %4678 = vpow2.f32 %v2380_v28  ;;  %v5419_v28 = vadd.f32 %v2395_v40, %v5265_v57 }
 0x777   :  { %4680 = vpow2.f32 %v2382_v46  ;;  %v5428_v46 = vadd.f32 %v2396_v49, %v5269_v59 }
 0x778   :  { %4682 = vpow2.f32 %v2384_v31  ;;  %v5436_v31 = vadd.f32 %v2397_v25, %v5273_v61  ;;  %v2427_v36 = vmul.f32 0.0, %v5419_v28 }
 0x779   :  { %v4671_v52 = vpop.eup %4670  ;;  %4684 = vpow2.f32 %v2386_v34  ;;  %v2428_v34 = vmul.f32 0.0, %v5428_v46 }
 0x77a   :  { %v4673_v23 = vpop.eup %4672  ;;  %v2398_v16 = vmul.f32 %v4671_v52, %v2350_v24  ;;  %4686 = vpow2.f32 %v2388_v50  ;;  %v2429_v50 = vmul.f32 0.0, %v5436_v31  ;;  %v2442_v52 = vadd.f32 %v2441_v33, %v2427_v36 }
 0x77b   :  { %v2399_v35 = vmul.f32 %v4673_v23, %v2351_v19  ;;  %4688 = vpow2.f32 %v2390_v20 }
 0x77c   :  { %v5443_v41 = vadd.f32 %v2398_v16, %v5277_v63  ;;  %v2443_v19 = vadd.f32 %v2442_v52, %v2428_v34 }
 0x77d   :  { %v5450_v22 = vadd.f32 %v2399_v35, %v5281_v1 }
 0x77e   :  { %v2430_v23 = vmul.f32 0.0, %v5443_v41  ;;  %v2444_v35 = vadd.f32 %v2443_v19, %v2429_v50 }
 0x780   :  { %v2445_v33 = vadd.f32 %v2444_v35, %v2430_v23 }
 0x781   :  { %v4675_v26 = vpop.eup %4674 }
 0x782   :  { %v4677_v37 = vpop.eup %4676  ;;  %v2400_v40 = vmul.f32 %v4675_v26, %v2352_v27  ;;  %v2431_v26 = vmul.f32 0.0, %v5450_v22 }
 0x783   :  { %v4679_v30 = vpop.eup %4678  ;;  %v2401_v49 = vmul.f32 %v4677_v37, %v2353_v39  ;;  %v2357_v37 = vld [vmem:[%s6150_s4 + $0x68] sm:$0xff] }
 0x784   :  { %v4681_v24 = vpop.eup %4680  ;;  %v5457_v25 = vadd.f32 %v2400_v40, %v5285_v3  ;;  %v2402_v20 = vmul.f32 %v4679_v30, %v2354_v48  ;;  %v2358_v48 = vld [vmem:[%s6150_s4 + $0x70] sm:$0xff] }
 0x785   :  { %v4683_v16 = vpop.eup %4682  ;;  %v5465_v27 = vadd.f32 %v2401_v49, %v5289_v5  ;;  %v2403_v29 = vmul.f32 %v4681_v24, %v2355_v32  ;;  %v2446_v24 = vadd.f32 %v2445_v33, %v2431_v26 }
 0x786   :  { %v4685_v36 = vpop.eup %4684  ;;  %v2432_v39 = vmul.f32 0.0, %v5457_v25  ;;  %v5472_v40 = vadd.f32 %v2402_v20, %v5293_v7  ;;  %v2404_v34 = vmul.f32 %v4683_v16, %v2356_v47  ;;  %v2359_v20 = vld [vmem:[%s6150_s4 + $0x78] sm:$0xff] }
 0x787   :  { %v4687_v30 = vpop.eup %4686  ;;  %v2433_v49 = vmul.f32 0.0, %v5465_v27  ;;  %v5479_v50 = vadd.f32 %v2403_v29, %v5297_v9  ;;  %v2405_v52 = vmul.f32 %v4685_v36, %v2357_v37 }
 0x788   :  { %v4689_v32 = vpop.eup %4688  ;;  %v2434_v19 = vmul.f32 0.0, %v5472_v40  ;;  %v5486_v23 = vadd.f32 %v2404_v34, %v5301_v11  ;;  %v2406_v16 = vmul.f32 %v4687_v30, %v2358_v48  ;;  %v2447_v47 = vadd.f32 %v2446_v24, %v2432_v39 }
 0x789   :  { %v2435_v35 = vmul.f32 0.0, %v5479_v50  ;;  %v5490_v17 = vadd.f32 %v2405_v52, %v5305_v13  ;;  %v2407_v29 = vmul.f32 %v4689_v32, %v2359_v20 }
 0x78a   :  { %v2448_v36 = vadd.f32 %v2447_v47, %v2433_v49  ;;  %v2436_v26 = vmul.f32 0.0, %v5486_v23  ;;  %v5494_v37 = vadd.f32 %v2406_v16, %v5309_v15  ;;  %v5505_v49 = vld [vmem:[%s6158_s12 + $0x78] sm:$0xff] }
 0x78b   :  { %v2437_v44 = vmul.f32 0.0, %v5490_v17  ;;  %v5498_v34 = vadd.f32 %v2407_v29, %v5313_v42  ;;  %4419 = vmatprep.subr.mxu0 %v5505_v49 }
 0x78c   :  { %v2449_v33 = vadd.f32 %v2448_v36, %v2434_v19  ;;  %v2438_v39 = vmul.f32 0.0, %v5494_v37 }
 0x78d   :  { %v2439_v52 = vmul.f32 0.0, %v5498_v34 }
 0x78e   :  { %v2450_v30 = vadd.f32 %v2449_v33, %v2435_v35 }
 0x790   :  { %v2451_v48 = vadd.f32 %v2450_v30, %v2436_v26 }
 0x792   :  { %v2452_v24 = vadd.f32 %v2451_v48, %v2437_v44 }
 0x794   :  { %v2453_v32 = vadd.f32 %v2452_v24, %v2438_v39 }
 0x796   :  { %v2454_v20 = vadd.f32 %v2453_v32, %v2439_v52 }
 0x798   :  { %v2455_v19 = vrot.slane %v2454_v20, 4 }
 0x79a   :  { %v2456_v16 = vadd.f32 %v2455_v19, %v2454_v20 }
 0x79c   :  { %v2457_v47 = vrot.slane %v2456_v16, 2 }
 0x79e   :  { %v2458_v29 = vadd.f32 %v2457_v47, %v2456_v16 }
 0x7a0   :  { %v2459_v35 = vrot.slane %v2458_v29, 1 }
 0x7a2   :  { %v2460_v36 = vadd.f32 %v2459_v35, %v2458_v29 }
 0x7a4   :  { %v2461_v33 = vmul.f32 0.125, %v2460_v36 }
 0x7a6   :  { %v5509_v26 = vsub.f32 %v5400_v38, %v2461_v33  ;;  %v5513_v30 = vsub.f32 %v5425_v21, %v2461_v33  ;;  %v5516_v39 = vsub.f32 %v5411_v51, %v2461_v33  ;;  %v5519_v52 = vsub.f32 %v5419_v28, %v2461_v33 }
 0x7a7   :  { %v5525_v38 = vsub.f32 %v5428_v46, %v2461_v33  ;;  %v5529_v51 = vsub.f32 %v5436_v31, %v2461_v33  ;;  %v5533_v35 = vsub.f32 %v5443_v41, %v2461_v33  ;;  %v5537_v46 = vsub.f32 %v5450_v22, %v2461_v33 }
 0x7a8   :  { %v2479_v44 = vmul.f32 0.0, %v5509_v26  ;;  %v2480_v24 = vmul.f32 0.0, %v5516_v39  ;;  %v2494_v32 = vmul.f32 %v5513_v30, %v5513_v30  ;;  %v2481_v19 = vmul.f32 0.0, %v5519_v52 }
 0x7a9   :  { %v2482_v47 = vmul.f32 0.0, %v5525_v38  ;;  %v2483_v36 = vmul.f32 0.0, %v5529_v51  ;;  %v5541_v31 = vsub.f32 %v5457_v25, %v2461_v33  ;;  %v5545_v41 = vsub.f32 %v5465_v27, %v2461_v33 }
 0x7aa   :  { %v2495_v48 = vmul.f32 %v2479_v44, %v2479_v44  ;;  %v2496_v21 = vmul.f32 %v2480_v24, %v2480_v24  ;;  %v2497_v28 = vmul.f32 %v2481_v19, %v2481_v19  ;;  %v2484_v24 = vmul.f32 0.0, %v5533_v35 }
 0x7ab   :  { %v2498_v44 = vmul.f32 %v2482_v47, %v2482_v47  ;;  %v2485_v19 = vmul.f32 0.0, %v5537_v46  ;;  %v2486_v47 = vmul.f32 0.0, %v5541_v31  ;;  %v5549_v22 = vsub.f32 %v5472_v40, %v2461_v33 }
 0x7ac   :  { %v2510_v20 = vadd.f32 %v2495_v48, %v2494_v32  ;;  %v2499_v32 = vmul.f32 %v2483_v36, %v2483_v36  ;;  %v2487_v36 = vmul.f32 0.0, %v5545_v41  ;;  %v5553_v25 = vsub.f32 %v5479_v50, %v2461_v33 }
 0x7ad   :  { %v5557_v27 = vsub.f32 %v5486_v23, %v2461_v33  ;;  %v5561_v40 = vsub.f32 %v5490_v17, %v2461_v33 }
 0x7ae   :  { %v2511_v16 = vadd.f32 %v2510_v20, %v2496_v21  ;;  %v2500_v21 = vmul.f32 %v2484_v24, %v2484_v24  ;;  %v2488_v24 = vmul.f32 0.0, %v5549_v22 }
 0x7b0   :  { %v2512_v29 = vadd.f32 %v2511_v16, %v2497_v28  ;;  %v2501_v28 = vmul.f32 %v2485_v19, %v2485_v19  ;;  %v2489_v19 = vmul.f32 0.0, %v5553_v25 }
 0x7b2   :  { %v2513_v48 = vadd.f32 %v2512_v29, %v2498_v44  ;;  %v2502_v44 = vmul.f32 %v2486_v47, %v2486_v47  ;;  %v2490_v47 = vmul.f32 0.0, %v5557_v27 }
 0x7b4   :  { %v2514_v20 = vadd.f32 %v2513_v48, %v2499_v32  ;;  %v2503_v32 = vmul.f32 %v2487_v36, %v2487_v36  ;;  %v2491_v36 = vmul.f32 0.0, %v5561_v40 }
 0x7b6   :  { %v2515_v16 = vadd.f32 %v2514_v20, %v2500_v21  ;;  %v2504_v21 = vmul.f32 %v2488_v24, %v2488_v24  ;;  %v5569_v24 = vsub.f32 %v5498_v34, %v2461_v33 }
 0x7b8   :  { %v2516_v29 = vadd.f32 %v2515_v16, %v2501_v28  ;;  %v2505_v28 = vmul.f32 %v2489_v19, %v2489_v19 }
 0x7ba   :  { %v2517_v48 = vadd.f32 %v2516_v29, %v2502_v44  ;;  %v5565_v44 = vsub.f32 %v5494_v37, %v2461_v33  ;;  %v2493_v37 = vmul.f32 0.0, %v5569_v24  ;;  %v6222_v33 = vmov 0  }
 0x7bc   :  { %v2518_v20 = vadd.f32 %v2517_v48, %v2503_v32  ;;  %v2506_v48 = vmul.f32 %v2490_v47, %v2490_v47  ;;  %v2492_v17 = vmul.f32 0.0, %v5565_v44 }
 0x7be   :  { %v2519_v16 = vadd.f32 %v2518_v20, %v2504_v21  ;;  %v2507_v20 = vmul.f32 %v2491_v36, %v2491_v36  ;;  %v2508_v12 = vmul.f32 %v2492_v17, %v2492_v17  ;;  %v2563_v36 = vld [vmem:[%s6158_s12 + $0x68] sm:$0xff]  ;;  %v2562_v17 = vld [vmem:[%s6158_s12 + $0x60] sm:$0xff] }
 0x7c0   :  { %v2520_v29 = vadd.f32 %v2519_v16, %v2505_v28 }
 0x7c2   :  { %v2521_v32 = vadd.f32 %v2520_v29, %v2506_v48  ;;  %v2564_v29 = vld [vmem:[%s6158_s12 + $0x70] sm:$0xff]  ;;  %v2509_v48 = vmul.f32 %v2493_v37, %v2493_v37 }
 0x7c4   :  { %v2522_v14 = vadd.f32 %v2521_v32, %v2507_v20 }
 0x7c6   :  { %v2523_v34 = vadd.f32 %v2522_v14, %v2508_v12 }
 0x7c8   :  { %v2524_v20 = vadd.f32 %v2523_v34, %v2509_v48 }
 0x81a   :  { %v4405_v50 = vpop.f32.mrf.mxu1 }
 0x81b   :  { %v1919_v12 = vmax.f32 %v4405_v50, 0.0  ;;  %v2559_v50 = vld [vmem:[%s6158_s12 + $0x48] sm:$0xff] }
 0x81c   :  { %v1854_v23 = vpop.f32.mrf.mxu1 }
 0x81d   :  { %v1917_v19 = vmax.f32 %v1854_v23, 0.0 }
 0x81e   :  { %v4406_v18 = vpop.f32.mrf.mxu1 }
 0x81f   :  { %v1920_v23 = vmax.f32 %v4406_v18, 0.0  ;;  %v2560_v18 = vld [vmem:[%s6158_s12 + $0x50] sm:$0xff] }
 0x820   :  { %v1857_v21 = vpop.f32.mrf.mxu1 }
 0x821   :  { %v1918_v16 = vmax.f32 %v1857_v21, 0.0  ;;  %v1950_v14 = vpack.c.bf16 %v1920_v23, %v1919_v12  ;;  %v2525_v21 = vrot.slane %v2524_v20, 4 }
 0x822   :  { %v5572_v28 = vpop.f32.mrf.mxu1 }
 0x823   :  { %v1949_v10 = vpack.c.bf16 %v1918_v16, %v1917_v19  ;;  %v2526_v34 = vadd.f32 %v2525_v21, %v2524_v20  ;;  %v2555_v20 = vld [vmem:[%s6158_s12 + $0x28] sm:$0xff]  ;;  %v1923_v12 = vmax.f32 %v5572_v28, 0.0  ;;  %v2553_v21 = vld [vmem:[%s6158_s12 + $0x18] sm:$0xff] }
 0x824   :  { %v1870_v47 = vpop.f32.mrf.mxu1 }
 0x825   :  { %2070 = vmatmul.mubr.bf16.vlgmr.msra.gmra.mxu0 %v1949_v10  ;;  %v2561_v10 = vld [vmem:[%s6158_s12 + $0x58] sm:$0xff]  ;;  %v1921_v19 = vmax.f32 %v1870_v47, 0.0  ;;  %v2556_v47 = vld [vmem:[%s6158_s12 + $0x30] sm:$0xff] }
 0x826   :  { %2079 = vmatprep.mubr.bf16.mxu0 %v6222_v33  ;;  %4420 = vmatpush3.msra.mxu0 %v5505_v49  ;;  %v4410_v32 = vpop.f32.mrf.mxu1 }
 0x827   :  { %4421 = vmatprep.subr.mxu0 %v2564_v29 }
 0x828   :  { %4422 = vmatpush3.msra.mxu0 %v2564_v29  ;;  %v1873_v49 = vpop.f32.mrf.mxu1  ;;  %v2558_v29 = vld [vmem:[%s6158_s12 + $0x40] sm:$0xff] }
 0x829   :  { %4423 = vmatprep.subr.mxu0 %v2563_v36  ;;  %v1922_v16 = vmax.f32 %v1873_v49, 0.0  ;;  %v2554_v49 = vld [vmem:[%s6158_s12 + $0x20] sm:$0xff] }
 0x82a   :  { %4424 = vmatpush3.msra.mxu0 %v2563_v36  ;;  %v4413_v37 = vpop.f32.mrf.mxu1  ;;  %v2557_v36 = vld [vmem:[%s6158_s12 + $0x38] sm:$0xff] }
 0x82b   :  { %4425 = vmatprep.subr.mxu0 %v2562_v17  ;;  %v1951_v48 = vpack.c.bf16 %v1922_v16, %v1921_v19  ;;  %v2551_v16 = vld [vmem:[%s6158_s12 + $0x8] sm:$0xff] }
 0x82c   :  { %4426 = vmatpush3.msra.mxu0 %v2562_v17  ;;  %v1886_v23 = vpop.f32.mrf.mxu1  ;;  %v2527_v17 = vrot.slane %v2526_v34, 2 }
 0x82d   :  { %2080 = vmatmul.mubr.bf16.gmra.mxu0 %v1950_v14  ;;  %4427 = vmatprep.subr.mxu0 %v2561_v10 }
 0x82e   :  { %2089 = vmatprep.mubr.bf16.mxu0 %v6222_v33  ;;  %4428 = vmatpush3.msra.mxu0 %v2561_v10  ;;  %v1924_v10 = vmax.f32 %v4410_v32, 0.0  ;;  %v4414_v14 = vpop.f32.mrf.mxu1  ;;  %v2552_v32 = vld [vmem:[%s6158_s12 + $0x10] sm:$0xff] }
 0x82f   :  { %4429 = vmatprep.subr.mxu0 %v2560_v18 }
 0x830   :  { %4430 = vmatpush3.msra.mxu0 %v2560_v18  ;;  %v2528_v18 = vadd.f32 %v2527_v17, %v2526_v34  ;;  %v1889_v19 = vpop.f32.mrf.mxu1 }
 0x831   :  { %4431 = vmatprep.subr.mxu0 %v2559_v50  ;;  %v1926_v34 = vmax.f32 %v1889_v19, 0.0 }
 0x832   :  { %4432 = vmatpush3.msra.mxu0 %v2559_v50  ;;  %v1952_v50 = vpack.c.bf16 %v1924_v10, %v1923_v12  ;;  %v2529_v28 = vrot.slane %v2528_v18, 1  ;;  %v1928_v10 = vmax.f32 %v4414_v14, 0.0 }
 0x833   :  { %4433 = vmatprep.subr.mxu0 %v2558_v29 }
 0x834   :  { %4434 = vmatpush3.msra.mxu0 %v2558_v29  ;;  %v1925_v29 = vmax.f32 %v1886_v23, 0.0  ;;  %v1927_v23 = vmax.f32 %v4413_v37, 0.0 }
 0x835   :  { %2090 = vmatmul.mubr.bf16.gmra.mxu0 %v1951_v48  ;;  %4435 = vmatprep.subr.mxu0 %v2557_v36  ;;  %v2530_v48 = vadd.f32 %v2529_v28, %v2528_v18 }
 0x836   :  { %2099 = vmatprep.mubr.bf16.mxu0 %v6222_v33  ;;  %4436 = vmatpush3.msra.mxu0 %v2557_v36  ;;  %v4417_v36 = vpop.f32.mrf.mxu1  ;;  %v1953_v17 = vpack.c.bf16 %v1926_v34, %v1925_v29  ;;  %v1954_v18 = vpack.c.bf16 %v1928_v10, %v1927_v23 }
 0x837   :  { %4437 = vmatprep.subr.mxu0 %v2556_v47  ;;  %v2531_v12 = vmul.f32 0.14285715, %v2530_v48 }
 0x838   :  { %4438 = vmatpush3.msra.mxu0 %v2556_v47  ;;  %v2550_v47 = vld [vmem:[%s6158_s12] sm:$0xff] }
 0x839   :  { %4439 = vmatprep.subr.mxu0 %v2555_v20 }
 0x83a   :  { %4440 = vmatpush3.msra.mxu0 %v2555_v20  ;;  %v1902_v20 = vpop.f32.mrf.mxu1 }
 0x83b   :  { %4441 = vmatprep.subr.mxu0 %v2554_v49  ;;  %v1929_v19 = vmax.f32 %v1902_v20, 0.0 }
 0x83c   :  { %4442 = vmatpush3.msra.mxu0 %v2554_v49  ;;  %v4418_v49 = vpop.f32.mrf.mxu1 }
 0x83d   :  { %2100 = vmatmul.mubr.bf16.gmra.mxu0 %v1952_v50  ;;  %4443 = vmatprep.subr.mxu0 %v2553_v21  ;;  %v1932_v29 = vmax.f32 %v4418_v49, 0.0 }
 0x83e   :  { %2109 = vmatprep.mubr.bf16.mxu0 %v6222_v33  ;;  %4444 = vmatpush3.msra.mxu0 %v2553_v21  ;;  %v2532_v21 = vmax.f32 %v2531_v12, 1e-12  ;;  %v1905_v50 = vpop.f32.mrf.mxu1 }
 0x83f   :  { %4445 = vmatprep.subr.mxu0 %v2552_v32  ;;  %v1930_v28 = vmax.f32 %v1905_v50, 0.0 }
 0x840   :  { %4446 = vmatpush3.msra.mxu0 %v2552_v32  ;;  %4690 = vrsqrt.f32 %v2532_v21 }
 0x841   :  { %4447 = vmatprep.subr.mxu0 %v2551_v16  ;;  %v1955_v32 = vpack.c.bf16 %v1930_v28, %v1929_v19 }
 0x842   :  { %4448 = vmatpush3.msra.mxu0 %v2551_v16  ;;  %v1931_v16 = vmax.f32 %v4417_v36, 0.0 }
 0x843   :  { %4449 = vmatprep.subr.mxu0 %v2550_v47 }
 0x844   :  { %4450 = vmatpush3.msra.mxu0 %v2550_v47  ;;  %v1956_v48 = vpack.c.bf16 %v1932_v29, %v1931_v16 }
 0x845   :  { %2110 = vmatmul.mubr.bf16.gmra.mxu0 %v1953_v17 }
 0x846   :  { %2119 = vmatprep.mubr.bf16.mxu0 %v6222_v33 }
 0x84d   :  { %2120 = vmatmul.mubr.bf16.gmra.mxu0 %v1954_v18  ;;  %v4691_v34 = vpop.eup %4690 }
 0x84e   :  { %2129 = vmatprep.mubr.bf16.mxu0 %v6222_v33  ;;  %v2534_v37 = vmul.f32 %v4691_v34, %v5513_v30  ;;  %v2535_v14 = vmul.f32 %v4691_v34, %v5509_v26  ;;  %v2536_v47 = vmul.f32 %v4691_v34, %v5516_v39  ;;  %v2537_v17 = vmul.f32 %v4691_v34, %v5519_v52 }
 0x84f   :  { %v2538_v20 = vmul.f32 %v4691_v34, %v5525_v38  ;;  %v2539_v36 = vmul.f32 %v4691_v34, %v5529_v51  ;;  %v2540_v12 = vmul.f32 %v4691_v34, %v5533_v35  ;;  %v2541_v30 = vmul.f32 %v4691_v34, %v5537_v46 }
 0x850   :  { %v2542_v26 = vmul.f32 %v4691_v34, %v5541_v31  ;;  %v2543_v39 = vmul.f32 %v4691_v34, %v5545_v41  ;;  %v2544_v52 = vmul.f32 %v4691_v34, %v5549_v22  ;;  %v2545_v38 = vmul.f32 %v4691_v34, %v5553_v25 }
 0x851   :  { %v2546_v51 = vmul.f32 %v4691_v34, %v5557_v27  ;;  %v2547_v35 = vmul.f32 %v4691_v34, %v5561_v40  ;;  %v2548_v46 = vmul.f32 %v4691_v34, %v5565_v44  ;;  %v2549_v31 = vmul.f32 %v4691_v34, %v5569_v24 }
 0x855   :  { %2130 = vmatmul.mubr.bf16.gmra.mxu0 %v1955_v32 }
 0x856   :  { %2139 = vmatprep.mubr.bf16.mxu0 %v6222_v33 }
 0x85d   :  { %2140 = vmatmul.mubr.bf16.gmra.mxu0 %v1956_v48 }
 0x85e   :  { %4451 = vmatprep.mubr.f32.mxu0 %v2534_v37 }
 0x865   :  { %4452 = vmatmul.mubr.f32.vlgmr.msra.gmra.mxu0 %v2535_v14 }
 0x866   :  { %4454 = vmatprep.mubr.f32.mxu0 %v2536_v47 }
 0x869   :  { %4455 = vmatmul.mubr.f32.gmra.mxu0 %v2537_v17 }
 0x86a   :  { %4457 = vmatprep.mubr.f32.mxu0 %v2538_v20 }
 0x86d   :  { %4458 = vmatmul.mubr.f32.gmra.mxu0 %v2539_v36 }
 0x86e   :  { %4460 = vmatprep.mubr.f32.mxu0 %v2540_v12 }
 0x871   :  { %4461 = vmatmul.mubr.f32.gmra.mxu0 %v2541_v30 }
 0x872   :  { %4463 = vmatprep.mubr.f32.mxu0 %v2542_v26 }
 0x875   :  { %4464 = vmatmul.mubr.f32.gmra.mxu0 %v2543_v39 }
 0x876   :  { %4466 = vmatprep.mubr.f32.mxu0 %v2544_v52 }
 0x879   :  { %4467 = vmatmul.mubr.f32.gmra.mxu0 %v2545_v38 }
 0x87a   :  { %4469 = vmatprep.mubr.f32.mxu0 %v2546_v51 }
 0x87d   :  { %4470 = vmatmul.mubr.f32.gmra.mxu0 %v2547_v35 }
 0x87e   :  { %4472 = vmatprep.mubr.f32.mxu0 %v2548_v46 }
 0x881   :  { %4473 = vmatmul.mubr.f32.gmra.mxu0 %v2549_v31 }
 0x8e5   :  { %v5645_v41 = vpop.f32.mrf.mxu0 }
 0x8e7   :  { %v2073_v22 = vpop.f32.mrf.mxu0 }
 0x8e9   :  { %v2075_v23 = vpop.f32.mrf.mxu0 }
 0x8ea   :  { %v2150_v10 = vpack.c.bf16 %v2075_v23, %v5645_v41 }
 0x8eb   :  { %v2077_v25 = vpop.f32.mrf.mxu0 }
 0x8ec   :  { %v2151_v49 = vpack.c.bf16 %v2077_v25, %v2073_v22 }
 0x8ed   :  { %v2081_v27 = vpop.f32.mrf.mxu0 }
 0x8ef   :  { %v2083_v21 = vpop.f32.mrf.mxu0 }
 0x8f1   :  { %v2085_v18 = vpop.f32.mrf.mxu0 }
 0x8f2   :  { %v2152_v50 = vpack.c.bf16 %v2085_v18, %v2081_v27 }
 0x8f3   :  { %v2087_v40 = vpop.f32.mrf.mxu0 }
 0x8f4   :  { %v2153_v19 = vpack.c.bf16 %v2087_v40, %v2083_v21 }
 0x8f5   :  { %v2091_v44 = vpop.f32.mrf.mxu0 }
 0x8f7   :  { %v2093_v28 = vpop.f32.mrf.mxu0 }
 0x8f9   :  { %v2095_v32 = vpop.f32.mrf.mxu0 }
 0x8fb   :  { %v2097_v16 = vpop.f32.mrf.mxu0 }
 0x8fc   :  { %v2155_v4 = vpack.c.bf16 %v2097_v16, %v2093_v28  ;;  %v2929_v28 = vld [vmem:[#allocation15 + $0x60] sm:$0xff]  ;;  %v2927_v16 = vld [vmem:[#allocation15 + $0x50] sm:$0xff] }
 0x8fd   :  { %v2101_v24 = vpop.f32.mrf.mxu0 }
 0x8ff   :  { %v2103_v29 = vpop.f32.mrf.mxu0 }
 0x901   :  { %v2105_v34 = vpop.f32.mrf.mxu0 }
 0x902   :  { %v2156_v6 = vpack.c.bf16 %v2105_v34, %v2101_v24  ;;  %v2926_v24 = vld [vmem:[#allocation15 + $0x48] sm:$0xff]  ;;  %v2924_v34 = vld [vmem:[#allocation15 + $0x38] sm:$0xff] }
 0x903   :  { %v2107_v48 = vpop.f32.mrf.mxu0 }
 0x904   :  { %v2157_v8 = vpack.c.bf16 %v2107_v48, %v2103_v29  ;;  %v4728_v29 = vld [vmem:[#allocation4 + $0x10] sm:$0xff]  }
 0x905   :  { %v2111_v37 = vpop.f32.mrf.mxu0  ;;  %v2923_v48 = vld [vmem:[#allocation15 + $0x30] sm:$0xff] }
 0x907   :  { %v2113_v14 = vpop.f32.mrf.mxu0 }
 0x909   :  { %v2115_v47 = vpop.f32.mrf.mxu0 }
 0x90a   :  { %v2158_v40 = vpack.c.bf16 %v2115_v47, %v2111_v37  ;;  %v2922_v37 = vld [vmem:[#allocation15 + $0x28] sm:$0xff]  ;;  %v2921_v47 = vld [vmem:[#allocation15 + $0x20] sm:$0xff] }
 0x90b   :  { %v2117_v17 = vpop.f32.mrf.mxu0 }
 0x90c   :  { %v2159_v18 = vpack.c.bf16 %v2117_v17, %v2113_v14  ;;  %v4727_v14 = vld [vmem:[#allocation4 + $0x8] sm:$0xff]   ;;  %v2920_v17 = vld [vmem:[#allocation15 + $0x18] sm:$0xff] }
 0x90d   :  { %v2121_v20 = vpop.f32.mrf.mxu0 }
 0x90f   :  { %v2123_v36 = vpop.f32.mrf.mxu0 }
 0x911   :  { %v2125_v12 = vpop.f32.mrf.mxu0 }
 0x912   :  { %v2160_v21 = vpack.c.bf16 %v2125_v12, %v2121_v20  ;;  %v2919_v20 = vld [vmem:[#allocation15 + $0x10] sm:$0xff]  ;;  %v2918_v12 = vld [vmem:[#allocation15 + $0x8] sm:$0xff] }
 0x913   :  { %v2127_v30 = vpop.f32.mrf.mxu0 }
 0x914   :  { %v2161_v27 = vpack.c.bf16 %v2127_v30, %v2123_v36  ;;  %v4726_v36 = vld [vmem:[#allocation4] sm:$0xff]  }
 0x915   :  { %v2131_v26 = vpop.f32.mrf.mxu0  ;;  %v2917_v30 = vld [vmem:[#allocation15] sm:$0xff] }
 0x917   :  { %v2133_v39 = vpop.f32.mrf.mxu0 }
 0x919   :  { %v2135_v52 = vpop.f32.mrf.mxu0 }
 0x91a   :  { %v2162_v25 = vpack.c.bf16 %v2135_v52, %v2131_v26 }
 0x91b   :  { %v2137_v38 = vpop.f32.mrf.mxu0 }
 0x91c   :  { %v2163_v23 = vpack.c.bf16 %v2137_v38, %v2133_v39  ;;  %v2154_v39 = vpack.c.bf16 %v2095_v32, %v2091_v44  ;;  %v2930_v44 = vld [vmem:[#allocation15 + $0x68] sm:$0xff]  ;;  %v2928_v32 = vld [vmem:[#allocation15 + $0x58] sm:$0xff] }
 0x91d   :  { %v2141_v51 = vpop.f32.mrf.mxu0 }
 0x91f   :  { %v2143_v35 = vpop.f32.mrf.mxu0 }
 0x921   :  { %v2145_v46 = vpop.f32.mrf.mxu0 }
 0x922   :  { %v2164_v22 = vpack.c.bf16 %v2145_v46, %v2141_v51 }
 0x923   :  { %v2147_v31 = vpop.f32.mrf.mxu0 }
 0x924   :  { %v2165_v41 = vpack.c.bf16 %v2147_v31, %v2143_v35 }
 0x926   :  { %2166 = vmatprep.subr.bf16.mxu1 %v2165_v41 }
 0x927   :  { %2167 = vmatpush1.bf16.msra.mxu1 %v2164_v22 }
 0x928   :  { %2168 = vmatprep.subr.bf16.mxu1 %v2163_v23 }
 0x92b   :  { %2169 = vmatpush1.bf16.msra.mxu1 %v2162_v25 }
 0x92c   :  { %2170 = vmatprep.subr.bf16.mxu1 %v2161_v27 }
 0x92f   :  { %2171 = vmatpush1.bf16.msra.mxu1 %v2160_v21 }
 0x930   :  { %2172 = vmatprep.subr.bf16.mxu1 %v2159_v18 }
 0x933   :  { %2173 = vmatpush1.bf16.msra.mxu1 %v2158_v40 }
 0x934   :  { %2174 = vmatprep.subr.bf16.mxu1 %v2157_v8  ;;  %v4731_v8 = vld [vmem:[#allocation4 + $0x28] sm:$0xff]  }
 0x937   :  { %2175 = vmatpush1.bf16.msra.mxu1 %v2156_v6  ;;  %v4729_v6 = vld [vmem:[#allocation4 + $0x18] sm:$0xff]  }
 0x938   :  { %2176 = vmatprep.subr.bf16.mxu1 %v2155_v4  ;;  %v4730_v4 = vld [vmem:[#allocation4 + $0x20] sm:$0xff]  }
 0x93b   :  { %2177 = vmatpush1.bf16.msra.mxu1 %v2154_v39 }
 0x93c   :  { %2178 = vmatprep.subr.bf16.mxu1 %v2153_v19  ;;  %v2931_v19 = vld [vmem:[#allocation15 + $0x70] sm:$0xff] }
 0x93f   :  { %2179 = vmatpush1.bf16.msra.mxu1 %v2152_v50  ;;  %v2932_v50 = vld [vmem:[#allocation15 + $0x78] sm:$0xff] }
 0x940   :  { %2180 = vmatprep.subr.bf16.mxu1 %v2151_v49  ;;  %v4733_v49 = vld [vmem:[#allocation4 + $0x38] sm:$0xff]  }
 0x943   :  { %2181 = vmatpush1.bf16.msra.mxu1 %v2150_v10  ;;  %v4732_v10 = vld [vmem:[#allocation4 + $0x30] sm:$0xff]  }
 0x944   :  { %4475 = vmatprep.subr.mxu1 %v2932_v50 }
 0x946   :  { %2199 = vmatmul.mubr.bf16.vlgmr.msra.gmra.mxu1 %v4726_v36 }
 0x947   :  { %2208 = vmatprep.mubr.bf16.mxu1 %v6222_v33  ;;  %4476 = vmatpush3.msra.mxu1 %v2932_v50 }
 0x948   :  { %4477 = vmatprep.subr.mxu1 %v2931_v19 }
 0x949   :  { %4478 = vmatpush3.msra.mxu1 %v2931_v19 }
 0x94a   :  { %4479 = vmatprep.subr.mxu1 %v2930_v44 }
 0x94b   :  { %4480 = vmatpush3.msra.mxu1 %v2930_v44 }
 0x94c   :  { %4481 = vmatprep.subr.mxu1 %v2929_v28 }
 0x94d   :  { %4482 = vmatpush3.msra.mxu1 %v2929_v28 }
 0x94e   :  { %2209 = vmatmul.mubr.bf16.gmra.mxu1 %v4727_v14  ;;  %4483 = vmatprep.subr.mxu1 %v2928_v32 }
 0x94f   :  { %2218 = vmatprep.mubr.bf16.mxu1 %v6222_v33  ;;  %4484 = vmatpush3.msra.mxu1 %v2928_v32 }
 0x950   :  { %4485 = vmatprep.subr.mxu1 %v2927_v16 }
 0x951   :  { %4486 = vmatpush3.msra.mxu1 %v2927_v16 }
 0x952   :  { %4487 = vmatprep.subr.mxu1 %v2926_v24 }
 0x953   :  { %4488 = vmatpush3.msra.mxu1 %v2926_v24 }
 0x956   :  { %2219 = vmatmul.mubr.bf16.gmra.mxu1 %v4728_v29 }
 0x957   :  { %2228 = vmatprep.mubr.bf16.mxu1 %v6222_v33 }
 0x95e   :  { %2229 = vmatmul.mubr.bf16.gmra.mxu1 %v4729_v6 }
 0x95f   :  { %2238 = vmatprep.mubr.bf16.mxu1 %v6222_v33 }
 0x966   :  { %2239 = vmatmul.mubr.bf16.gmra.mxu1 %v4730_v4 }
 0x967   :  { %2248 = vmatprep.mubr.bf16.mxu1 %v6222_v33 }
 0x96e   :  { %2249 = vmatmul.mubr.bf16.gmra.mxu1 %v4731_v8 }
 0x96f   :  { %2258 = vmatprep.mubr.bf16.mxu1 %v6222_v33 }
 0x976   :  { %2259 = vmatmul.mubr.bf16.gmra.mxu1 %v4732_v10 }
 0x977   :  { %2268 = vmatprep.mubr.bf16.mxu1 %v6222_v33  ;;  %v2925_v33 = vld [vmem:[#allocation15 + $0x40] sm:$0xff] }
 0x978   :  { %4489 = vmatprep.subr.mxu1 %v2925_v33 }
 0x979   :  { %4490 = vmatpush3.msra.mxu1 %v2925_v33 }
 0x97a   :  { %4491 = vmatprep.subr.mxu1 %v2924_v34 }
 0x97b   :  { %4492 = vmatpush3.msra.mxu1 %v2924_v34  ;;  %v2712_v34 = vld [vmem:[%s6151_s5 + $0x8] sm:$0xff] }
 0x97c   :  { %4493 = vmatprep.subr.mxu1 %v2923_v48 }
 0x97d   :  { %4494 = vmatpush3.msra.mxu1 %v2923_v48 }
 0x97e   :  { %2269 = vmatmul.mubr.bf16.gmra.mxu1 %v4733_v49  ;;  %4495 = vmatprep.subr.mxu1 %v2922_v37 }
 0x97f   :  { %4496 = vmatpush3.msra.mxu1 %v2922_v37 }
 0x980   :  { %4497 = vmatprep.subr.mxu1 %v2921_v47 }
 0x981   :  { %4498 = vmatpush3.msra.mxu1 %v2921_v47  ;;  %v2713_v47 = vld [vmem:[%s6151_s5 + $0x10] sm:$0xff] }
 0x982   :  { %4499 = vmatprep.subr.mxu1 %v2920_v17 }
 0x983   :  { %4500 = vmatpush3.msra.mxu1 %v2920_v17 }
 0x984   :  { %4501 = vmatprep.subr.mxu1 %v2919_v20 }
 0x985   :  { %4502 = vmatpush3.msra.mxu1 %v2919_v20 }
 0x986   :  { %4503 = vmatprep.subr.mxu1 %v2918_v12 }
 0x987   :  { %4504 = vmatpush3.msra.mxu1 %v2918_v12 }
 0x988   :  { %4505 = vmatprep.subr.mxu1 %v2917_v30 }
 0x989   :  { %4506 = vmatpush3.msra.mxu1 %v2917_v30 }
 0xa06   :  { %v5655_v26 = vpop.f32.mrf.mxu1 }
 0xa08   :  { %v5657_v52 = vpop.f32.mrf.mxu1 }
 0xa09   :  { %6223 = vst [vmem:[#allocation44_spill] sm:$0xff] %v5657_v52  ;;  %v2727_v29 = vmul.f32 1.442695, %v5657_v52 }
 0xa0a   :  { %v5659_v38 = vpop.f32.mrf.mxu1 }
 0xa0c   :  { %v5661_v51 = vpop.f32.mrf.mxu1 }
 0xa0d   :  { %6224 = vst [vmem:[#allocation45_spill] sm:$0xff] %v5661_v51  ;;  %v2729_v21 = vmul.f32 1.442695, %v5661_v51 }
 0xa0e   :  { %v5663_v35 = vpop.f32.mrf.mxu1 }
 0xa0f   :  { %4692 = vpow2.f32 %v2729_v21  ;;  %v2714_v21 = vld [vmem:[%s6151_s5 + $0x18] sm:$0xff] }
 0xa10   :  { %v5665_v46 = vpop.f32.mrf.mxu1 }
 0xa11   :  { %6225 = vst [vmem:[#allocation46_spill] sm:$0xff] %v5665_v46  ;;  %v2731_v40 = vmul.f32 1.442695, %v5665_v46 }
 0xa12   :  { %v5667_v31 = vpop.f32.mrf.mxu1 }
 0xa13   :  { %4694 = vpow2.f32 %v2731_v40 }
 0xa14   :  { %v5669_v41 = vpop.f32.mrf.mxu1 }
 0xa15   :  { %6226 = vst [vmem:[#allocation47_spill] sm:$0xff] %v5669_v41  ;;  %v2733_v36 = vmul.f32 1.442695, %v5669_v41 }
 0xa16   :  { %v5671_v22 = vpop.f32.mrf.mxu1 }
 0xa17   :  { %4696 = vpow2.f32 %v2733_v36 }
 0xa18   :  { %v5673_v23 = vpop.f32.mrf.mxu1  ;;  %4698 = vpow2.f32 %v2727_v29 }
 0xa19   :  { %6227 = vst [vmem:[#allocation48_spill] sm:$0xff] %v5673_v23  ;;  %v2735_v6 = vmul.f32 1.442695, %v5673_v23 }
 0xa1a   :  { %v5675_v25 = vpop.f32.mrf.mxu1 }
 0xa1b   :  { %4700 = vpow2.f32 %v2735_v6 }
 0xa1c   :  { %v5677_v27 = vpop.f32.mrf.mxu1  ;;  %v4693_v24 = vpop.eup %4692 }
 0xa1d   :  { %6228 = vst [vmem:[#allocation49_spill] sm:$0xff] %v5677_v27  ;;  %v2737_v8 = vmul.f32 1.442695, %v5677_v27  ;;  %v2760_v12 = vmul.f32 %v4693_v24, %v2712_v34 }
 0xa1e   :  { %v5680_v18 = vpop.f32.mrf.mxu1 }
 0xa1f   :  { %4702 = vpow2.f32 %v2737_v8  ;;  %v2715_v8 = vld [vmem:[%s6151_s5 + $0x20] sm:$0xff] }
 0xa20   :  { %v5683_v39 = vpop.f32.mrf.mxu1  ;;  %v4695_v37 = vpop.eup %4694 }
 0xa21   :  { %6229 = vst [vmem:[#allocation50_spill] sm:$0xff] %v5683_v39  ;;  %v2739_v50 = vmul.f32 1.442695, %v5683_v39  ;;  %v2761_v36 = vmul.f32 %v4695_v37, %v2713_v47  ;;  %v2716_v47 = vld [vmem:[%s6151_s5 + $0x28] sm:$0xff] }
 0xa22   :  { %v5686_v14 = vpop.f32.mrf.mxu1 }
 0xa23   :  { %4704 = vpow2.f32 %v2739_v50 }
 0xa24   :  { %v5690_v4 = vpop.f32.mrf.mxu1  ;;  %v4697_v30 = vpop.eup %4696 }
 0xa25   :  { %6230 = vst [vmem:[#allocation51_spill] sm:$0xff] %v5690_v4  ;;  %v2741_v44 = vmul.f32 1.442695, %v5690_v4  ;;  %v4699_v40 = vpop.eup %4698  ;;  %v2762_v24 = vmul.f32 %v4697_v30, %v2714_v21 }
 0xa26   :  { %v5693_v10 = vpop.f32.mrf.mxu1 }
 0xa27   :  { %4706 = vpow2.f32 %v2741_v44  ;;  %v2711_v44 = vld [vmem:[%s6151_s5] sm:$0xff]  ;;  %v5750_v2 = vadd.f32 %v2762_v24, %v5667_v31 }
 0xa28   :  { %v5695_v49 = vpop.f32.mrf.mxu1  ;;  %v4701_v6 = vpop.eup %4700 }
 0xa29   :  { %6231 = vst [vmem:[#allocation52_spill] sm:$0xff] %v5695_v49  ;;  %v2743_v32 = vmul.f32 1.442695, %v5695_v49  ;;  %v2794_v0 = vmul.f32 0.0, %v5750_v2 }
 0xa2a   :  { %v5698_v19 = vpop.f32.mrf.mxu1 }
 0xa2b   :  { %4708 = vpow2.f32 %v2743_v32  ;;  %v3141_v32 = vld [vmem:[#allocation16 + $0x1f8] sm:$0xff] }
 0xa2c   :  { %v5701_v28 = vpop.f32.mrf.mxu1  ;;  %4003 = vmatprep.subr.mxu1 %v3141_v32  ;;  %v4703_v37 = vpop.eup %4702 }
 0xa2d   :  { %6232 = vst [vmem:[#allocation53_spill] sm:$0xff] %v5701_v28  ;;  %v2745_v33 = vmul.f32 1.442695, %v5701_v28  ;;  %v5741_v28 = vadd.f32 %v2761_v36, %v5663_v35  ;;  %v2764_v49 = vmul.f32 %v4703_v37, %v2716_v47 }
 0xa2e   :  { %v5704_v16 = vpop.f32.mrf.mxu1 }
 0xa2f   :  { %4710 = vpow2.f32 %v2745_v33  ;;  %v5733_v33 = vadd.f32 %v2760_v12, %v5659_v38  ;;  %v2717_v12 = vld [vmem:[%s6151_s5 + $0x30] sm:$0xff]  ;;  %v2793_v37 = vmul.f32 0.0, %v5741_v28 }
 0xa30   :  { %v5710_v48 = vpop.f32.mrf.mxu1  ;;  %v4705_v21 = vpop.eup %4704 }
 0xa31   :  { %6233 = vst [vmem:[#allocation54_spill] sm:$0xff] %v5710_v48  ;;  %v2747_v17 = vmul.f32 1.442695, %v5710_v48  ;;  %v2759_v48 = vmul.f32 %v4699_v40, %v2711_v44  ;;  %v2765_v24 = vmul.f32 %v4705_v21, %v2717_v12  ;;  %v2720_v21 = vld [vmem:[%s6151_s5 + $0x48] sm:$0xff] }
 0xa32   :  { %v5716_v20 = vpop.f32.mrf.mxu1 }
 0xa33   :  { %4712 = vpow2.f32 %v2747_v17  ;;  %v2763_v17 = vmul.f32 %v4701_v6, %v2715_v8  ;;  %v2792_v6 = vmul.f32 0.0, %v5733_v33  ;;  %v2718_v8 = vld [vmem:[%s6151_s5 + $0x38] sm:$0xff]  ;;  %v5762_v44 = vadd.f32 %v2759_v48, %v5655_v26 }
 0xa34   :  { %v5721_v29 = vpop.f32.mrf.mxu1  ;;  %v4707_v40 = vpop.eup %4706  ;;  %v5783_v27 = vadd.f32 %v2765_v24, %v5680_v18 }
 0xa35   :  { %6234 = vst [vmem:[#allocation55_spill] sm:$0xff] %v5721_v29  ;;  %v2749_v50 = vmul.f32 1.442695, %v5721_v29  ;;  %v5754_v36 = vadd.f32 %v2763_v17, %v5671_v22  ;;  %v2719_v17 = vld [vmem:[%s6151_s5 + $0x40] sm:$0xff]  ;;  %v2807_v48 = vadd.f32 %v2792_v6, %v5762_v44  ;;  %v2766_v39 = vmul.f32 %v4707_v40, %v2718_v8  ;;  %v2721_v6 = vld [vmem:[%s6151_s5 + $0x50] sm:$0xff] }
 0xa36   :  { %v5730_v34 = vpop.f32.mrf.mxu1 }
 0xa37   :  { %6235 = vst [vmem:[#allocation56_spill] sm:$0xff] %v5730_v34  ;;  %4714 = vpow2.f32 %v2749_v50  ;;  %v5793_v41 = vadd.f32 %v2766_v39, %v5686_v14 }
 0xa38   :  { %v5738_v29 = vpop.f32.mrf.mxu1 }
 0xa39   :  { %6236 = vst [vmem:[#allocation57_spill] sm:$0xff] %v5738_v29  ;;  %v2751_v30 = vmul.f32 1.442695, %v5738_v29  ;;  %v4709_v29 = vpop.eup %4708  ;;  %v2798_v39 = vmul.f32 0.0, %v5793_v41 }
 0xa3a   :  { %v5747_v32 = vpop.f32.mrf.mxu1  ;;  %v2767_v60 = vmul.f32 %v4709_v29, %v2719_v17  ;;  %v2722_v29 = vld [vmem:[%s6151_s5 + $0x58] sm:$0xff] }
 0xa3b   :  { %6237 = vst [vmem:[#allocation58_spill] sm:$0xff] %v5747_v32  ;;  %4716 = vpow2.f32 %v2751_v30  ;;  %v5767_v30 = vadd.f32 %v2764_v49, %v5675_v25  ;;  %v2795_v49 = vmul.f32 0.0, %v5754_v36 }
 0xa3c   :  { %v5759_v50 = vpop.f32.mrf.mxu1  ;;  %v4711_v62 = vpop.eup %4710  ;;  %v5802_v56 = vadd.f32 %v2767_v60, %v5693_v10 }
 0xa3d   :  { %6238 = vst [vmem:[#allocation59_spill] sm:$0xff] %v5759_v50  ;;  %v2753_v47 = vmul.f32 1.442695, %v5759_v50  ;;  %v2808_v50 = vadd.f32 %v2807_v48, %v2793_v37  ;;  %v2796_v8 = vmul.f32 0.0, %v5767_v30  ;;  %v2768_v37 = vmul.f32 %v4711_v62, %v2720_v21  ;;  %v2723_v62 = vld [vmem:[%s6151_s5 + $0x60] sm:$0xff] }
 0xa3e   :  { %v5772_v4 = vpop.f32.mrf.mxu1 }
 0xa3f   :  { %4718 = vpow2.f32 %v2753_v47  ;;  %v2809_v47 = vadd.f32 %v2808_v50, %v2794_v0  ;;  %v5810_v50 = vadd.f32 %v2768_v37, %v5698_v19 }
 0xa40   :  { %v5779_v12 = vpop.f32.mrf.mxu1  ;;  %v4713_v58 = vpop.eup %4712 }
 0xa41   :  { %6239 = vst [vmem:[#allocation60_spill] sm:$0xff] %v5779_v12  ;;  %v2755_v23 = vmul.f32 1.442695, %v5779_v12  ;;  %v2810_v48 = vadd.f32 %v2809_v47, %v2795_v49  ;;  %v2797_v12 = vmul.f32 0.0, %v5783_v27  ;;  %v2769_v46 = vmul.f32 %v4713_v58, %v2721_v6 }
 0xa42   :  { %v5789_v40 = vpop.f32.mrf.mxu1  ;;  %v2799_v47 = vmul.f32 0.0, %v5802_v56 }
 0xa43   :  { %4720 = vpow2.f32 %v2755_v23  ;;  %v2811_v23 = vadd.f32 %v2810_v48, %v2796_v8  ;;  %v5814_v60 = vadd.f32 %v2769_v46, %v5704_v16  ;;  %v2800_v8 = vmul.f32 0.0, %v5810_v50 }
 0xa44   :  { %v4715_v24 = vpop.eup %4714  ;;  %v5798_v17 = vpop.f32.mrf.mxu1 }
 0xa45   :  { %6240 = vst [vmem:[#allocation61_spill] sm:$0xff] %v5798_v17  ;;  %v2757_v0 = vmul.f32 1.442695, %v5798_v17  ;;  %v2770_v21 = vmul.f32 %v4715_v24, %v2722_v29  ;;  %v2812_v6 = vadd.f32 %v2811_v23, %v2797_v12  ;;  %v2724_v17 = vld [vmem:[%s6151_s5 + $0x68] sm:$0xff]  ;;  %v2801_v29 = vmul.f32 0.0, %v5814_v60  ;;  %v2725_v12 = vld [vmem:[%s6151_s5 + $0x70] sm:$0xff] }
 0xa47   :  { %4722 = vpow2.f32 %v2757_v0  ;;  %v5821_v48 = vadd.f32 %v2770_v21, %v5716_v20  ;;  %v2813_v37 = vadd.f32 %v2812_v6, %v2798_v39 }
 0xa48   :  { %v4717_v49 = vpop.eup %4716 }
 0xa49   :  { %v2771_v58 = vmul.f32 %v4717_v49, %v2723_v62  ;;  %v2814_v54 = vadd.f32 %v2813_v37, %v2799_v47  ;;  %v2802_v62 = vmul.f32 0.0, %v5821_v48 }
 0xa4b   :  { %v5825_v0 = vadd.f32 %v2771_v58, %v5730_v34  ;;  %v2815_v21 = vadd.f32 %v2814_v54, %v2800_v8 }
 0xa4c   :  { %v4719_v24 = vpop.eup %4718 }
 0xa4d   :  { %v2772_v46 = vmul.f32 %v4719_v24, %v2724_v17  ;;  %v2803_v39 = vmul.f32 0.0, %v5825_v0  ;;  %v2816_v51 = vadd.f32 %v2815_v21, %v2801_v29  ;;  %v2726_v17 = vld [vmem:[%s6151_s5 + $0x78] sm:$0xff] }
 0xa4f   :  { %v5832_v23 = vadd.f32 %v2772_v46, %v5747_v32  ;;  %v2817_v37 = vadd.f32 %v2816_v51, %v2802_v62 }
 0xa50   :  { %v4721_v49 = vpop.eup %4720 }
 0xa51   :  { %v2773_v6 = vmul.f32 %v4721_v49, %v2725_v12  ;;  %v2804_v47 = vmul.f32 0.0, %v5832_v23  ;;  %v2818_v46 = vadd.f32 %v2817_v37, %v2803_v39 }
 0xa53   :  { %v2789_v58 = vadd.f32 %v2773_v6, %v5772_v4  ;;  %v2819_v8 = vadd.f32 %v2818_v46, %v2804_v47 }
 0xa54   :  { %v4723_v24 = vpop.eup %4722 }
 0xa55   :  { %v2805_v45 = vmul.f32 0.0, %v2789_v58  ;;  %v2774_v52 = vmul.f32 %v4723_v24, %v2726_v17 }
 0xa57   :  { %v2790_v54 = vadd.f32 %v2774_v52, %v5789_v40  ;;  %v2820_v15 = vadd.f32 %v2819_v8, %v2805_v45 }
 0xa59   :  { %v2806_v42 = vmul.f32 0.0, %v2790_v54 }
 0xa5b   :  { %v2821_v12 = vadd.f32 %v2820_v15, %v2806_v42 }
 0xa5d   :  { %v2822_v29 = vrot.slane %v2821_v12, 4 }
 0xa5f   :  { %v2823_v21 = vadd.f32 %v2822_v29, %v2821_v12 }
 0xa61   :  { %v2824_v49 = vrot.slane %v2823_v21, 2 }
 0xa63   :  { %v2825_v13 = vadd.f32 %v2824_v49, %v2823_v21 }
 0xa65   :  { %v2826_v32 = vrot.slane %v2825_v13, 1 }
 0xa67   :  { %v2827_v11 = vadd.f32 %v2826_v32, %v2825_v13 }
 0xa69   :  { %v2828_v34 = vmul.f32 0.125, %v2827_v11 }
 0xa6b   :  { %v5842_v6 = vsub.f32 %v5733_v33, %v2828_v34  ;;  %v5845_v51 = vsub.f32 %v5741_v28, %v2828_v34  ;;  %v5849_v52 = vsub.f32 %v5762_v44, %v2828_v34  ;;  %v5852_v45 = vsub.f32 %v5750_v2, %v2828_v34 }
 0xa6c   :  { %v5855_v15 = vsub.f32 %v5754_v36, %v2828_v34  ;;  %v5859_v42 = vsub.f32 %v5767_v30, %v2828_v34  ;;  %v5865_v32 = vsub.f32 %v5783_v27, %v2828_v34  ;;  %v5869_v36 = vsub.f32 %v5793_v41, %v2828_v34 }
 0xa6d   :  { %v2846_v62 = vmul.f32 0.0, %v5842_v6  ;;  %v2847_v13 = vmul.f32 0.0, %v5845_v51  ;;  %v2848_v28 = vmul.f32 0.0, %v5852_v45  ;;  %v2861_v33 = vmul.f32 %v5849_v52, %v5849_v52 }
 0xa6e   :  { %v2849_v2 = vmul.f32 0.0, %v5855_v15  ;;  %v2850_v17 = vmul.f32 0.0, %v5859_v42  ;;  %v5873_v37 = vsub.f32 %v5802_v56, %v2828_v34  ;;  %v2851_v24 = vmul.f32 0.0, %v5865_v32 }
 0xa6f   :  { %v2862_v11 = vmul.f32 %v2846_v62, %v2846_v62  ;;  %v2863_v44 = vmul.f32 %v2847_v13, %v2847_v13  ;;  %v2864_v47 = vmul.f32 %v2848_v28, %v2848_v28  ;;  %v5877_v27 = vsub.f32 %v5810_v50, %v2828_v34 }
 0xa70   :  { %v2865_v46 = vmul.f32 %v2849_v2, %v2849_v2  ;;  %v2852_v12 = vmul.f32 0.0, %v5869_v36  ;;  %v2866_v29 = vmul.f32 %v2850_v17, %v2850_v17  ;;  %v5881_v41 = vsub.f32 %v5814_v60, %v2828_v34 }
 0xa71   :  { %v2877_v39 = vadd.f32 %v2862_v11, %v2861_v33  ;;  %v2853_v49 = vmul.f32 0.0, %v5873_v37  ;;  %v2867_v62 = vmul.f32 %v2851_v24, %v2851_v24  ;;  %v5885_v56 = vsub.f32 %v5821_v48, %v2828_v34 }
 0xa72   :  { %v2854_v11 = vmul.f32 0.0, %v5877_v27  ;;  %v2868_v28 = vmul.f32 %v2852_v12, %v2852_v12  ;;  %v5889_v50 = vsub.f32 %v5825_v0, %v2828_v34  ;;  %v2855_v2 = vmul.f32 0.0, %v5881_v41 }
 0xa73   :  { %v2878_v30 = vadd.f32 %v2877_v39, %v2863_v44  ;;  %v2869_v44 = vmul.f32 %v2853_v49, %v2853_v49  ;;  %v5893_v60 = vsub.f32 %v5832_v23, %v2828_v34  ;;  %v2856_v17 = vmul.f32 0.0, %v5885_v56 }
 0xa74   :  { %v5896_v48 = vsub.f32 %v2789_v58, %v2828_v34  ;;  %v2857_v24 = vmul.f32 0.0, %v5889_v50  ;;  %v5899_v12 = vsub.f32 %v2790_v54, %v2828_v34  ;;  %v3108_v34 = vld [vmem:[#allocation16 + $0xf0] sm:$0xff] }
 0xa75   :  { %v2879_v8 = vadd.f32 %v2878_v30, %v2864_v47  ;;  %v2870_v47 = vmul.f32 %v2854_v11, %v2854_v11  ;;  %v2858_v0 = vmul.f32 0.0, %v5893_v60 }
 0xa76   :  { %v2859_v49 = vmul.f32 0.0, %v5896_v48  ;;  %v2873_v23 = vmul.f32 %v2857_v24, %v2857_v24  ;;  %v3091_v24 = vld [vmem:[#allocation16 + $0x68] sm:$0xff] }
 0xa77   :  { %v2880_v21 = vadd.f32 %v2879_v8, %v2865_v46  ;;  %v2871_v46 = vmul.f32 %v2855_v2, %v2855_v2  ;;  %v2874_v11 = vmul.f32 %v2858_v0, %v2858_v0  ;;  %v3109_v2 = vld [vmem:[#allocation16 + $0xf8] sm:$0xff]  ;;  %v3090_v0 = vld [vmem:[#allocation16 + $0x60] sm:$0xff] }
 0xa78   :  { %v2875_v58 = vmul.f32 %v2859_v49, %v2859_v49  ;;  %3923 = vmatprep.subr.mxu0 %v3109_v2  ;;  %v3086_v2 = vld [vmem:[#allocation16 + $0x40] sm:$0xff] }
 0xa79   :  { %v2881_v13 = vadd.f32 %v2880_v21, %v2866_v29  ;;  %v2872_v29 = vmul.f32 %v2856_v17, %v2856_v17  ;;  %v3107_v17 = vld [vmem:[#allocation16 + $0xe8] sm:$0xff] }
 0xa7b   :  { %v2882_v33 = vadd.f32 %v2881_v13, %v2867_v62  ;;  %v2860_v13 = vmul.f32 0.0, %v5899_v12 }
 0xa7d   :  { %v2883_v39 = vadd.f32 %v2882_v33, %v2868_v28 }
 0xa7f   :  { %v2884_v30 = vadd.f32 %v2883_v39, %v2869_v44  ;;  %v2876_v44 = vmul.f32 %v2860_v13, %v2860_v13 }
 0xa81   :  { %v2885_v8 = vadd.f32 %v2884_v30, %v2870_v47  ;;  %v3093_v47 = vld [vmem:[#allocation16 + $0x78] sm:$0xff]  ;;  %v3092_v30 = vld [vmem:[#allocation16 + $0x70] sm:$0xff] }
 0xa82   :  { %3924 = vmatpush3.msra.mxu0 %v3093_v47  ;;  %v3101_v47 = vld [vmem:[#allocation16 + $0xb8] sm:$0xff] }
 0xa83   :  { %v2886_v21 = vadd.f32 %v2885_v8, %v2871_v46  ;;  %3925 = vmatprep.subr.mxu0 %v3108_v34  ;;  %v3106_v8 = vld [vmem:[#allocation16 + $0xe0] sm:$0xff] }
 0xa84   :  { %3926 = vmatpush3.msra.mxu0 %v3092_v30  ;;  %v3100_v30 = vld [vmem:[#allocation16 + $0xb0] sm:$0xff] }
 0xa85   :  { %v2887_v62 = vadd.f32 %v2886_v21, %v2872_v29  ;;  %3927 = vmatprep.subr.mxu0 %v3107_v17  ;;  %v3105_v21 = vld [vmem:[#allocation16 + $0xd8] sm:$0xff] }
 0xa86   :  { %3928 = vmatpush3.msra.mxu0 %v3091_v24  ;;  %v3099_v24 = vld [vmem:[#allocation16 + $0xa8] sm:$0xff] }
 0xa87   :  { %v2888_v28 = vadd.f32 %v2887_v62, %v2873_v23  ;;  %3929 = vmatprep.subr.mxu0 %v3106_v8  ;;  %v3089_v23 = vld [vmem:[#allocation16 + $0x58] sm:$0xff]  ;;  %v3104_v62 = vld [vmem:[#allocation16 + $0xd0] sm:$0xff]  ;;  %v3083_v8 = vld [vmem:[#allocation16 + $0x28] sm:$0xff] }
 0xa88   :  { %3930 = vmatpush3.msra.mxu0 %v3090_v0  ;;  %v3082_v0 = vld [vmem:[#allocation16 + $0x20] sm:$0xff] }
 0xa89   :  { %v2889_v33 = vadd.f32 %v2888_v28, %v2874_v11  ;;  %3931 = vmatprep.subr.mxu0 %v3105_v21  ;;  %v3088_v11 = vld [vmem:[#allocation16 + $0x50] sm:$0xff]  ;;  %v3103_v28 = vld [vmem:[#allocation16 + $0xc8] sm:$0xff]  ;;  %v3097_v21 = vld [vmem:[#allocation16 + $0x98] sm:$0xff] }
 0xa8a   :  { %3932 = vmatpush3.msra.mxu0 %v3089_v23  ;;  %v3096_v23 = vld [vmem:[#allocation16 + $0x90] sm:$0xff] }
 0xa8b   :  { %v2890_v39 = vadd.f32 %v2889_v33, %v2875_v58  ;;  %3933 = vmatprep.subr.mxu0 %v3104_v62  ;;  %v3087_v33 = vld [vmem:[#allocation16 + $0x48] sm:$0xff]  ;;  %v3080_v62 = vld [vmem:[#allocation16 + $0x10] sm:$0xff] }
 0xa8c   :  { %3934 = vmatpush3.msra.mxu0 %v3088_v11 }
 0xa8d   :  { %v2891_v54 = vadd.f32 %v2890_v39, %v2876_v44  ;;  %v3102_v44 = vld [vmem:[#allocation16 + $0xc0] sm:$0xff]  ;;  %3935 = vmatprep.subr.mxu0 %v3103_v28 }
 0xa8e   :  { %3936 = vmatpush3.msra.mxu0 %v3087_v33 }
 0xa8f   :  { %v2892_v46 = vrot.slane %v2891_v54, 4  ;;  %3937 = vmatprep.subr.mxu0 %v3102_v44  ;;  %v3140_v44 = vld [vmem:[#allocation16 + $0x1f0] sm:$0xff] }
 0xa90   :  { %3938 = vmatpush3.msra.mxu0 %v3086_v2  ;;  %v3139_v2 = vld [vmem:[#allocation16 + $0x1e8] sm:$0xff] }
 0xa91   :  { %v2893_v29 = vadd.f32 %v2892_v46, %v2891_v54  ;;  %v3085_v54 = vld [vmem:[#allocation16 + $0x38] sm:$0xff]  ;;  %3939 = vmatprep.subr.mxu0 %v3101_v47  ;;  %v3084_v46 = vld [vmem:[#allocation16 + $0x30] sm:$0xff] }
 0xa92   :  { %3940 = vmatpush3.msra.mxu0 %v3085_v54  ;;  %v3122_v54 = vld [vmem:[#allocation16 + $0x160] sm:$0xff] }
 0xa93   :  { %v2894_v49 = vrot.slane %v2893_v29, 2  ;;  %3941 = vmatprep.subr.mxu0 %v3100_v30 }
 0xa94   :  { %3942 = vmatpush3.msra.mxu0 %v3084_v46  ;;  %v3136_v46 = vld [vmem:[#allocation16 + $0x1d0] sm:$0xff] }
 0xa95   :  { %v2895_v13 = vadd.f32 %v2894_v49, %v2893_v29  ;;  %v3098_v29 = vld [vmem:[#allocation16 + $0xa0] sm:$0xff]  ;;  %3943 = vmatprep.subr.mxu0 %v3099_v24  ;;  %v3081_v49 = vld [vmem:[#allocation16 + $0x18] sm:$0xff]  ;;  %v3135_v24 = vld [vmem:[#allocation16 + $0x1c8] sm:$0xff] }
 0xa96   :  { %3944 = vmatpush3.msra.mxu0 %v3083_v8 }
 0xa97   :  { %v2896_v58 = vrot.slane %v2895_v13, 1  ;;  %3945 = vmatprep.subr.mxu0 %v3098_v29  ;;  %v3119_v29 = vld [vmem:[#allocation16 + $0x148] sm:$0xff] }
 0xa98   :  { %3946 = vmatpush3.msra.mxu0 %v3082_v0  ;;  %v3134_v0 = vld [vmem:[#allocation16 + $0x1c0] sm:$0xff] }
 0xa99   :  { %v2897_v39 = vadd.f32 %v2896_v58, %v2895_v13  ;;  %3947 = vmatprep.subr.mxu0 %v3097_v21  ;;  %v3125_v58 = vld [vmem:[#allocation16 + $0x178] sm:$0xff] }
 0xa9a   :  { %3948 = vmatpush3.msra.mxu0 %v3081_v49  ;;  %v3133_v21 = vld [vmem:[#allocation16 + $0x1b8] sm:$0xff] }
 0xa9b   :  { %v2898_v34 = vmul.f32 0.14285715, %v2897_v39  ;;  %3949 = vmatprep.subr.mxu0 %v3096_v23  ;;  %v3124_v39 = vld [vmem:[#allocation16 + $0x170] sm:$0xff]  ;;  %v3117_v23 = vld [vmem:[#allocation16 + $0x138] sm:$0xff] }
 0xa9c   :  { %3950 = vmatpush3.msra.mxu0 %v3080_v62  ;;  %v3132_v62 = vld [vmem:[#allocation16 + $0x1b0] sm:$0xff] }
 0xa9d   :  { %v2899_v17 = vmax.f32 %v2898_v34, 1e-12  ;;  %v3123_v34 = vld [vmem:[#allocation16 + $0x168] sm:$0xff] }
 0xa9f   :  { %4724 = vrsqrt.f32 %v2899_v17  ;;  %v3121_v17 = vld [vmem:[#allocation16 + $0x158] sm:$0xff] }
 0xaac   :  { %v5904_v13 = vpop.eup %4724 }
 0xaad   :  { %v2901_v11 = vmul.f32 %v5904_v13, %v5849_v52  ;;  %v2902_v28 = vmul.f32 %v5904_v13, %v5842_v6  ;;  %v2903_v33 = vmul.f32 %v5904_v13, %v5845_v51  ;;  %v2904_v47 = vmul.f32 %v5904_v13, %v5852_v45  ;;  %v3138_v52 = vld [vmem:[#allocation16 + $0x1e0] sm:$0xff]  ;;  %v3137_v51 = vld [vmem:[#allocation16 + $0x1d8] sm:$0xff] }
 0xaae   :  { %v2905_v6 = vmul.f32 %v5904_v13, %v5855_v15  ;;  %v2906_v30 = vmul.f32 %v5904_v13, %v5859_v42  ;;  %v2907_v45 = vmul.f32 %v5904_v13, %v5865_v32  ;;  %v3120_v15 = vld [vmem:[#allocation16 + $0x150] sm:$0xff]  ;;  %v2908_v8 = vmul.f32 %v5904_v13, %v5869_v36  ;;  %v3118_v32 = vld [vmem:[#allocation16 + $0x140] sm:$0xff] }
 0xaaf   :  { %4507 = vmatprep.mubr.f32.mxu1 %v2901_v11  ;;  %v2909_v42 = vmul.f32 %v5904_v13, %v5873_v37  ;;  %v2910_v49 = vmul.f32 %v5904_v13, %v5877_v27  ;;  %v2911_v36 = vmul.f32 %v5904_v13, %v5881_v41  ;;  %v3116_v37 = vld [vmem:[#allocation16 + $0x130] sm:$0xff]  ;;  %v3131_v11 = vld [vmem:[#allocation16 + $0x1a8] sm:$0xff]  ;;  %v2913_v27 = vmul.f32 %v5904_v13, %v5889_v50  ;;  %v3114_v41 = vld [vmem:[#allocation16 + $0x120] sm:$0xff] }
 0xab0   :  { %4508 = vmatmul.mubr.f32.vlgmr.msra.gmra.mxu1 %v2902_v28  ;;  %v2912_v28 = vmul.f32 %v5904_v13, %v5885_v56  ;;  %v2915_v56 = vmul.f32 %v5904_v13, %v5896_v48  ;;  %v3112_v50 = vld [vmem:[#allocation16 + $0x110] sm:$0xff]  ;;  %v3153_v48 = vld [vmem:[#allocation16 + $0x258] sm:$0xff] }
 0xab1   :  { %4510 = vmatprep.mubr.f32.mxu1 %v2903_v33  ;;  %4004 = vmatpush3.msra.mxu1 %v3125_v58  ;;  %v3115_v58 = vld [vmem:[#allocation16 + $0x128] sm:$0xff]  ;;  %v3130_v33 = vld [vmem:[#allocation16 + $0x1a0] sm:$0xff] }
 0xab2   :  { %4005 = vmatprep.subr.mxu1 %v3140_v44  ;;  %v3129_v44 = vld [vmem:[#allocation16 + $0x198] sm:$0xff] }
 0xab3   :  { %4006 = vmatpush3.msra.mxu1 %v3124_v39  ;;  %v2914_v39 = vmul.f32 %v5904_v13, %v5893_v60  ;;  %v3110_v60 = vld [vmem:[#allocation16 + $0x100] sm:$0xff] }
 0xab4   :  { %4511 = vmatmul.mubr.f32.gmra.mxu1 %v2904_v47  ;;  %4007 = vmatprep.subr.mxu1 %v3139_v2  ;;  %v3113_v2 = vld [vmem:[#allocation16 + $0x118] sm:$0xff]  ;;  %v3128_v47 = vld [vmem:[#allocation16 + $0x190] sm:$0xff] }
 0xab5   :  { %4513 = vmatprep.mubr.f32.mxu1 %v2905_v6  ;;  %4008 = vmatpush3.msra.mxu1 %v3123_v34  ;;  %v3127_v34 = vld [vmem:[#allocation16 + $0x188] sm:$0xff]  ;;  %v2916_v6 = vmul.f32 %v5904_v13, %v5899_v12  ;;  %v3168_v13 = vld [vmem:[#allocation16 + $0x2d0] sm:$0xff] }
 0xab6   :  { %4009 = vmatprep.subr.mxu1 %v3138_v52  ;;  %v3111_v52 = vld [vmem:[#allocation16 + $0x108] sm:$0xff] }
 0xab7   :  { %4010 = vmatpush3.msra.mxu1 %v3122_v54  ;;  %v3126_v54 = vld [vmem:[#allocation16 + $0x180] sm:$0xff] }
 0xab8   :  { %4514 = vmatmul.mubr.f32.gmra.mxu1 %v2906_v30  ;;  %4011 = vmatprep.subr.mxu1 %v3137_v51  ;;  %v3152_v30 = vld [vmem:[#allocation16 + $0x250] sm:$0xff] }
 0xab9   :  { %4516 = vmatprep.mubr.f32.mxu1 %v2907_v45  ;;  %4012 = vmatpush3.msra.mxu1 %v3121_v17  ;;  %v3167_v17 = vld [vmem:[#allocation16 + $0x2c8] sm:$0xff] }
 0xaba   :  { %4013 = vmatprep.subr.mxu1 %v3136_v46  ;;  %v3151_v45 = vld [vmem:[#allocation16 + $0x248] sm:$0xff] }
 0xabb   :  { %4014 = vmatpush3.msra.mxu1 %v3120_v15  ;;  %v3166_v15 = vld [vmem:[#allocation16 + $0x2c0] sm:$0xff] }
 0xabc   :  { %4517 = vmatmul.mubr.f32.gmra.mxu1 %v2908_v8  ;;  %4015 = vmatprep.subr.mxu1 %v3135_v24  ;;  %v3150_v8 = vld [vmem:[#allocation16 + $0x240] sm:$0xff] }
 0xabd   :  { %4519 = vmatprep.mubr.f32.mxu1 %v2909_v42  ;;  %4016 = vmatpush3.msra.mxu1 %v3119_v29  ;;  %v3165_v29 = vld [vmem:[#allocation16 + $0x2b8] sm:$0xff] }
 0xabe   :  { %4017 = vmatprep.subr.mxu1 %v3134_v0  ;;  %v3149_v42 = vld [vmem:[#allocation16 + $0x238] sm:$0xff] }
 0xabf   :  { %4018 = vmatpush3.msra.mxu1 %v3118_v32  ;;  %v3164_v32 = vld [vmem:[#allocation16 + $0x2b0] sm:$0xff] }
 0xac0   :  { %4520 = vmatmul.mubr.f32.gmra.mxu1 %v2910_v49  ;;  %4019 = vmatprep.subr.mxu1 %v3133_v21  ;;  %v3148_v49 = vld [vmem:[#allocation16 + $0x230] sm:$0xff] }
 0xac1   :  { %4522 = vmatprep.mubr.f32.mxu1 %v2911_v36  ;;  %4020 = vmatpush3.msra.mxu1 %v3117_v23  ;;  %v3163_v23 = vld [vmem:[#allocation16 + $0x2a8] sm:$0xff] }
 0xac2   :  { %4021 = vmatprep.subr.mxu1 %v3132_v62  ;;  %v3147_v36 = vld [vmem:[#allocation16 + $0x228] sm:$0xff] }
 0xac3   :  { %4022 = vmatpush3.msra.mxu1 %v3116_v37  ;;  %v3162_v37 = vld [vmem:[#allocation16 + $0x2a0] sm:$0xff] }
 0xac4   :  { %4523 = vmatmul.mubr.f32.gmra.mxu1 %v2912_v28  ;;  %4023 = vmatprep.subr.mxu1 %v3131_v11  ;;  %v3146_v28 = vld [vmem:[#allocation16 + $0x220] sm:$0xff] }
 0xac5   :  { %4525 = vmatprep.mubr.f32.mxu1 %v2913_v27  ;;  %4024 = vmatpush3.msra.mxu1 %v3115_v58  ;;  %v3161_v58 = vld [vmem:[#allocation16 + $0x298] sm:$0xff] }
 0xac6   :  { %4025 = vmatprep.subr.mxu1 %v3130_v33  ;;  %v3145_v27 = vld [vmem:[#allocation16 + $0x218] sm:$0xff] }
 0xac7   :  { %4026 = vmatpush3.msra.mxu1 %v3114_v41  ;;  %v3160_v41 = vld [vmem:[#allocation16 + $0x290] sm:$0xff] }
 0xac8   :  { %4526 = vmatmul.mubr.f32.gmra.mxu1 %v2914_v39  ;;  %4027 = vmatprep.subr.mxu1 %v3129_v44  ;;  %v3144_v39 = vld [vmem:[#allocation16 + $0x210] sm:$0xff] }
 0xac9   :  { %4528 = vmatprep.mubr.f32.mxu1 %v2915_v56  ;;  %4028 = vmatpush3.msra.mxu1 %v3113_v2  ;;  %v3159_v2 = vld [vmem:[#allocation16 + $0x288] sm:$0xff] }
 0xaca   :  { %4029 = vmatprep.subr.mxu1 %v3128_v47  ;;  %v3143_v56 = vld [vmem:[#allocation16 + $0x208] sm:$0xff] }
 0xacb   :  { %4030 = vmatpush3.msra.mxu1 %v3112_v50  ;;  %v3158_v50 = vld [vmem:[#allocation16 + $0x280] sm:$0xff] }
 0xacc   :  { %4529 = vmatmul.mubr.f32.gmra.mxu1 %v2916_v6  ;;  %4031 = vmatprep.subr.mxu1 %v3127_v34  ;;  %v3142_v6 = vld [vmem:[#allocation16 + $0x200] sm:$0xff] }
 0xacd   :  { %4032 = vmatpush3.msra.mxu1 %v3111_v52  ;;  %3383 = vmatprep.mubr.f32.mxu1 %v5655_v26  ;;  %v6246_v26 = vld [vmem:[#allocation42_spill] sm:$0xff] }
 0xace   :  { %4033 = vmatprep.subr.mxu1 %v3126_v54 }
 0xacf   :  { %4034 = vmatpush3.msra.mxu1 %v3110_v60 }
 0xad0   :  { %3384 = vmatmul.mubr.f32.vlgmr.msra.gmra.mxu1 %v5253_v43  ;;  %v3095_v43 = vld [vmem:[#allocation16 + $0x88] sm:$0xff] }
 0xad1   :  { %3388 = vmatprep.mubr.f32.mxu1 %v5659_v38  ;;  %3951 = vmatprep.subr.mxu0 %v3095_v43 }
 0xad4   :  { %3389 = vmatmul.mubr.f32.gmra.mxu1 %v5257_v53  ;;  %v3079_v53 = vld [vmem:[#allocation16 + $0x8] sm:$0xff] }
 0xad5   :  { %3393 = vmatprep.mubr.f32.mxu1 %v5663_v35  ;;  %3952 = vmatpush3.msra.mxu0 %v3079_v53 }
 0xad8   :  { %3394 = vmatmul.mubr.f32.gmra.mxu1 %v5261_v55  ;;  %v3094_v55 = vld [vmem:[#allocation16 + $0x80] sm:$0xff] }
 0xad9   :  { %3398 = vmatprep.mubr.f32.mxu1 %v5667_v31  ;;  %3953 = vmatprep.subr.mxu0 %v3094_v55 }
 0xadc   :  { %3399 = vmatmul.mubr.f32.gmra.mxu1 %v5265_v57  ;;  %v3078_v57 = vld [vmem:[#allocation16] sm:$0xff] }
 0xadd   :  { %3403 = vmatprep.mubr.f32.mxu1 %v5671_v22  ;;  %3954 = vmatpush3.msra.mxu0 %v3078_v57  ;;  %v3172_v22 = vld [vmem:[#allocation16 + $0x2f0] sm:$0xff] }
 0xae0   :  { %3404 = vmatmul.mubr.f32.gmra.mxu1 %v5269_v59  ;;  %v3173_v59 = vld [vmem:[#allocation16 + $0x2f8] sm:$0xff] }
 0xae1   :  { %3408 = vmatprep.mubr.f32.mxu1 %v5675_v25  ;;  %4083 = vmatprep.subr.mxu0 %v3173_v59 }
 0xae4   :  { %3409 = vmatmul.mubr.f32.gmra.mxu1 %v5273_v61  ;;  %v6241_v61 = vld [vmem:[#allocation56_spill] sm:$0xff] }
 0xae5   :  { %3413 = vmatprep.mubr.f32.mxu1 %v5680_v18  ;;  %v3156_v18 = vld [vmem:[#allocation16 + $0x270] sm:$0xff] }
 0xae8   :  { %3414 = vmatmul.mubr.f32.gmra.mxu1 %v5277_v63  ;;  %v6242_v63 = vld [vmem:[#allocation36_spill] sm:$0xff] }
 0xae9   :  { %3418 = vmatprep.mubr.f32.mxu1 %v5686_v14  ;;  %v3171_v14 = vld [vmem:[#allocation16 + $0x2e8] sm:$0xff] }
 0xaec   :  { %3419 = vmatmul.mubr.f32.gmra.mxu1 %v5281_v1  ;;  %v6243_v1 = vld [vmem:[#allocation58_spill] sm:$0xff] }
 0xaed   :  { %3423 = vmatprep.mubr.f32.mxu1 %v5693_v10 }
 0xaf0   :  { %3424 = vmatmul.mubr.f32.gmra.mxu1 %v5285_v3  ;;  %v6244_v3 = vld [vmem:[#allocation38_spill] sm:$0xff] }
 0xaf1   :  { %3428 = vmatprep.mubr.f32.mxu1 %v5698_v19  ;;  %v3170_v19 = vld [vmem:[#allocation16 + $0x2e0] sm:$0xff] }
 0xaf4   :  { %3429 = vmatmul.mubr.f32.gmra.mxu1 %v5289_v5  ;;  %v6245_v5 = vld [vmem:[#allocation40_spill] sm:$0xff] }
 0xaf5   :  { %3433 = vmatprep.mubr.f32.mxu1 %v5704_v16 }
 0xaf8   :  { %3434 = vmatmul.mubr.f32.gmra.mxu1 %v5293_v7  ;;  %v4453_v7 = vpop.f32.mrf.mxu0 }
 0xaf9   :  { %3438 = vmatprep.mubr.f32.mxu1 %v5716_v20  ;;  %v3154_v20 = vld [vmem:[#allocation16 + $0x260] sm:$0xff] }
 0xafa   :  { %v2632_v31 = vpop.f32.mrf.mxu0 }
 0xafc   :  { %3439 = vmatmul.mubr.f32.gmra.mxu1 %v5297_v9  ;;  %v3157_v9 = vld [vmem:[#allocation16 + $0x278] sm:$0xff]  ;;  %v4456_v10 = vpop.f32.mrf.mxu0 }
 0xafd   :  { %3443 = vmatprep.mubr.f32.mxu1 %v6241_v61 }
 0xafe   :  { %v2642_v12 = vpop.f32.mrf.mxu0 }
 0xb00   :  { %3444 = vmatmul.mubr.f32.gmra.mxu1 %v6242_v63  ;;  %v4459_v46 = vpop.f32.mrf.mxu0 }
 0xb01   :  { %3448 = vmatprep.mubr.f32.mxu1 %v6243_v1 }
 0xb02   :  { %v2652_v0 = vpop.f32.mrf.mxu0 }
 0xb04   :  { %3449 = vmatmul.mubr.f32.gmra.mxu1 %v6244_v3  ;;  %v4462_v62 = vpop.f32.mrf.mxu0 }
 0xb05   :  { %3453 = vmatprep.mubr.f32.mxu1 %v5772_v4  ;;  %v3155_v4 = vld [vmem:[#allocation16 + $0x268] sm:$0xff] }
 0xb06   :  { %v2662_v33 = vpop.f32.mrf.mxu0 }
 0xb08   :  { %3454 = vmatmul.mubr.f32.gmra.mxu1 %v6245_v5  ;;  %v4465_v47 = vpop.f32.mrf.mxu0 }
 0xb09   :  { %3458 = vmatprep.mubr.f32.mxu1 %v5789_v40  ;;  %v3169_v40 = vld [vmem:[#allocation16 + $0x2d8] sm:$0xff] }
 0xb0a   :  { %v2672_v52 = vpop.f32.mrf.mxu0 }
 0xb0c   :  { %3459 = vmatmul.mubr.f32.gmra.mxu1 %v6246_v26  ;;  %v4468_v60 = vpop.f32.mrf.mxu0  ;;  %v6247_v26 = vld [vmem:[#allocation44_spill] sm:$0xff] }
 0xb0e   :  { %v2682_v53 = vpop.f32.mrf.mxu0 }
 0xb10   :  { %v4471_v57 = vpop.f32.mrf.mxu0 }
 0xb12   :  { %v2692_v61 = vpop.f32.mrf.mxu0 }
 0xb14   :  { %v4474_v1 = vpop.f32.mrf.mxu0 }
 0xb16   :  { %v2702_v5 = vpop.f32.mrf.mxu0 }
 0xb70   :  { %v4509_v38 = vpop.f32.mrf.mxu1 }
 0xb72   :  { %v2999_v35 = vpop.f32.mrf.mxu1 }
 0xb73   :  { %3238 = vmatprep.mubr.f32.mxu0 %v2999_v35  ;;  %v6250_v35 = vld [vmem:[#allocation25_spill] sm:$0xff] }
 0xb74   :  { %v4512_v25 = vpop.f32.mrf.mxu1  ;;  %3239 = vmatmul.mubr.f32.vlgmr.msra.gmra.mxu0 %v2632_v31  ;;  %v6252_v31 = vld [vmem:[#allocation26_spill] sm:$0xff] }
 0xb75   :  { %3243 = vmatprep.mubr.f32.mxu0 %v4509_v38  ;;  %4084 = vmatpush3.msra.mxu0 %v3157_v9  ;;  %v6249_v38 = vld [vmem:[#allocation45_spill] sm:$0xff]  ;;  %v6251_v9 = vld [vmem:[#allocation46_spill] sm:$0xff] }
 0xb76   :  { %4085 = vmatprep.subr.mxu0 %v3172_v22  ;;  %v3009_v16 = vpop.f32.mrf.mxu1  ;;  %v6253_v22 = vld [vmem:[#allocation47_spill] sm:$0xff] }
 0xb77   :  { %4086 = vmatpush3.msra.mxu0 %v3156_v18  ;;  %v6255_v18 = vld [vmem:[#allocation48_spill] sm:$0xff] }
 0xb78   :  { %3244 = vmatmul.mubr.f32.gmra.mxu0 %v4453_v7  ;;  %4087 = vmatprep.subr.mxu0 %v3171_v14  ;;  %v4515_v51 = vpop.f32.mrf.mxu1  ;;  %v6248_v7 = vld [vmem:[#allocation24_spill] sm:$0xff] }
 0xb79   :  { %3248 = vmatprep.mubr.f32.mxu0 %v3009_v16  ;;  %4088 = vmatpush3.msra.mxu0 %v3155_v4  ;;  %v6256_v14 = vld [vmem:[#allocation28_spill] sm:$0xff]  ;;  %v6257_v4 = vld [vmem:[#allocation49_spill] sm:$0xff]  ;;  %v6260_v16 = vld [vmem:[#allocation30_spill] sm:$0xff] }
 0xb7a   :  { %4089 = vmatprep.subr.mxu0 %v3170_v19  ;;  %v3019_v24 = vpop.f32.mrf.mxu1  ;;  %v6259_v19 = vld [vmem:[#allocation50_spill] sm:$0xff] }
 0xb7b   :  { %4090 = vmatpush3.msra.mxu0 %v3154_v20  ;;  %v6261_v20 = vld [vmem:[#allocation51_spill] sm:$0xff] }
 0xb7c   :  { %3249 = vmatmul.mubr.f32.gmra.mxu0 %v2642_v12  ;;  %4091 = vmatprep.subr.mxu0 %v3169_v40  ;;  %v4518_v21 = vpop.f32.mrf.mxu1  ;;  %v6262_v40 = vld [vmem:[#allocation31_spill] sm:$0xff]  ;;  %v6264_v12 = vld [vmem:[#allocation32_spill] sm:$0xff] }
 0xb7d   :  { %3253 = vmatprep.mubr.f32.mxu0 %v4512_v25  ;;  %4092 = vmatpush3.msra.mxu0 %v3153_v48  ;;  %v6254_v25 = vld [vmem:[#allocation27_spill] sm:$0xff]  ;;  %v6263_v48 = vld [vmem:[#allocation52_spill] sm:$0xff] }
 0xb7e   :  { %4093 = vmatprep.subr.mxu0 %v3168_v13  ;;  %v3029_v11 = vpop.f32.mrf.mxu1  ;;  %v6265_v13 = vld [vmem:[#allocation53_spill] sm:$0xff] }
 0xb7f   :  { %4094 = vmatpush3.msra.mxu0 %v3152_v30  ;;  %v6267_v30 = vld [vmem:[#allocation54_spill] sm:$0xff] }
 0xb80   :  { %3254 = vmatmul.mubr.f32.gmra.mxu0 %v4456_v10  ;;  %4095 = vmatprep.subr.mxu0 %v3167_v17  ;;  %v4521_v44 = vpop.f32.mrf.mxu1  ;;  %v6258_v10 = vld [vmem:[#allocation29_spill] sm:$0xff]  ;;  %v6268_v17 = vld [vmem:[#allocation34_spill] sm:$0xff] }
 0xb81   :  { %3258 = vmatprep.mubr.f32.mxu0 %v3019_v24  ;;  %4096 = vmatpush3.msra.mxu0 %v3151_v45  ;;  %v6269_v45 = vld [vmem:[#allocation55_spill] sm:$0xff]  ;;  %v6272_v24 = vld [vmem:[#allocation37_spill] sm:$0xff] }
 0xb82   :  { %4097 = vmatprep.subr.mxu0 %v3166_v15  ;;  %v3039_v34 = vpop.f32.mrf.mxu1  ;;  %v6271_v15 = vld [vmem:[#allocation57_spill] sm:$0xff] }
 0xb83   :  { %4098 = vmatpush3.msra.mxu0 %v3150_v8  ;;  %v6273_v8 = vld [vmem:[#allocation59_spill] sm:$0xff] }
 0xb84   :  { %3259 = vmatmul.mubr.f32.gmra.mxu0 %v2652_v0  ;;  %4099 = vmatprep.subr.mxu0 %v3165_v29  ;;  %v4524_v54 = vpop.f32.mrf.mxu1  ;;  %v6274_v29 = vld [vmem:[#allocation39_spill] sm:$0xff]  ;;  %v6276_v0 = vld [vmem:[#allocation41_spill] sm:$0xff] }
 0xb85   :  { %3263 = vmatprep.mubr.f32.mxu0 %v4515_v51  ;;  %4100 = vmatpush3.msra.mxu0 %v3149_v42  ;;  %v6266_v51 = vld [vmem:[#allocation33_spill] sm:$0xff]  ;;  %v6275_v42 = vld [vmem:[#allocation60_spill] sm:$0xff] }
 0xb86   :  { %4101 = vmatprep.subr.mxu0 %v3164_v32  ;;  %v3049_v43 = vpop.f32.mrf.mxu1  ;;  %v6277_v32 = vld [vmem:[#allocation61_spill] sm:$0xff] }
 0xb87   :  { %4102 = vmatpush3.msra.mxu0 %v3148_v49 }
 0xb88   :  { %3264 = vmatmul.mubr.f32.gmra.mxu0 %v4459_v46  ;;  %4103 = vmatprep.subr.mxu0 %v3163_v23  ;;  %v4527_v55 = vpop.f32.mrf.mxu1  ;;  %v6270_v46 = vld [vmem:[#allocation35_spill] sm:$0xff] }
 0xb89   :  { %3268 = vmatprep.mubr.f32.mxu0 %v3029_v11  ;;  %4104 = vmatpush3.msra.mxu0 %v3147_v36 }
 0xb8a   :  { %4105 = vmatprep.subr.mxu0 %v3162_v37  ;;  %v3059_v59 = vpop.f32.mrf.mxu1 }
 0xb8b   :  { %4106 = vmatpush3.msra.mxu0 %v3146_v28 }
 0xb8c   :  { %3269 = vmatmul.mubr.f32.gmra.mxu0 %v2662_v33  ;;  %4107 = vmatprep.subr.mxu0 %v3161_v58  ;;  %v4530_v63 = vpop.f32.mrf.mxu1 }
 0xb8d   :  { %3273 = vmatprep.mubr.f32.mxu0 %v4518_v21  ;;  %4108 = vmatpush3.msra.mxu0 %v3145_v27  ;;  %v6278_v21 = vld [vmem:[#allocation43_spill] sm:$0xff] }
 0xb8e   :  { %4109 = vmatprep.subr.mxu0 %v3160_v41  ;;  %v3069_v3 = vpop.f32.mrf.mxu1 }
 0xb8f   :  { %4110 = vmatpush3.msra.mxu0 %v3144_v39 }
 0xb90   :  { %3274 = vmatmul.mubr.f32.gmra.mxu0 %v4462_v62  ;;  %4111 = vmatprep.subr.mxu0 %v3159_v2  ;;  %v4035_v49 = vpop.f32.mrf.mxu1 }
 0xb91   :  { %3278 = vmatprep.mubr.f32.mxu0 %v3039_v34  ;;  %4112 = vmatpush3.msra.mxu0 %v3143_v56 }
 0xb92   :  { %4113 = vmatprep.subr.mxu0 %v3158_v50  ;;  %v4036_v36 = vpop.f32.mrf.mxu1 }
 0xb93   :  { %4114 = vmatpush3.msra.mxu0 %v3142_v6 }
 0xb94   :  { %3279 = vmatmul.mubr.f32.gmra.mxu0 %v2672_v52  ;;  %v4038_v11 = vpop.f32.mrf.mxu1 }
 0xb95   :  { %3283 = vmatprep.mubr.f32.mxu0 %v4521_v44 }
 0xb96   :  { %v4039_v27 = vpop.f32.mrf.mxu1 }
 0xb98   :  { %3284 = vmatmul.mubr.f32.gmra.mxu0 %v4465_v47  ;;  %v4041_v44 = vpop.f32.mrf.mxu1 }
 0xb99   :  { %3288 = vmatprep.mubr.f32.mxu0 %v3049_v43 }
 0xb9a   :  { %v4042_v56 = vpop.f32.mrf.mxu1 }
 0xb9c   :  { %3289 = vmatmul.mubr.f32.gmra.mxu0 %v2682_v53  ;;  %v4044_v34 = vpop.f32.mrf.mxu1 }
 0xb9d   :  { %3293 = vmatprep.mubr.f32.mxu0 %v4524_v54 }
 0xb9e   :  { %v4045_v54 = vpop.f32.mrf.mxu1 }
 0xba0   :  { %3294 = vmatmul.mubr.f32.gmra.mxu0 %v4468_v60  ;;  %v4047_v53 = vpop.f32.mrf.mxu1 }
 0xba1   :  { %3298 = vmatprep.mubr.f32.mxu0 %v3059_v59 }
 0xba2   :  { %v4048_v59 = vpop.f32.mrf.mxu1 }
 0xba4   :  { %3299 = vmatmul.mubr.f32.gmra.mxu0 %v2692_v61 }
 0xba5   :  { %3303 = vmatprep.mubr.f32.mxu0 %v4527_v55 }
 0xba8   :  { %3304 = vmatmul.mubr.f32.gmra.mxu0 %v4471_v57 }
 0xba9   :  { %3308 = vmatprep.mubr.f32.mxu0 %v3069_v3 }
 0xbac   :  { %3309 = vmatmul.mubr.f32.gmra.mxu0 %v2702_v5 }
 0xbad   :  { %3313 = vmatprep.mubr.f32.mxu0 %v4530_v63 }
 0xbb0   :  { %3314 = vmatmul.mubr.f32.gmra.mxu0 %v4474_v1  ;;  %v6024_v1 = vpop.f32.mrf.mxu1 }
 0xbb1   :  { %3528 = vmatprep.mubr.f32.mxu0 %v6247_v26 }
 0xbb2   :  { %v4051_v26 = vpop.f32.mrf.mxu1 }
 0xbb4   :  { %3529 = vmatmul.mubr.f32.vlgmr.msra.gmra.mxu0 %v6248_v7 }
 0xbb5   :  { %3533 = vmatprep.mubr.f32.mxu0 %v6249_v38 }
 0xbb8   :  { %3534 = vmatmul.mubr.f32.gmra.mxu0 %v6250_v35  ;;  %v6034_v35 = vpop.f32.mrf.mxu1 }
 0xbb9   :  { %3538 = vmatprep.mubr.f32.mxu0 %v6251_v9 }
 0xbbc   :  { %3539 = vmatmul.mubr.f32.gmra.mxu0 %v6252_v31 }
 0xbbd   :  { %3543 = vmatprep.mubr.f32.mxu0 %v6253_v22  ;;  %v6040_v22 = vpop.f32.mrf.mxu1 }
 0xbc0   :  { %3544 = vmatmul.mubr.f32.gmra.mxu0 %v6254_v25 }
 0xbc1   :  { %3548 = vmatprep.mubr.f32.mxu0 %v6255_v18 }
 0xbc4   :  { %3549 = vmatmul.mubr.f32.gmra.mxu0 %v6256_v14  ;;  %v6046_v14 = vpop.f32.mrf.mxu1 }
 0xbc5   :  { %3553 = vmatprep.mubr.f32.mxu0 %v6257_v4 }
 0xbc8   :  { %3554 = vmatmul.mubr.f32.gmra.mxu0 %v6258_v10 }
 0xbc9   :  { %3558 = vmatprep.mubr.f32.mxu0 %v6259_v19  ;;  %v6052_v19 = vpop.f32.mrf.mxu1 }
 0xbcc   :  { %3559 = vmatmul.mubr.f32.gmra.mxu0 %v6260_v16 }
 0xbcd   :  { %3563 = vmatprep.mubr.f32.mxu0 %v6261_v20 }
 0xbd0   :  { %3564 = vmatmul.mubr.f32.gmra.mxu0 %v6262_v40  ;;  %v6058_v40 = vpop.f32.mrf.mxu1 }
 0xbd1   :  { %3568 = vmatprep.mubr.f32.mxu0 %v6263_v48 }
 0xbd4   :  { %3569 = vmatmul.mubr.f32.gmra.mxu0 %v6264_v12 }
 0xbd5   :  { %3573 = vmatprep.mubr.f32.mxu0 %v6265_v13 }
 0xbd8   :  { %3574 = vmatmul.mubr.f32.gmra.mxu0 %v6266_v51  ;;  %v4037_v51 = vadd.f32 %v4036_v36, %v4035_v49  ;;  %v4043_v36 = vadd.f32 %v4042_v56, %v4041_v44 }
 0xbd9   :  { %3578 = vmatprep.mubr.f32.mxu0 %v6267_v30  ;;  %v6062_v30 = vpop.f32.mrf.mxu1 }
 0xbdc   :  { %3579 = vmatmul.mubr.f32.gmra.mxu0 %v6268_v17 }
 0xbdd   :  { %3583 = vmatprep.mubr.f32.mxu0 %v6269_v45 }
 0xbe0   :  { %3584 = vmatmul.mubr.f32.gmra.mxu0 %v6270_v46 }
 0xbe1   :  { %3588 = vmatprep.mubr.f32.mxu0 %v6271_v15 }
 0xbe4   :  { %3589 = vmatmul.mubr.f32.gmra.mxu0 %v6272_v24 }
 0xbe5   :  { %3593 = vmatprep.mubr.f32.mxu0 %v6273_v8  ;;  %v4040_v8 = vadd.f32 %v4039_v27, %v4038_v11 }
 0xbe8   :  { %3594 = vmatmul.mubr.f32.gmra.mxu0 %v6274_v29 }
 0xbe9   :  { %3598 = vmatprep.mubr.f32.mxu0 %v6275_v42  ;;  %v6064_v42 = vpop.f32.mrf.mxu1 }
 0xbec   :  { %3599 = vmatmul.mubr.f32.gmra.mxu0 %v6276_v0 }
 0xbed   :  { %3603 = vmatprep.mubr.f32.mxu0 %v6277_v32 }
 0xbf0   :  { %3604 = vmatmul.mubr.f32.gmra.mxu0 %v6278_v21 }
 0xc34   :  { %v3955_v23 = vpop.f32.mrf.mxu0 }
 0xc36   :  { %v3956_v62 = vpop.f32.mrf.mxu0 }
 0xc37   :  { %v3957_v12 = vadd.f32 %v3956_v62, %v3955_v23 }
 0xc38   :  { %v3958_v37 = vpop.f32.mrf.mxu0 }
 0xc39   :  { %v3386_v45 = vadd.f32 %v4037_v51, %v3957_v12 }
 0xc3a   :  { %v3959_v28 = vpop.f32.mrf.mxu0 }
 0xc3b   :  { %v3960_v46 = vadd.f32 %v3959_v28, %v3958_v37 }
 0xc3c   :  { %v3961_v58 = vpop.f32.mrf.mxu0 }
 0xc3d   :  { %v3391_v32 = vadd.f32 %v4040_v8, %v3960_v46 }
 0xc3e   :  { %v3962_v33 = vpop.f32.mrf.mxu0 }
 0xc3f   :  { %v3963_v21 = vadd.f32 %v3962_v33, %v3961_v58 }
 0xc40   :  { %v3964_v41 = vpop.f32.mrf.mxu0 }
 0xc41   :  { %v3396_v37 = vadd.f32 %v4043_v36, %v3963_v21  ;;  %v4058_v36 = vadd.f32 %v6052_v19, %v6046_v14 }
 0xc42   :  { %v3965_v39 = vpop.f32.mrf.mxu0 }
 0xc43   :  { %v3966_v28 = vadd.f32 %v3965_v39, %v3964_v41  ;;  %v4049_v39 = vadd.f32 %v4048_v59, %v4047_v53  ;;  %v4055_v59 = vadd.f32 %v6040_v22, %v6034_v35 }
 0xc44   :  { %v6002_v2 = vpop.f32.mrf.mxu0 }
 0xc46   :  { %v6004_v47 = vpop.f32.mrf.mxu0 }
 0xc48   :  { %v6006_v50 = vpop.f32.mrf.mxu0 }
 0xc4a   :  { %v6008_v6 = vpop.f32.mrf.mxu0 }
 0xc4c   :  { %v6010_v52 = vpop.f32.mrf.mxu0 }
 0xc4e   :  { %v6012_v60 = vpop.f32.mrf.mxu0 }
 0xc4f   :  { %v3975_v53 = vadd.f32 %v6012_v60, %v6010_v52 }
 0xc50   :  { %v6014_v43 = vpop.f32.mrf.mxu0 }
 0xc52   :  { %v6016_v55 = vpop.f32.mrf.mxu0 }
 0xc54   :  { %v6018_v57 = vpop.f32.mrf.mxu0 }
 0xc56   :  { %v6020_v61 = vpop.f32.mrf.mxu0 }
 0xc57   :  { %v3981_v22 = vadd.f32 %v6020_v61, %v6018_v57 }
 0xc58   :  { %v6022_v63 = vpop.f32.mrf.mxu0 }
 0xc5a   :  { %v6026_v3 = vpop.f32.mrf.mxu0 }
 0xc5b   :  { %v3984_v19 = vadd.f32 %v6026_v3, %v6022_v63 }
 0xc5c   :  { %v6028_v5 = vpop.f32.mrf.mxu0 }
 0xc5e   :  { %v6030_v7 = vpop.f32.mrf.mxu0 }
 0xc60   :  { %v6032_v38 = vpop.f32.mrf.mxu0 }
 0xc62   :  { %v6036_v9 = vpop.f32.mrf.mxu0 }
 0xc64   :  { %v6038_v31 = vpop.f32.mrf.mxu0 }
 0xc66   :  { %v6042_v25 = vpop.f32.mrf.mxu0 }
 0xc68   :  { %v6044_v18 = vpop.f32.mrf.mxu0 }
 0xc6a   :  { %v6048_v4 = vpop.f32.mrf.mxu0 }
 0xc6c   :  { %v6050_v10 = vpop.f32.mrf.mxu0 }
 0xc6e   :  { %v6054_v16 = vpop.f32.mrf.mxu0 }
 0xc70   :  { %v6056_v20 = vpop.f32.mrf.mxu0 }
 0xc72   :  { %v6060_v48 = vpop.f32.mrf.mxu0 }
 0xc73   :  { %6279 = vst [vmem:[#allocation56_spill] sm:$0xff] %v6060_v48  ;;  %v4063_v48 = vpop.f32.mrf.mxu1 }
 0xc74   :  { %v4115_v13 = vpop.f32.mrf.mxu0 }
 0xc75   :  { %v4065_v33 = vpop.f32.mrf.mxu1 }
 0xc76   :  { %v4116_v17 = vpop.f32.mrf.mxu0 }
 0xc77   :  { %v4117_v15 = vadd.f32 %v4116_v17, %v4115_v13  ;;  %v4046_v13 = vadd.f32 %v4045_v54, %v4044_v34  ;;  %v4066_v46 = vpop.f32.mrf.mxu1  ;;  %v3972_v34 = vadd.f32 %v6008_v6, %v6006_v50 }
 0xc78   :  { %v4118_v24 = vpop.f32.mrf.mxu0 }
 0xc79   :  { %v3531_v29 = vadd.f32 %v4117_v15, %v3386_v45  ;;  %v3401_v17 = vadd.f32 %v4046_v13, %v3966_v28  ;;  %v3969_v45 = vadd.f32 %v6004_v47, %v6002_v2  ;;  %v4052_v47 = vadd.f32 %v4051_v26, %v6024_v1 }
 0xc7a   :  { %v4119_v0 = vpop.f32.mrf.mxu0  ;;  %v3416_v1 = vadd.f32 %v4055_v59, %v3975_v53  ;;  %v3978_v26 = vadd.f32 %v6016_v55, %v6014_v43  ;;  %v4061_v28 = vadd.f32 %v6062_v30, %v6058_v40  ;;  %v3987_v40 = vadd.f32 %v6030_v7, %v6028_v5 }
 0xc7b   :  { %3609 = vst [vmem:[%s6161_s15] sm:$0xff] %v3531_v29  ;;  %v4120_v23 = vadd.f32 %v4119_v0, %v4118_v24  ;;  %v3406_v24 = vadd.f32 %v4049_v39, %v3969_v45  ;;  %v4068_v29 = vpop.f32.mrf.mxu1  ;;  %v4067_v30 = vadd.f32 %v4066_v46, %v4065_v33  ;;  %v3993_v33 = vadd.f32 %v6042_v25, %v6038_v31 }
 0xc7c   :  { %v4121_v49 = vpop.f32.mrf.mxu0  ;;  %v3421_v35 = vadd.f32 %v4058_v36, %v3978_v26  ;;  %v3426_v14 = vadd.f32 %v4061_v28, %v3981_v22  ;;  %v6280_v36 = vld [vmem:[#allocation56_spill] sm:$0xff] }
 0xc7d   :  { %v3536_v62 = vadd.f32 %v4120_v23, %v3391_v32  ;;  %v3411_v32 = vadd.f32 %v4052_v47, %v3972_v34  ;;  %v4069_v23 = vpop.f32.mrf.mxu1 }
 0xc7e   :  { %v4122_v12 = vpop.f32.mrf.mxu0  ;;  %v4070_v7 = vadd.f32 %v4069_v23, %v4068_v29  ;;  %v3996_v29 = vadd.f32 %v6048_v4, %v6044_v18  ;;  %v3999_v23 = vadd.f32 %v6054_v16, %v6050_v10 }
 0xc7f   :  { %3610 = vst [vmem:[%s6161_s15 + $0x8] sm:$0xff] %v3536_v62  ;;  %v4123_v11 = vadd.f32 %v4122_v12, %v4121_v49  ;;  %v4071_v12 = vpop.f32.mrf.mxu1 }
 0xc80   :  { %v4124_v27 = vpop.f32.mrf.mxu0 }
 0xc81   :  { %v3541_v58 = vadd.f32 %v4123_v11, %v3396_v37 }
 0xc82   :  { %v4125_v51 = vpop.f32.mrf.mxu0 }
 0xc83   :  { %3611 = vst [vmem:[%s6161_s15 + $0x10] sm:$0xff] %v3541_v58  ;;  %v4126_v44 = vadd.f32 %v4125_v51, %v4124_v27  ;;  %v4072_v27 = vpop.f32.mrf.mxu1  ;;  %v4064_v58 = vadd.f32 %v4063_v48, %v6064_v42  ;;  %v3990_v48 = vadd.f32 %v6036_v9, %v6032_v38 }
 0xc84   :  { %v4127_v41 = vpop.f32.mrf.mxu0  ;;  %v4073_v9 = vadd.f32 %v4072_v27, %v4071_v12 }
 0xc85   :  { %v3546_v56 = vadd.f32 %v4126_v44, %v3401_v17  ;;  %v4074_v17 = vpop.f32.mrf.mxu1  ;;  %v3431_v44 = vadd.f32 %v4064_v58, %v3984_v19 }
 0xc86   :  { %v4128_v15 = vpop.f32.mrf.mxu0 }
 0xc87   :  { %3612 = vst [vmem:[%s6161_s15 + $0x18] sm:$0xff] %v3546_v56  ;;  %v4129_v54 = vadd.f32 %v4128_v15, %v4127_v41  ;;  %v4075_v39 = vpop.f32.mrf.mxu1  ;;  %v3436_v15 = vadd.f32 %v4067_v30, %v3987_v40 }
 0xc88   :  { %v4130_v2 = vpop.f32.mrf.mxu0  ;;  %v4076_v25 = vadd.f32 %v4075_v39, %v4074_v17 }
 0xc89   :  { %v3551_v8 = vadd.f32 %v4129_v54, %v3406_v24  ;;  %v4077_v34 = vpop.f32.mrf.mxu1 }
 0xc8a   :  { %v4131_v0 = vpop.f32.mrf.mxu0 }
 0xc8b   :  { %3613 = vst [vmem:[%s6161_s15 + $0x20] sm:$0xff] %v3551_v8  ;;  %v4132_v50 = vadd.f32 %v4131_v0, %v4130_v2  ;;  %v3441_v2 = vadd.f32 %v4070_v7, %v3990_v48  ;;  %v4078_v8 = vpop.f32.mrf.mxu1 }
 0xc8c   :  { %v4133_v6 = vpop.f32.mrf.mxu0  ;;  %v4079_v4 = vadd.f32 %v4078_v8, %v4077_v34 }
 0xc8d   :  { %v3556_v21 = vadd.f32 %v4132_v50, %v3411_v32  ;;  %v3446_v32 = vadd.f32 %v4073_v9, %v3993_v33 }
 0xc8e   :  { %v4134_v49 = vpop.f32.mrf.mxu0 }
 0xc8f   :  { %3614 = vst [vmem:[%s6161_s15 + $0x28] sm:$0xff] %v3556_v21  ;;  %v4135_v52 = vadd.f32 %v4134_v49, %v4133_v6  ;;  %v4080_v6 = vpop.f32.mrf.mxu1  ;;  %v3451_v21 = vadd.f32 %v4076_v25, %v3996_v29 }
 0xc90   :  { %v4136_v60 = vpop.f32.mrf.mxu0 }
 0xc91   :  { %v3561_v62 = vadd.f32 %v4135_v52, %v3416_v1  ;;  %v4081_v26 = vpop.f32.mrf.mxu1 }
 0xc92   :  { %v4137_v37 = vpop.f32.mrf.mxu0  ;;  %v4082_v16 = vadd.f32 %v4081_v26, %v4080_v6 }
 0xc93   :  { %3615 = vst [vmem:[%s6161_s15 + $0x30] sm:$0xff] %v3561_v62  ;;  %v4138_v43 = vadd.f32 %v4137_v37, %v4136_v60  ;;  %v3456_v60 = vadd.f32 %v4079_v4, %v3999_v23  ;;  %v4002_v62 = vadd.f32 %v6280_v36, %v6056_v20 }
 0xc94   :  { %v4139_v55 = vpop.f32.mrf.mxu0 }
 0xc95   :  { %v3566_v11 = vadd.f32 %v4138_v43, %v3421_v35  ;;  %v3461_v22 = vadd.f32 %v4082_v16, %v4002_v62 }
 0xc96   :  { %v4140_v13 = vpop.f32.mrf.mxu0 }
 0xc97   :  { %3616 = vst [vmem:[%s6161_s15 + $0x38] sm:$0xff] %v3566_v11  ;;  %v4141_v57 = vadd.f32 %v4140_v13, %v4139_v55 }
 0xc98   :  { %v4142_v61 = vpop.f32.mrf.mxu0 }
 0xc99   :  { %v3571_v51 = vadd.f32 %v4141_v57, %v3426_v14 }
 0xc9a   :  { %v4143_v45 = vpop.f32.mrf.mxu0 }
 0xc9b   :  { %3617 = vst [vmem:[%s6161_s15 + $0x40] sm:$0xff] %v3571_v51  ;;  %v4144_v63 = vadd.f32 %v4143_v45, %v4142_v61 }
 0xc9c   :  { %v4145_v3 = vpop.f32.mrf.mxu0 }
 0xc9d   :  { %v3576_v41 = vadd.f32 %v4144_v63, %v3431_v44 }
 0xc9e   :  { %v4146_v56 = vpop.f32.mrf.mxu0 }
 0xc9f   :  { %3618 = vst [vmem:[%s6161_s15 + $0x48] sm:$0xff] %v3576_v41  ;;  %v4147_v42 = vadd.f32 %v4146_v56, %v4145_v3 }
 0xca0   :  { %v4148_v5 = vpop.f32.mrf.mxu0 }
 0xca1   :  { %v3581_v24 = vadd.f32 %v4147_v42, %v3436_v15 }
 0xca2   :  { %v4149_v54 = vpop.f32.mrf.mxu0 }
 0xca3   :  { %3619 = vst [vmem:[%s6161_s15 + $0x50] sm:$0xff] %v3581_v24  ;;  %v4150_v46 = vadd.f32 %v4149_v54, %v4148_v5 }
 0xca4   :  { %v4151_v38 = vpop.f32.mrf.mxu0 }
 0xca5   :  { %v3586_v47 = vadd.f32 %v4150_v46, %v3441_v2 }
 0xca6   :  { %v4152_v0 = vpop.f32.mrf.mxu0 }
 0xca7   :  { %3620 = vst [vmem:[%s6161_s15 + $0x58] sm:$0xff] %v3586_v47  ;;  %v4153_v53 = vadd.f32 %v4152_v0, %v4151_v38 }
 0xca8   :  { %v4154_v31 = vpop.f32.mrf.mxu0 }
 0xca9   :  { %v3591_v50 = vadd.f32 %v4153_v53, %v3446_v32 }
 0xcaa   :  { %v4155_v59 = vpop.f32.mrf.mxu0 }
 0xcab   :  { %3621 = vst [vmem:[%s6161_s15 + $0x60] sm:$0xff] %v3591_v50  ;;  %v4156_v49 = vadd.f32 %v4155_v59, %v4154_v31 }
 0xcac   :  { %v4157_v18 = vpop.f32.mrf.mxu0 }
 0xcad   :  { %v3596_v1 = vadd.f32 %v4156_v49, %v3451_v21 }
 0xcae   :  { %v4158_v52 = vpop.f32.mrf.mxu0 }
 0xcaf   :  { %3622 = vst [vmem:[%s6161_s15 + $0x68] sm:$0xff] %v3596_v1  ;;  %v4159_v12 = vadd.f32 %v4158_v52, %v4157_v18 }
 0xcb0   :  { %v4160_v10 = vpop.f32.mrf.mxu0 }
 0xcb1   :  { %v3601_v37 = vadd.f32 %v4159_v12, %v3456_v60 }
 0xcb2   :  { %v4161_v35 = vpop.f32.mrf.mxu0 }
 0xcb3   :  { %3623 = vst [vmem:[%s6161_s15 + $0x70] sm:$0xff] %v3601_v37  ;;  %v4162_v43 = vadd.f32 %v4161_v35, %v4160_v10 }
 0xcb5   :  { %v3606_v55 = vadd.f32 %v4162_v43, %v3461_v22 }
 0xcb7   :  { %3624 = vst [vmem:[%s6161_s15 + $0x78] sm:$0xff] %v3606_v55 }
 0xcb8   :  { %3629 = vsyncpa [#allocation3], 1 }
 0xcb9   :  { %3630 = vsyncpa [#allocation5], 1 }
 0xcba   :  { %3631 = vsyncpa [#allocation8], 1 }
 0xcbb   :  { %3632 = vsyncpa [#allocation11], 1 }
 0xcbc   :  { %3633 = vsyncpa [#allocation14], 1 }
 0xcbd   :  { %3634 = vsyncpa [#allocation17], 1 }

</bundles_post_ra>
